<compile_context>
chip_gen: v6e
topology: v6e:2x2x1
jax: 0.10.0
libtpu: 0.0.40
codegen_flags: <defaults>
</compile_context>

<pallas_src>
import functools

import jax
import jax.numpy as jnp
from jax.experimental import pallas as pl
from jax.experimental.pallas import tpu as pltpu

EPS = 1e-5          # nn.BatchNorm2d default eps
_LANE = 128


def _round_up(n, m):
    return (n + m - 1) // m * m


def _pad_last(a, to):
    if a.shape[-1] == to:
        return a
    pad = [(0, 0)] * (a.ndim - 1) + [(0, to - a.shape[-1])]
    return jnp.pad(a, pad)


# ----------------------------- in-kernel helpers -----------------------------

def _build_window(xm_ref, xt_ref, xb_ref, sc_ref, sh_ref, cdt):
    """Build the (TH+2, W+2, Cp) conv window for this row tile.

    xm_ref : (TH, W+2, Cp) main rows, xt_ref/xb_ref: clamped 1-row halos above/below.
    If sc_ref/sh_ref given, apply fused BN+ReLU (pre-activation of this conv's input) and
    re-zero the two border columns; always zero the halo rows at the image boundary.
    """
    i, nt = pl.program_id(1), pl.num_programs(1)
    _, wp2, _ = xm_ref.shape
    w = wp2 - 2
    main, top, bot = xm_ref[...], xt_ref[...], xb_ref[...]
    if sc_ref is not None:
        sc, sh = sc_ref[...], sh_ref[...]
        col = jax.lax.broadcasted_iota(jnp.int32, (1, wp2, 1), 1)
        cmask = jnp.logical_and(col >= 1, col <= w)

        def fix(v):
            a = jnp.maximum(v.astype(jnp.float32) * sc + sh, 0.0)
            return jnp.where(cmask, a, 0.0)

        main, top, bot = fix(main), fix(top), fix(bot)
    top = top * (i > 0).astype(top.dtype)
    bot = bot * (i < nt - 1).astype(bot.dtype)
    return jnp.concatenate([top, main, bot], axis=0).astype(cdt)


def _conv9(xin, w_ref):
    """3x3 conv as 9 accumulating MXU matmuls.  xin: (TH+2, W+2, Cp) cdt,
    w_ref: (9, Cp, CoutP).  Returns (TH*W, CoutP) float32."""
    thp2, wp2, cp = xin.shape
    th, w = thp2 - 2, wp2 - 2
    acc = None
    for kh in range(3):
        for kw in range(3):
            win = xin[kh:kh + th, kw:kw + w, :].reshape(th * w, cp)
            part = jnp.dot(win, w_ref[kh * 3 + kw],
                           preferred_element_type=jnp.float32)
            acc = part if acc is None else acc + part
    return acc


def _emit_conv(acc, y_ref, sum_ref, sq_ref, pad_out):
    """Write the conv tile (optionally width-padded with zero border columns) and
    accumulate per-image BN partial sums into the resident output rows."""
    i = pl.program_id(1)
    if pad_out:
        th, wp2, c = y_ref.shape
        w = wp2 - 2
        y = acc.reshape(th, w, c).astype(y_ref.dtype)
        z = jnp.zeros((th, 1, c), y_ref.dtype)
        y_ref[...] = jnp.concatenate([z, y, z], axis=1)
    else:
        th, w, c = y_ref.shape
        y_ref[...] = acc.reshape(th, w, c).astype(y_ref.dtype)

    @pl.when(i == 0)
    def _():
        sum_ref[...] = jnp.zeros_like(sum_ref)
        sq_ref[...] = jnp.zeros_like(sq_ref)

    sum_ref[...] += jnp.sum(acc, axis=0, keepdims=True)
    sq_ref[...] += jnp.sum(acc * acc, axis=0, keepdims=True)


# ------------------------------- Pallas kernels -------------------------------

def _conv_stats_kernel(xm, xt, xb, w, y_ref, sum_ref, sq_ref, *, pad_out, cdt):
    xin = _build_window(xm, xt, xb, None, None, cdt)
    _emit_conv(_conv9(xin, w), y_ref, sum_ref, sq_ref, pad_out)


def _conv_prebn_stats_kernel(xm, xt, xb, sc, sh, w, y_ref, sum_ref, sq_ref, *, pad_out, cdt):
    xin = _build_window(xm, xt, xb, sc, sh, cdt)
    _emit_conv(_conv9(xin, w), y_ref, sum_ref, sq_ref, pad_out)


def _conv_prebn_stats_skip_kernel(xm, xt, xb, sc, sh, w, xs, ws,
                                  y_ref, sum_ref, sq_ref, ssum_ref, ssq_ref,
                                  *, pad_out, cdt):
    xin = _build_window(xm, xt, xb, sc, sh, cdt)
    _emit_conv(_conv9(xin, w), y_ref, sum_ref, sq_ref, pad_out)

    # Skip branch 1x1 conv: computed only for its BN statistics (values recomputed in pass B).
    th, w_, cinp = xs.shape
    s = jnp.dot(xs[...].reshape(th * w_, cinp), ws[...],
                preferred_element_type=jnp.float32)
    i = pl.program_id(1)

    @pl.when(i == 0)
    def _():
        ssum_ref[...] = jnp.zeros_like(ssum_ref)
        ssq_ref[...] = jnp.zeros_like(ssq_ref)

    ssum_ref[...] += jnp.sum(s, axis=0, keepdims=True)
    ssq_ref[...] += jnp.sum(s * s, axis=0, keepdims=True)


def _bn_identity_relu_kernel(y_ref, sc_ref, sh_ref, xs_ref, o_ref):
    main = y_ref[...].astype(jnp.float32) * sc_ref[...] + sh_ref[...]
    o_ref[...] = jnp.maximum(main + xs_ref[...].astype(jnp.float32), 0.0)


def _bn_skipconv_relu_kernel(y_ref, sc_ref, sh_ref, xs_ref, ws_ref, ssc_ref, ssh_ref, o_ref):
    tb, w, c = o_ref.shape
    cinp = xs_ref.shape[-1]
    main = y_ref[...].astype(jnp.float32) * sc_ref[...] + sh_ref[...]
    s = jnp.dot(xs_ref[...].reshape(tb * w, cinp), ws_ref[...],
                preferred_element_type=jnp.float32).reshape(tb, w, c)
    o_ref[...] = jnp.maximum(main + s * ssc_ref[...] + ssh_ref[...], 0.0)


# ------------------------------ pallas_call glue ------------------------------

def _vmem_limit_bytes():
    try:
        cap = int(pltpu.get_tpu_info().vmem_capacity_bytes)
    except Exception:
        cap = 64 * 1024 * 1024        # conservative (v7x-sized) fallback
    return min(cap * 3 // 4, 96 * 1024 * 1024)


def _pick_tile_rows(H, W, cin_p, cout_p, mid_bytes, budget, max_m=2048):
    """Largest TH dividing H whose per-step working set (stage-2 skip variant, the
    heaviest) fits the VMEM budget, with the M-tile capped at max_m rows."""
    cmax = max(cin_p, cout_p)
    wp2 = W + 2
    best = 1
    for th in range(1, H + 1):
        if H % th or th * W > max_m:
            continue
        m = th * W
        dbl = 2 * (th * wp2 * cmax * mid_bytes            # conv-input main block
                   + 2 * wp2 * cmax * mid_bytes           # 1-row halos
                   + m * cin_p * mid_bytes                # skip-branch x tile
                   + m * cout_p * mid_bytes               # conv output block
                   + (9 * cmax + cin_p) * cout_p * mid_bytes   # resident weights
                   + 16 * cout_p * 4)                     # scale/shift/stat rows
        live = ((th + 2) * wp2 * cmax * (4 + mid_bytes)   # window (pre-BN f32 + cdt copy)
                + m * cmax * mid_bytes                    # one shifted-window operand
                + 3 * m * cout_p * 4)                     # acc + matmul result + skip matmul
        if dbl + live <= budget:
            best = th
    return best


def _pick_tile_rows_b(H, W, cin_p, cout_p, mid_bytes, budget, max_m=8192):
    """Pass B (pure FMA / small matmul + ReLU) tile: decoupled from the conv tile."""
    best = 1
    for th in range(1, H + 1):
        if H % th or th * W > max_m:
            continue
        m = th * W
        need = (2 * (m * cout_p * mid_bytes + m * cin_p * 4 + m * cout_p * 4
                     + cin_p * cout_p * mid_bytes)
                + 3 * m * cout_p * 4)
        if need <= budget:
            best = th
    return best


def _conv_specs(H, TH, Wp2, Cp):
    main = pl.BlockSpec((None, TH, Wp2, Cp), lambda n, i: (n, i, 0, 0))
    top = pl.BlockSpec((None, 1, Wp2, Cp),
                       lambda n, i: (n, jnp.maximum(i * TH - 1, 0), 0, 0))
    bot = pl.BlockSpec((None, 1, Wp2, Cp),
                       lambda n, i: (n, jnp.minimum((i + 1) * TH, H - 1), 0, 0))
    return main, top, bot


def _conv_stats_call(xin, w, *, pre, pad_out, tile_rows, out_dtype, cdt, vlim):
    N, H, Wp2, Cp = xin.shape
    W = Wp2 - 2
    TH, HT = tile_rows, H // tile_rows
    CoutP = w.shape[-1]
    main, top, bot = _conv_specs(H, TH, Wp2, Cp)
    wspec = pl.BlockSpec(w.shape, lambda n, i: (0, 0, 0))
    chan = pl.BlockSpec((1, CoutP), lambda n, i: (0, 0))
    nrow = pl.BlockSpec((None, 1, CoutP), lambda n, i: (n, 0, 0))
    y_w = Wp2 if pad_out else W
    yspec = pl.BlockSpec((None, TH, y_w, CoutP), lambda n, i: (n, i, 0, 0))
    out_shape = (jax.ShapeDtypeStruct((N, H, y_w, CoutP), out_dtype),
                 jax.ShapeDtypeStruct((N, 1, CoutP), jnp.float32),
                 jax.ShapeDtypeStruct((N, 1, CoutP), jnp.float32))
    if pre is None:
        kernel = functools.partial(_conv_stats_kernel, pad_out=pad_out, cdt=cdt)
        in_specs = [main, top, bot, wspec]
        args = (xin, xin, xin, w)
    else:
        sc, sh = pre
        kernel = functools.partial(_conv_prebn_stats_kernel, pad_out=pad_out, cdt=cdt)
        in_specs = [main, top, bot, chan, chan, wspec]
        args = (xin, xin, xin, sc, sh, w)
    return pl.pallas_call(
        kernel,
        out_shape=out_shape,
        grid_spec=pltpu.PrefetchScalarGridSpec(
            num_scalar_prefetch=0, grid=(N, HT),
            in_specs=in_specs, out_specs=(yspec, nrow, nrow)),
        compiler_params=pltpu.CompilerParams(
            dimension_semantics=("parallel", "arbitrary"),
            vmem_limit_bytes=vlim),
    )(*args)


def _conv_stats_skip_call(y1, sc1, sh1, w, xC, ws, *, tile_rows, out_dtype, cdt, vlim):
    N, H, Wp2, Cp = y1.shape
    W = Wp2 - 2
    TH, HT = tile_rows, H // tile_rows
    CoutP, CinP = w.shape[-1], xC.shape[-1]
    main, top, bot = _conv_specs(H, TH, Wp2, Cp)
    chan = pl.BlockSpec((1, CoutP), lambda n, i: (0, 0))
    wspec = pl.BlockSpec(w.shape, lambda n, i: (0, 0, 0))
    wsspec = pl.BlockSpec(ws.shape, lambda n, i: (0, 0))
    xsspec = pl.BlockSpec((None, TH, W, CinP), lambda n, i: (n, i, 0, 0))
    nrow = pl.BlockSpec((None, 1, CoutP), lambda n, i: (n, 0, 0))
    yspec = pl.BlockSpec((None, TH, W, CoutP), lambda n, i: (n, i, 0, 0))
    kernel = functools.partial(_conv_prebn_stats_skip_kernel, pad_out=False, cdt=cdt)
    return pl.pallas_call(
        kernel,
        out_shape=(jax.ShapeDtypeStruct((N, H, W, CoutP), out_dtype),
                   jax.ShapeDtypeStruct((N, 1, CoutP), jnp.float32),
                   jax.ShapeDtypeStruct((N, 1, CoutP), jnp.float32),
                   jax.ShapeDtypeStruct((N, 1, CoutP), jnp.float32),
                   jax.ShapeDtypeStruct((N, 1, CoutP), jnp.float32)),
        grid_spec=pltpu.PrefetchScalarGridSpec(
            num_scalar_prefetch=0, grid=(N, HT),
            in_specs=[main, top, bot, chan, chan, wspec, xsspec, wsspec],
            out_specs=(yspec, nrow, nrow, nrow, nrow)),
        compiler_params=pltpu.CompilerParams(
            dimension_semantics=("parallel", "arbitrary"),
            vmem_limit_bytes=vlim),
    )(y1, y1, y1, sc1, sh1, w, xC, ws)


def _bn_identity_relu(y, sc, sh, xs, *, tile_rows, vlim):
    N, H, W, C = y.shape
    TB, HB = tile_rows, H // tile_rows
    CinP = xs.shape[-1]
    row = lambda c: pl.BlockSpec((None, TB, W, c), lambda n, i: (n, i, 0, 0))
    chan = pl.BlockSpec((1, C), lambda n, i: (0, 0))
    return pl.pallas_call(
        _bn_identity_relu_kernel,
        out_shape=jax.ShapeDtypeStruct((N, H, W, C), jnp.float32),
        grid_spec=pltpu.PrefetchScalarGridSpec(
            num_scalar_prefetch=0, grid=(N, HB),
            in_specs=[row(C), chan, chan, row(CinP)],
            out_specs=row(C)),
        compiler_params=pltpu.CompilerParams(
            dimension_semantics=("parallel", "parallel"),
            vmem_limit_bytes=vlim),
    )(y, sc, sh, xs)


def _bn_skipconv_relu(y, sc, sh, xs, ws, ssc, ssh, *, tile_rows, vlim):
    N, H, W, C = y.shape
    TB, HB = tile_rows, H // tile_rows
    CinP = xs.shape[-1]
    row = lambda c: pl.BlockSpec((None, TB, W, c), lambda n, i: (n, i, 0, 0))
    chan = pl.BlockSpec((1, C), lambda n, i: (0, 0))
    wsspec = pl.BlockSpec(ws.shape, lambda n, i: (0, 0))
    return pl.pallas_call(
        _bn_skipconv_relu_kernel,
        out_shape=jax.ShapeDtypeStruct((N, H, W, C), jnp.float32),
        grid_spec=pltpu.PrefetchScalarGridSpec(
            num_scalar_prefetch=0, grid=(N, HB),
            in_specs=[row(C), chan, chan, row(CinP), wsspec, chan, chan],
            out_specs=row(C)),
        compiler_params=pltpu.CompilerParams(
            dimension_semantics=("parallel", "parallel"),
            vmem_limit_bytes=vlim),
    )(y, sc, sh, xs, ws, ssc, ssh)


def _finalize_bn(sums, sqs, g, be, m_total):
    """Fold per-image partial sums -> train-mode BN (scale, shift).  Plain JAX (tiny)."""
    s = jnp.sum(sums, axis=0)                       # (1, C)
    q = jnp.sum(sqs, axis=0)
    mean = s / m_total
    var = jnp.maximum(q / m_total - mean * mean, 0.0)
    scale = g * jax.lax.rsqrt(var + EPS)
    shift = be - mean * scale
    return scale, shift


# ------------------------------ public wrapper ------------------------------

def residual_block_pallas(x, params, *, tile_rows=None, compute_dtype=jnp.bfloat16):
    """x: (N, H, W, Cin) float32 NHWC (== torch NCHW permuted).  compute_dtype controls the
    MXU input dtype AND the HBM dtype of the intermediate conv outputs (default bf16)."""
    N, H, W, Cin = x.shape
    Cout = params["w1"].shape[-1]
    CinP, CoutP = _round_up(Cin, _LANE), _round_up(Cout, _LANE)
    cdt = compute_dtype
    mid_dt = cdt
    mb = jnp.dtype(mid_dt).itemsize

    vlim = _vmem_limit_bytes()
    budget = int(vlim * 0.8)
    if tile_rows is None:
        tile_rows = _pick_tile_rows(H, W, CinP, CoutP, mb, budget)
    assert H % tile_rows == 0, "tile_rows must divide H"
    tb = _pick_tile_rows_b(H, W, CinP, CoutP, mb, budget)

    # Channel-pad params; gamma/beta pad with 0 so padded lanes stay exactly 0 through BN.
    # Conv biases dropped: cancelled exactly by train-mode BN mean subtraction.
    w1 = jnp.pad(params["w1"], ((0, 0), (0, 0), (0, CinP - Cin), (0, CoutP - Cout)))
    w1 = w1.reshape(9, CinP, CoutP).astype(cdt)
    w2 = jnp.pad(params["w2"], ((0, 0), (0, 0), (0, CoutP - Cout), (0, CoutP - Cout)))
    w2 = w2.reshape(9, CoutP, CoutP).astype(cdt)
    g1, be1 = _pad_last(params["g1"], CoutP), _pad_last(params["be1"], CoutP)
    g2, be2 = _pad_last(params["g2"], CoutP), _pad_last(params["be2"], CoutP)

    xP = _pad_last(x, CinP)                                            # (N,H,W,CinP) f32
    xW = jnp.pad(xP, ((0, 0), (0, 0), (1, 1), (0, 0))).astype(cdt)     # width-padded, cdt

    m_total = N * H * W

    # ---- stage 1: conv1 + BN1 partial stats (width-padded cdt output, no h1 round trip) ----
    y1, s1, q1 = _conv_stats_call(xW, w1, pre=None, pad_out=True,
                                  tile_rows=tile_rows, out_dtype=mid_dt, cdt=cdt, vlim=vlim)
    sc1, sh1 = _finalize_bn(s1, q1, g1, be1, m_total)

    # ---- stage 2: fused BN1+ReLU -> conv2 + BN2 stats (+ skip stats), then pass B ----
    if "ws" in params:      # in_channels != out_channels: 1x1 conv + BN skip
        ws = jnp.pad(params["ws"], ((0, CinP - Cin), (0, CoutP - Cout))).astype(cdt)
        gs, bes = _pad_last(params["gs"], CoutP), _pad_last(params["bes"], CoutP)
        xC = xP.astype(cdt)
        y2, s2, q2, ss, sq = _conv_stats_skip_call(
            y1, sc1, sh1, w2, xC, ws,
            tile_rows=tile_rows, out_dtype=mid_dt, cdt=cdt, vlim=vlim)
        sc2, sh2 = _finalize_bn(s2, q2, g2, be2, m_total)
        ssc, ssh = _finalize_bn(ss, sq, gs, bes, m_total)
        out = _bn_skipconv_relu(y2, sc2, sh2, xC, ws, ssc, ssh, tile_rows=tb, vlim=vlim)
    else:                   # identity skip (Cin == Cout)
        y2, s2, q2 = _conv_stats_call(y1, w2, pre=(sc1, sh1), pad_out=False,
                                      tile_rows=tile_rows, out_dtype=mid_dt, cdt=cdt, vlim=vlim)
        sc2, sh2 = _finalize_bn(s2, q2, g2, be2, m_total)
        out = _bn_identity_relu(y2, sc2, sh2, xP, tile_rows=tb, vlim=vlim)

    return out[..., :Cout]


# ------------------------------ pure-JAX reference ------------------------------

def _conv2d_ref(x, w_hwio, b, pad):
    y = jax.lax.conv_general_dilated(
        x, w_hwio, window_strides=(1, 1), padding=[(pad, pad), (pad, pad)],
        dimension_numbers=("NHWC", "HWIO", "NHWC"),
        precision=jax.lax.Precision.HIGHEST)
    return y + b.reshape(1, 1, 1, -1)


def _bn_train_ref(x, g, be):
    m = jnp.mean(x, axis=(0, 1, 2), keepdims=True)
    v = jnp.mean((x - m) ** 2, axis=(0, 1, 2), keepdims=True)
    return (x - m) * jax.lax.rsqrt(v + EPS) * g.reshape(1, 1, 1, -1) + be.reshape(1, 1, 1, -1)


def residual_block_ref(x, params):
    h = _conv2d_ref(x, params["w1"], params["b1"], pad=1)
    h = jnp.maximum(_bn_train_ref(h, params["g1"], params["be1"]), 0.0)
    h = _conv2d_ref(h, params["w2"], params["b2"], pad=1)
    h = _bn_train_ref(h, params["g2"], params["be2"])
    if "ws" in params:
        sk = _conv2d_ref(x, params["ws"][None, None], params["bs"], pad=0)
        sk = _bn_train_ref(sk, params["gs"], params["bes"])
    else:
        sk = x
    return jnp.maximum(h + sk, 0.0)


# ------------------------------ deterministic params ------------------------------

def make_params(key, cin, cout):
    ks = jax.random.split(key, 12)
    p = {
        "w1": 0.1 * jax.random.normal(ks[0], (3, 3, cin, cout), jnp.float32),
        "b1": 0.1 * jax.random.normal(ks[1], (1, cout), jnp.float32),
        "g1": 1.0 + 0.1 * jax.random.normal(ks[2], (1, cout), jnp.float32),
        "be1": 0.1 * jax.random.normal(ks[3], (1, cout), jnp.float32),
        "w2": 0.1 * jax.random.normal(ks[4], (3, 3, cout, cout), jnp.float32),
        "b2": 0.1 * jax.random.normal(ks[5], (1, cout), jnp.float32),
        "g2": 1.0 + 0.1 * jax.random.normal(ks[6], (1, cout), jnp.float32),
        "be2": 0.1 * jax.random.normal(ks[7], (1, cout), jnp.float32),
    }
    if cin != cout:
        p["ws"] = 0.1 * jax.random.normal(ks[8], (cin, cout), jnp.float32)
        p["bs"] = 0.1 * jax.random.normal(ks[9], (1, cout), jnp.float32)
        p["gs"] = 1.0 + 0.1 * jax.random.normal(ks[10], (1, cout), jnp.float32)
        p["bes"] = 0.1 * jax.random.normal(ks[11], (1, cout), jnp.float32)
    return p


if __name__ == "__main__":
    key = jax.random.PRNGKey(0)
    kx, kp1, kp2 = jax.random.split(key, 3)

    # Case 1: in_channels != out_channels (1x1-conv + BN skip), default bf16 compute + bf16
    # HBM intermediates.  tile_rows=4 forces a multi-tile grid so the clamped halo rows,
    # in-kernel boundary masking and cross-tile BN-stat accumulation are all exercised.
    N, H, W, Cin, Cout = 2, 16, 16, 4, 8
    x = jax.random.normal(kx, (N, H, W, Cin), jnp.float32)   # NHWC; torch shape (2, 4, 16, 16)
    params = make_params(kp1, Cin, Cout)
    fwd1 = jax.jit(functools.partial(residual_block_pallas, tile_rows=4))
    out = jax.block_until_ready(fwd1(x, params))
    ref = residual_block_ref(x, params)
    assert out.shape == (N, H, W, Cout)
    err = float(jnp.max(jnp.abs(out - ref)))
    mae = float(jnp.mean(jnp.abs(out - ref)))
    assert err < 1.5e-1 and mae < 1.5e-2, f"bf16 skip-conv mismatch: max={err} mean={mae}"

    # Case 2: in_channels == out_channels (identity skip), f32 compute path, auto tiles.
    x2 = jax.random.normal(kx, (N, H, W, Cout), jnp.float32)
    params2 = make_params(kp2, Cout, Cout)
    fwd2 = jax.jit(functools.partial(residual_block_pallas, compute_dtype=jnp.float32))
    out2 = jax.block_until_ready(fwd2(x2, params2))
    ref2 = residual_block_ref(x2, params2)
    err2 = float(jnp.max(jnp.abs(out2 - ref2)))
    assert err2 < 1e-2, f"f32 identity mismatch: max abs err = {err2}"

    print("KERNEL_OK")
</pallas_src>

<mosaic_0001>
module attributes {stable_mosaic.version = 11 : i64} {
  func.func @_conv_stats_kernel(%arg0: i32, %arg1: i32, %arg2: memref<1x4x18x128xbf16, #tpu.memory_space<vmem>>, %arg3: memref<1x1x18x128xbf16, #tpu.memory_space<vmem>>, %arg4: memref<1x1x18x128xbf16, #tpu.memory_space<vmem>>, %arg5: memref<9x128x128xbf16, #tpu.memory_space<vmem>>, %arg6: memref<1x4x18x128xbf16, #tpu.memory_space<vmem>>, %arg7: memref<1x1x128xf32, #tpu.memory_space<vmem>>, %arg8: memref<1x1x128xf32, #tpu.memory_space<vmem>>) attributes {dimension_semantics = [#tpu.dimension_semantics<parallel>, #tpu.dimension_semantics<arbitrary>], iteration_bounds = array<i64: 2, 4>, scalar_prefetch = 0 : i64, scratch_operands = 0 : i64, tpu.core_type = #tpu.core_type<tc>, window_params = [{transform_indices = @transform_0, window_bounds = array<i64: 1, 4, 18, 128>}, {transform_indices = @transform_1, window_bounds = array<i64: 1, 1, 18, 128>}, {transform_indices = @transform_2, window_bounds = array<i64: 1, 1, 18, 128>}, {pipeline_mode = #tpu.pipeline_mode<synchronous>, transform_indices = @transform_3, window_bounds = array<i64: 9, 128, 128>}, {transform_indices = @transform_4, window_bounds = array<i64: 1, 4, 18, 128>}, {transform_indices = @transform_5, window_bounds = array<i64: 1, 1, 128>}, {transform_indices = @transform_6, window_bounds = array<i64: 1, 1, 128>}]} {
    %c0 = arith.constant 0 : index
    %c0_0 = arith.constant 0 : index
    %c0_1 = arith.constant 0 : index
    %c0_2 = arith.constant 0 : index
    %0 = vector.load %arg2[%c0, %c0_0, %c0_1, %c0_2] : memref<1x4x18x128xbf16, #tpu.memory_space<vmem>>, vector<1x4x18x128xbf16>
    %1 = vector.shape_cast %0 : vector<1x4x18x128xbf16> to vector<4x18x128xbf16>
    %c0_3 = arith.constant 0 : index
    %c0_4 = arith.constant 0 : index
    %c0_5 = arith.constant 0 : index
    %c0_6 = arith.constant 0 : index
    %2 = vector.load %arg3[%c0_3, %c0_4, %c0_5, %c0_6] : memref<1x1x18x128xbf16, #tpu.memory_space<vmem>>, vector<1x1x18x128xbf16>
    %3 = vector.shape_cast %2 : vector<1x1x18x128xbf16> to vector<1x18x128xbf16>
    %c0_7 = arith.constant 0 : index
    %c0_8 = arith.constant 0 : index
    %c0_9 = arith.constant 0 : index
    %c0_10 = arith.constant 0 : index
    %4 = vector.load %arg4[%c0_7, %c0_8, %c0_9, %c0_10] : memref<1x1x18x128xbf16, #tpu.memory_space<vmem>>, vector<1x1x18x128xbf16>
    %5 = vector.shape_cast %4 : vector<1x1x18x128xbf16> to vector<1x18x128xbf16>
    %c0_i32 = arith.constant 0 : i32
    %6 = arith.cmpi sgt, %arg1, %c0_i32 : i32
    %7 = arith.extui %6 : i1 to i32
    %8 = arith.sitofp %7 : i32 to f32
    %9 = arith.truncf %8 : f32 to bf16
    %10 = vector.broadcast %9 : bf16 to vector<1x18x128xbf16>
    %11 = arith.mulf %3, %10 : vector<1x18x128xbf16>
    %c3_i32 = arith.constant 3 : i32
    %12 = arith.cmpi slt, %arg1, %c3_i32 : i32
    %13 = arith.extui %12 : i1 to i32
    %14 = arith.sitofp %13 : i32 to f32
    %15 = arith.truncf %14 : f32 to bf16
    %16 = vector.broadcast %15 : bf16 to vector<1x18x128xbf16>
    %17 = arith.mulf %5, %16 : vector<1x18x128xbf16>
    %18 = tpu.concatenate %11, %1, %17 in 0 : vector<1x18x128xbf16>, vector<4x18x128xbf16>, vector<1x18x128xbf16> -> vector<6x18x128xbf16>
    %19 = vector.extract_strided_slice %18 {offsets = [0, 0, 0], sizes = [4, 16, 128], strides = [1, 1, 1]} : vector<6x18x128xbf16> to vector<4x16x128xbf16>
    %20 = vector.shape_cast %19 : vector<4x16x128xbf16> to vector<64x128xbf16>
    %c0_11 = arith.constant 0 : index
    %c0_12 = arith.constant 0 : index
    %c0_13 = arith.constant 0 : index
    %21 = vector.load %arg5[%c0_11, %c0_12, %c0_13] : memref<9x128x128xbf16, #tpu.memory_space<vmem>>, vector<1x128x128xbf16>
    %22 = vector.shape_cast %21 : vector<1x128x128xbf16> to vector<128x128xbf16>
    %cst = arith.constant dense<0.000000e+00> : vector<64x128xf32>
    %23 = tpu.matmul %20, %22, %cst {dimension_numbers = #tpu.dot_dimension_numbers<[1], [0], [0], [1], [0, 0, 1, 1], [], []>} : vector<64x128xbf16>, vector<128x128xbf16>, vector<64x128xf32> -> vector<64x128xf32>
    %24 = vector.extract_strided_slice %18 {offsets = [0, 1, 0], sizes = [4, 16, 128], strides = [1, 1, 1]} : vector<6x18x128xbf16> to vector<4x16x128xbf16>
    %25 = vector.shape_cast %24 : vector<4x16x128xbf16> to vector<64x128xbf16>
    %c1 = arith.constant 1 : index
    %c0_14 = arith.constant 0 : index
    %c0_15 = arith.constant 0 : index
    %26 = vector.load %arg5[%c1, %c0_14, %c0_15] : memref<9x128x128xbf16, #tpu.memory_space<vmem>>, vector<1x128x128xbf16>
    %27 = vector.shape_cast %26 : vector<1x128x128xbf16> to vector<128x128xbf16>
    %cst_16 = arith.constant dense<0.000000e+00> : vector<64x128xf32>
    %28 = tpu.matmul %25, %27, %cst_16 {dimension_numbers = #tpu.dot_dimension_numbers<[1], [0], [0], [1], [0, 0, 1, 1], [], []>} : vector<64x128xbf16>, vector<128x128xbf16>, vector<64x128xf32> -> vector<64x128xf32>
    %29 = arith.addf %23, %28 : vector<64x128xf32>
    %30 = vector.extract_strided_slice %18 {offsets = [0, 2, 0], sizes = [4, 16, 128], strides = [1, 1, 1]} : vector<6x18x128xbf16> to vector<4x16x128xbf16>
    %31 = vector.shape_cast %30 : vector<4x16x128xbf16> to vector<64x128xbf16>
    %c2 = arith.constant 2 : index
    %c0_17 = arith.constant 0 : index
    %c0_18 = arith.constant 0 : index
    %32 = vector.load %arg5[%c2, %c0_17, %c0_18] : memref<9x128x128xbf16, #tpu.memory_space<vmem>>, vector<1x128x128xbf16>
    %33 = vector.shape_cast %32 : vector<1x128x128xbf16> to vector<128x128xbf16>
    %cst_19 = arith.constant dense<0.000000e+00> : vector<64x128xf32>
    %34 = tpu.matmul %31, %33, %cst_19 {dimension_numbers = #tpu.dot_dimension_numbers<[1], [0], [0], [1], [0, 0, 1, 1], [], []>} : vector<64x128xbf16>, vector<128x128xbf16>, vector<64x128xf32> -> vector<64x128xf32>
    %35 = arith.addf %29, %34 : vector<64x128xf32>
    %36 = vector.extract_strided_slice %18 {offsets = [1, 0, 0], sizes = [4, 16, 128], strides = [1, 1, 1]} : vector<6x18x128xbf16> to vector<4x16x128xbf16>
    %37 = vector.shape_cast %36 : vector<4x16x128xbf16> to vector<64x128xbf16>
    %c3 = arith.constant 3 : index
    %c0_20 = arith.constant 0 : index
    %c0_21 = arith.constant 0 : index
    %38 = vector.load %arg5[%c3, %c0_20, %c0_21] : memref<9x128x128xbf16, #tpu.memory_space<vmem>>, vector<1x128x128xbf16>
    %39 = vector.shape_cast %38 : vector<1x128x128xbf16> to vector<128x128xbf16>
    %cst_22 = arith.constant dense<0.000000e+00> : vector<64x128xf32>
    %40 = tpu.matmul %37, %39, %cst_22 {dimension_numbers = #tpu.dot_dimension_numbers<[1], [0], [0], [1], [0, 0, 1, 1], [], []>} : vector<64x128xbf16>, vector<128x128xbf16>, vector<64x128xf32> -> vector<64x128xf32>
    %41 = arith.addf %35, %40 : vector<64x128xf32>
    %42 = vector.extract_strided_slice %18 {offsets = [1, 1, 0], sizes = [4, 16, 128], strides = [1, 1, 1]} : vector<6x18x128xbf16> to vector<4x16x128xbf16>
    %43 = vector.shape_cast %42 : vector<4x16x128xbf16> to vector<64x128xbf16>
    %c4 = arith.constant 4 : index
    %c0_23 = arith.constant 0 : index
    %c0_24 = arith.constant 0 : index
    %44 = vector.load %arg5[%c4, %c0_23, %c0_24] : memref<9x128x128xbf16, #tpu.memory_space<vmem>>, vector<1x128x128xbf16>
    %45 = vector.shape_cast %44 : vector<1x128x128xbf16> to vector<128x128xbf16>
    %cst_25 = arith.constant dense<0.000000e+00> : vector<64x128xf32>
    %46 = tpu.matmul %43, %45, %cst_25 {dimension_numbers = #tpu.dot_dimension_numbers<[1], [0], [0], [1], [0, 0, 1, 1], [], []>} : vector<64x128xbf16>, vector<128x128xbf16>, vector<64x128xf32> -> vector<64x128xf32>
    %47 = arith.addf %41, %46 : vector<64x128xf32>
    %48 = vector.extract_strided_slice %18 {offsets = [1, 2, 0], sizes = [4, 16, 128], strides = [1, 1, 1]} : vector<6x18x128xbf16> to vector<4x16x128xbf16>
    %49 = vector.shape_cast %48 : vector<4x16x128xbf16> to vector<64x128xbf16>
    %c5 = arith.constant 5 : index
    %c0_26 = arith.constant 0 : index
    %c0_27 = arith.constant 0 : index
    %50 = vector.load %arg5[%c5, %c0_26, %c0_27] : memref<9x128x128xbf16, #tpu.memory_space<vmem>>, vector<1x128x128xbf16>
    %51 = vector.shape_cast %50 : vector<1x128x128xbf16> to vector<128x128xbf16>
    %cst_28 = arith.constant dense<0.000000e+00> : vector<64x128xf32>
    %52 = tpu.matmul %49, %51, %cst_28 {dimension_numbers = #tpu.dot_dimension_numbers<[1], [0], [0], [1], [0, 0, 1, 1], [], []>} : vector<64x128xbf16>, vector<128x128xbf16>, vector<64x128xf32> -> vector<64x128xf32>
    %53 = arith.addf %47, %52 : vector<64x128xf32>
    %54 = vector.extract_strided_slice %18 {offsets = [2, 0, 0], sizes = [4, 16, 128], strides = [1, 1, 1]} : vector<6x18x128xbf16> to vector<4x16x128xbf16>
    %55 = vector.shape_cast %54 : vector<4x16x128xbf16> to vector<64x128xbf16>
    %c6 = arith.constant 6 : index
    %c0_29 = arith.constant 0 : index
    %c0_30 = arith.constant 0 : index
    %56 = vector.load %arg5[%c6, %c0_29, %c0_30] : memref<9x128x128xbf16, #tpu.memory_space<vmem>>, vector<1x128x128xbf16>
    %57 = vector.shape_cast %56 : vector<1x128x128xbf16> to vector<128x128xbf16>
    %cst_31 = arith.constant dense<0.000000e+00> : vector<64x128xf32>
    %58 = tpu.matmul %55, %57, %cst_31 {dimension_numbers = #tpu.dot_dimension_numbers<[1], [0], [0], [1], [0, 0, 1, 1], [], []>} : vector<64x128xbf16>, vector<128x128xbf16>, vector<64x128xf32> -> vector<64x128xf32>
    %59 = arith.addf %53, %58 : vector<64x128xf32>
    %60 = vector.extract_strided_slice %18 {offsets = [2, 1, 0], sizes = [4, 16, 128], strides = [1, 1, 1]} : vector<6x18x128xbf16> to vector<4x16x128xbf16>
    %61 = vector.shape_cast %60 : vector<4x16x128xbf16> to vector<64x128xbf16>
    %c7 = arith.constant 7 : index
    %c0_32 = arith.constant 0 : index
    %c0_33 = arith.constant 0 : index
    %62 = vector.load %arg5[%c7, %c0_32, %c0_33] : memref<9x128x128xbf16, #tpu.memory_space<vmem>>, vector<1x128x128xbf16>
    %63 = vector.shape_cast %62 : vector<1x128x128xbf16> to vector<128x128xbf16>
    %cst_34 = arith.constant dense<0.000000e+00> : vector<64x128xf32>
    %64 = tpu.matmul %61, %63, %cst_34 {dimension_numbers = #tpu.dot_dimension_numbers<[1], [0], [0], [1], [0, 0, 1, 1], [], []>} : vector<64x128xbf16>, vector<128x128xbf16>, vector<64x128xf32> -> vector<64x128xf32>
    %65 = arith.addf %59, %64 : vector<64x128xf32>
    %66 = vector.extract_strided_slice %18 {offsets = [2, 2, 0], sizes = [4, 16, 128], strides = [1, 1, 1]} : vector<6x18x128xbf16> to vector<4x16x128xbf16>
    %67 = vector.shape_cast %66 : vector<4x16x128xbf16> to vector<64x128xbf16>
    %c8 = arith.constant 8 : index
    %c0_35 = arith.constant 0 : index
    %c0_36 = arith.constant 0 : index
    %68 = vector.load %arg5[%c8, %c0_35, %c0_36] : memref<9x128x128xbf16, #tpu.memory_space<vmem>>, vector<1x128x128xbf16>
    %69 = vector.shape_cast %68 : vector<1x128x128xbf16> to vector<128x128xbf16>
    %cst_37 = arith.constant dense<0.000000e+00> : vector<64x128xf32>
    %70 = tpu.matmul %67, %69, %cst_37 {dimension_numbers = #tpu.dot_dimension_numbers<[1], [0], [0], [1], [0, 0, 1, 1], [], []>} : vector<64x128xbf16>, vector<128x128xbf16>, vector<64x128xf32> -> vector<64x128xf32>
    %71 = arith.addf %65, %70 : vector<64x128xf32>
    %72 = vector.shape_cast %71 : vector<64x128xf32> to vector<4x16x128xf32>
    %73 = arith.truncf %72 : vector<4x16x128xf32> to vector<4x16x128xbf16>
    %cst_38 = arith.constant 0.000000e+00 : bf16
    %74 = vector.broadcast %cst_38 : bf16 to vector<4x1x128xbf16>
    %75 = tpu.concatenate %74, %73, %74 in 1 : vector<4x1x128xbf16>, vector<4x16x128xbf16>, vector<4x1x128xbf16> -> vector<4x18x128xbf16>
    %c0_39 = arith.constant 0 : index
    %c0_40 = arith.constant 0 : index
    %c0_41 = arith.constant 0 : index
    %c0_42 = arith.constant 0 : index
    %76 = vector.load %arg6[%c0_39, %c0_40, %c0_41, %c0_42] : memref<1x4x18x128xbf16, #tpu.memory_space<vmem>>, vector<1x4x18x128xbf16>
    %77 = vector.shape_cast %76 : vector<1x4x18x128xbf16> to vector<4x18x128xbf16>
    %78 = vector.shape_cast %75 : vector<4x18x128xbf16> to vector<1x4x18x128xbf16>
    tpu.vector_store %arg6[%c0_39, %c0_40, %c0_41, %c0_42], %78 {strides = array<i32>} : memref<1x4x18x128xbf16, #tpu.memory_space<vmem>>, vector<1x4x18x128xbf16>,
    %c0_i32_43 = arith.constant 0 : i32
    %79 = arith.cmpi eq, %arg1, %c0_i32_43 : i32
    %80 = arith.extui %79 : i1 to i32
    %c0_i32_44 = arith.constant 0 : i32
    %81 = arith.cmpi ne, %80, %c0_i32_44 : i32
    scf.if %81 {
      %cst_59 = arith.constant 0.000000e+00 : f32
      %99 = vector.broadcast %cst_59 : f32 to vector<1x128xf32>
      %c0_60 = arith.constant 0 : index
      %c0_61 = arith.constant 0 : index
      %c0_62 = arith.constant 0 : index
      %100 = vector.load %arg7[%c0_60, %c0_61, %c0_62] : memref<1x1x128xf32, #tpu.memory_space<vmem>>, vector<1x1x128xf32>
      %101 = vector.shape_cast %100 : vector<1x1x128xf32> to vector<1x128xf32>
      %102 = vector.shape_cast %99 : vector<1x128xf32> to vector<1x1x128xf32>
      tpu.vector_store %arg7[%c0_60, %c0_61, %c0_62], %102 {strides = array<i32>} : memref<1x1x128xf32, #tpu.memory_space<vmem>>, vector<1x1x128xf32>,
      %cst_63 = arith.constant 0.000000e+00 : f32
      %103 = vector.broadcast %cst_63 : f32 to vector<1x128xf32>
      %c0_64 = arith.constant 0 : index
      %c0_65 = arith.constant 0 : index
      %c0_66 = arith.constant 0 : index
      %104 = vector.load %arg8[%c0_64, %c0_65, %c0_66] : memref<1x1x128xf32, #tpu.memory_space<vmem>>, vector<1x1x128xf32>
      %105 = vector.shape_cast %104 : vector<1x1x128xf32> to vector<1x128xf32>
      %106 = vector.shape_cast %103 : vector<1x128xf32> to vector<1x1x128xf32>
      tpu.vector_store %arg8[%c0_64, %c0_65, %c0_66], %106 {strides = array<i32>} : memref<1x1x128xf32, #tpu.memory_space<vmem>>, vector<1x1x128xf32>,
    } else {
    }
    %c0_45 = arith.constant 0 : index
    %c0_46 = arith.constant 0 : index
    %c0_47 = arith.constant 0 : index
    %82 = vector.load %arg7[%c0_45, %c0_46, %c0_47] : memref<1x1x128xf32, #tpu.memory_space<vmem>>, vector<1x1x128xf32>
    %83 = vector.shape_cast %82 : vector<1x1x128xf32> to vector<1x128xf32>
    %cst_48 = arith.constant dense<0.000000e+00> : vector<128xf32>
    %84 = vector.multi_reduction <add>, %71, %cst_48 [0] : vector<64x128xf32> to vector<128xf32>
    %85 = vector.shape_cast %84 : vector<128xf32> to vector<1x128xf32>
    %86 = arith.addf %83, %85 : vector<1x128xf32>
    %c0_49 = arith.constant 0 : index
    %c0_50 = arith.constant 0 : index
    %c0_51 = arith.constant 0 : index
    %87 = vector.load %arg7[%c0_49, %c0_50, %c0_51] : memref<1x1x128xf32, #tpu.memory_space<vmem>>, vector<1x1x128xf32>
    %88 = vector.shape_cast %87 : vector<1x1x128xf32> to vector<1x128xf32>
    %89 = vector.shape_cast %86 : vector<1x128xf32> to vector<1x1x128xf32>
    tpu.vector_store %arg7[%c0_49, %c0_50, %c0_51], %89 {strides = array<i32>} : memref<1x1x128xf32, #tpu.memory_space<vmem>>, vector<1x1x128xf32>,
    %c0_52 = arith.constant 0 : index
    %c0_53 = arith.constant 0 : index
    %c0_54 = arith.constant 0 : index
    %90 = vector.load %arg8[%c0_52, %c0_53, %c0_54] : memref<1x1x128xf32, #tpu.memory_space<vmem>>, vector<1x1x128xf32>
    %91 = vector.shape_cast %90 : vector<1x1x128xf32> to vector<1x128xf32>
    %92 = arith.mulf %71, %71 : vector<64x128xf32>
    %cst_55 = arith.constant dense<0.000000e+00> : vector<128xf32>
    %93 = vector.multi_reduction <add>, %92, %cst_55 [0] : vector<64x128xf32> to vector<128xf32>
    %94 = vector.shape_cast %93 : vector<128xf32> to vector<1x128xf32>
    %95 = arith.addf %91, %94 : vector<1x128xf32>
    %c0_56 = arith.constant 0 : index
    %c0_57 = arith.constant 0 : index
    %c0_58 = arith.constant 0 : index
    %96 = vector.load %arg8[%c0_56, %c0_57, %c0_58] : memref<1x1x128xf32, #tpu.memory_space<vmem>>, vector<1x1x128xf32>
    %97 = vector.shape_cast %96 : vector<1x1x128xf32> to vector<1x128xf32>
    %98 = vector.shape_cast %95 : vector<1x128xf32> to vector<1x1x128xf32>
    tpu.vector_store %arg8[%c0_56, %c0_57, %c0_58], %98 {strides = array<i32>} : memref<1x1x128xf32, #tpu.memory_space<vmem>>, vector<1x1x128xf32>,
    return
  }
  func.func @transform_0(%arg0: i32, %arg1: i32) -> (i32, i32, i32, i32) {
    %c0_i32 = arith.constant 0 : i32
    %c0_i32_0 = arith.constant 0 : i32
    %c0_i32_1 = arith.constant 0 : i32
    return %arg0, %arg1, %c0_i32, %c0_i32_0 : i32, i32, i32, i32
  }
  func.func @transform_1(%arg0: i32, %arg1: i32) -> (i32, i32, i32, i32) {
    %c4_i32 = arith.constant 4 : i32
    %0 = arith.muli %arg1, %c4_i32 : i32
    %c1_i32 = arith.constant 1 : i32
    %1 = arith.subi %0, %c1_i32 : i32
    %c0_i32 = arith.constant 0 : i32
    %2 = arith.maxsi %1, %c0_i32 : i32
    %c0_i32_0 = arith.constant 0 : i32
    %c0_i32_1 = arith.constant 0 : i32
    %c0_i32_2 = arith.constant 0 : i32
    return %arg0, %2, %c0_i32_0, %c0_i32_1 : i32, i32, i32, i32
  }
  func.func @transform_2(%arg0: i32, %arg1: i32) -> (i32, i32, i32, i32) {
    %c1_i32 = arith.constant 1 : i32
    %0 = arith.addi %arg1, %c1_i32 : i32
    %c4_i32 = arith.constant 4 : i32
    %1 = arith.muli %0, %c4_i32 : i32
    %c15_i32 = arith.constant 15 : i32
    %2 = arith.minsi %1, %c15_i32 : i32
    %c0_i32 = arith.constant 0 : i32
    %c0_i32_0 = arith.constant 0 : i32
    %c0_i32_1 = arith.constant 0 : i32
    return %arg0, %2, %c0_i32, %c0_i32_0 : i32, i32, i32, i32
  }
  func.func @transform_3(%arg0: i32, %arg1: i32) -> (i32, i32, i32) {
    %c0_i32 = arith.constant 0 : i32
    %c0_i32_0 = arith.constant 0 : i32
    %c0_i32_1 = arith.constant 0 : i32
    %c0_i32_2 = arith.constant 0 : i32
    return %c0_i32, %c0_i32_0, %c0_i32_1 : i32, i32, i32
  }
  func.func @transform_4(%arg0: i32, %arg1: i32) -> (i32, i32, i32, i32) {
    %c0_i32 = arith.constant 0 : i32
    %c0_i32_0 = arith.constant 0 : i32
    %c0_i32_1 = arith.constant 0 : i32
    return %arg0, %arg1, %c0_i32, %c0_i32_0 : i32, i32, i32, i32
  }
  func.func @transform_5(%arg0: i32, %arg1: i32) -> (i32, i32, i32) {
    %c0_i32 = arith.constant 0 : i32
    %c0_i32_0 = arith.constant 0 : i32
    %c0_i32_1 = arith.constant 0 : i32
    return %arg0, %c0_i32, %c0_i32_0 : i32, i32, i32
  }
  func.func @transform_6(%arg0: i32, %arg1: i32) -> (i32, i32, i32) {
    %c0_i32 = arith.constant 0 : i32
    %c0_i32_0 = arith.constant 0 : i32
    %c0_i32_1 = arith.constant 0 : i32
    return %arg0, %c0_i32, %c0_i32_0 : i32, i32, i32
  }
}

module attributes {stable_mosaic.version = 11 : i64} {
  func.func @_conv_prebn_stats_skip_kernel(%arg0: i32, %arg1: i32, %arg2: memref<1x4x18x128xbf16, #tpu.memory_space<vmem>>, %arg3: memref<1x1x18x128xbf16, #tpu.memory_space<vmem>>, %arg4: memref<1x1x18x128xbf16, #tpu.memory_space<vmem>>, %arg5: memref<1x128xf32, #tpu.memory_space<vmem>>, %arg6: memref<1x128xf32, #tpu.memory_space<vmem>>, %arg7: memref<9x128x128xbf16, #tpu.memory_space<vmem>>, %arg8: memref<1x4x16x128xbf16, #tpu.memory_space<vmem>>, %arg9: memref<128x128xbf16, #tpu.memory_space<vmem>>, %arg10: memref<1x4x16x128xbf16, #tpu.memory_space<vmem>>, %arg11: memref<1x1x128xf32, #tpu.memory_space<vmem>>, %arg12: memref<1x1x128xf32, #tpu.memory_space<vmem>>, %arg13: memref<1x1x128xf32, #tpu.memory_space<vmem>>, %arg14: memref<1x1x128xf32, #tpu.memory_space<vmem>>) attributes {dimension_semantics = [#tpu.dimension_semantics<parallel>, #tpu.dimension_semantics<arbitrary>], iteration_bounds = array<i64: 2, 4>, scalar_prefetch = 0 : i64, scratch_operands = 0 : i64, tpu.core_type = #tpu.core_type<tc>, window_params = [{transform_indices = @transform_0, window_bounds = array<i64: 1, 4, 18, 128>}, {transform_indices = @transform_1, window_bounds = array<i64: 1, 1, 18, 128>}, {transform_indices = @transform_2, window_bounds = array<i64: 1, 1, 18, 128>}, {pipeline_mode = #tpu.pipeline_mode<synchronous>, transform_indices = @transform_3, window_bounds = array<i64: 1, 128>}, {pipeline_mode = #tpu.pipeline_mode<synchronous>, transform_indices = @transform_4, window_bounds = array<i64: 1, 128>}, {pipeline_mode = #tpu.pipeline_mode<synchronous>, transform_indices = @transform_5, window_bounds = array<i64: 9, 128, 128>}, {transform_indices = @transform_6, window_bounds = array<i64: 1, 4, 16, 128>}, {pipeline_mode = #tpu.pipeline_mode<synchronous>, transform_indices = @transform_7, window_bounds = array<i64: 128, 128>}, {transform_indices = @transform_8, window_bounds = array<i64: 1, 4, 16, 128>}, {transform_indices = @transform_9, window_bounds = array<i64: 1, 1, 128>}, {transform_indices = @transform_10, window_bounds = array<i64: 1, 1, 128>}, {transform_indices = @transform_11, window_bounds = array<i64: 1, 1, 128>}, {transform_indices = @transform_12, window_bounds = array<i64: 1, 1, 128>}]} {
    %c0 = arith.constant 0 : index
    %c0_0 = arith.constant 0 : index
    %c0_1 = arith.constant 0 : index
    %c0_2 = arith.constant 0 : index
    %0 = vector.load %arg2[%c0, %c0_0, %c0_1, %c0_2] : memref<1x4x18x128xbf16, #tpu.memory_space<vmem>>, vector<1x4x18x128xbf16>
    %1 = vector.shape_cast %0 : vector<1x4x18x128xbf16> to vector<4x18x128xbf16>
    %c0_3 = arith.constant 0 : index
    %c0_4 = arith.constant 0 : index
    %c0_5 = arith.constant 0 : index
    %c0_6 = arith.constant 0 : index
    %2 = vector.load %arg3[%c0_3, %c0_4, %c0_5, %c0_6] : memref<1x1x18x128xbf16, #tpu.memory_space<vmem>>, vector<1x1x18x128xbf16>
    %3 = vector.shape_cast %2 : vector<1x1x18x128xbf16> to vector<1x18x128xbf16>
    %c0_7 = arith.constant 0 : index
    %c0_8 = arith.constant 0 : index
    %c0_9 = arith.constant 0 : index
    %c0_10 = arith.constant 0 : index
    %4 = vector.load %arg4[%c0_7, %c0_8, %c0_9, %c0_10] : memref<1x1x18x128xbf16, #tpu.memory_space<vmem>>, vector<1x1x18x128xbf16>
    %5 = vector.shape_cast %4 : vector<1x1x18x128xbf16> to vector<1x18x128xbf16>
    %c0_11 = arith.constant 0 : index
    %c0_12 = arith.constant 0 : index
    %6 = vector.load %arg5[%c0_11, %c0_12] : memref<1x128xf32, #tpu.memory_space<vmem>>, vector<1x128xf32>
    %c0_13 = arith.constant 0 : index
    %c0_14 = arith.constant 0 : index
    %7 = vector.load %arg6[%c0_13, %c0_14] : memref<1x128xf32, #tpu.memory_space<vmem>>, vector<1x128xf32>
    %8 = tpu.iota {dimensions = array<i32: 1>} : vector<1x18x1xi32>
    %c1_i32 = arith.constant 1 : i32
    %9 = vector.broadcast %c1_i32 : i32 to vector<1x18x1xi32>
    %10 = arith.cmpi sge, %8, %9 : vector<1x18x1xi32>
    %c16_i32 = arith.constant 16 : i32
    %11 = vector.broadcast %c16_i32 : i32 to vector<1x18x1xi32>
    %12 = arith.cmpi sle, %8, %11 : vector<1x18x1xi32>
    %13 = arith.andi %10, %12 : vector<1x18x1xi1>
    %14 = arith.extf %1 : vector<4x18x128xbf16> to vector<4x18x128xf32>
    %15 = vector.shape_cast %6 : vector<1x128xf32> to vector<1x1x128xf32>
    %16 = vector.broadcast %15 : vector<1x1x128xf32> to vector<4x18x128xf32>
    %17 = arith.mulf %14, %16 : vector<4x18x128xf32>
    %18 = vector.shape_cast %7 : vector<1x128xf32> to vector<1x1x128xf32>
    %19 = vector.broadcast %18 : vector<1x1x128xf32> to vector<4x18x128xf32>
    %20 = arith.addf %17, %19 : vector<4x18x128xf32>
    %cst = arith.constant 0.000000e+00 : f32
    %21 = vector.broadcast %cst : f32 to vector<4x18x128xf32>
    %22 = arith.maximumf %20, %21 : vector<4x18x128xf32>
    %cst_15 = arith.constant 0.000000e+00 : f32
    %23 = vector.shape_cast %13 : vector<1x18x1xi1> to vector<1x18x1xi1>
    %24 = vector.broadcast %23 : vector<1x18x1xi1> to vector<4x18x128xi1>
    %25 = vector.broadcast %cst_15 : f32 to vector<4x18x128xf32>
    %26 = arith.select %24, %22, %25 : vector<4x18x128xi1>, vector<4x18x128xf32>
    %27 = arith.extf %3 : vector<1x18x128xbf16> to vector<1x18x128xf32>
    %28 = vector.shape_cast %6 : vector<1x128xf32> to vector<1x1x128xf32>
    %29 = vector.broadcast %28 : vector<1x1x128xf32> to vector<1x18x128xf32>
    %30 = arith.mulf %27, %29 : vector<1x18x128xf32>
    %31 = vector.shape_cast %7 : vector<1x128xf32> to vector<1x1x128xf32>
    %32 = vector.broadcast %31 : vector<1x1x128xf32> to vector<1x18x128xf32>
    %33 = arith.addf %30, %32 : vector<1x18x128xf32>
    %cst_16 = arith.constant 0.000000e+00 : f32
    %34 = vector.broadcast %cst_16 : f32 to vector<1x18x128xf32>
    %35 = arith.maximumf %33, %34 : vector<1x18x128xf32>
    %cst_17 = arith.constant 0.000000e+00 : f32
    %36 = vector.shape_cast %13 : vector<1x18x1xi1> to vector<1x18x1xi1>
    %37 = vector.broadcast %36 : vector<1x18x1xi1> to vector<1x18x128xi1>
    %38 = vector.broadcast %cst_17 : f32 to vector<1x18x128xf32>
    %39 = arith.select %37, %35, %38 : vector<1x18x128xi1>, vector<1x18x128xf32>
    %40 = arith.extf %5 : vector<1x18x128xbf16> to vector<1x18x128xf32>
    %41 = vector.shape_cast %6 : vector<1x128xf32> to vector<1x1x128xf32>
    %42 = vector.broadcast %41 : vector<1x1x128xf32> to vector<1x18x128xf32>
    %43 = arith.mulf %40, %42 : vector<1x18x128xf32>
    %44 = vector.shape_cast %7 : vector<1x128xf32> to vector<1x1x128xf32>
    %45 = vector.broadcast %44 : vector<1x1x128xf32> to vector<1x18x128xf32>
    %46 = arith.addf %43, %45 : vector<1x18x128xf32>
    %cst_18 = arith.constant 0.000000e+00 : f32
    %47 = vector.broadcast %cst_18 : f32 to vector<1x18x128xf32>
    %48 = arith.maximumf %46, %47 : vector<1x18x128xf32>
    %cst_19 = arith.constant 0.000000e+00 : f32
    %49 = vector.shape_cast %13 : vector<1x18x1xi1> to vector<1x18x1xi1>
    %50 = vector.broadcast %49 : vector<1x18x1xi1> to vector<1x18x128xi1>
    %51 = vector.broadcast %cst_19 : f32 to vector<1x18x128xf32>
    %52 = arith.select %50, %48, %51 : vector<1x18x128xi1>, vector<1x18x128xf32>
    %c0_i32 = arith.constant 0 : i32
    %53 = arith.cmpi sgt, %arg1, %c0_i32 : i32
    %54 = arith.extui %53 : i1 to i32
    %55 = arith.sitofp %54 : i32 to f32
    %56 = vector.broadcast %55 : f32 to vector<1x18x128xf32>
    %57 = arith.mulf %39, %56 : vector<1x18x128xf32>
    %c3_i32 = arith.constant 3 : i32
    %58 = arith.cmpi slt, %arg1, %c3_i32 : i32
    %59 = arith.extui %58 : i1 to i32
    %60 = arith.sitofp %59 : i32 to f32
    %61 = vector.broadcast %60 : f32 to vector<1x18x128xf32>
    %62 = arith.mulf %52, %61 : vector<1x18x128xf32>
    %63 = tpu.concatenate %57, %26, %62 in 0 : vector<1x18x128xf32>, vector<4x18x128xf32>, vector<1x18x128xf32> -> vector<6x18x128xf32>
    %64 = arith.truncf %63 : vector<6x18x128xf32> to vector<6x18x128xbf16>
    %65 = vector.extract_strided_slice %64 {offsets = [0, 0, 0], sizes = [4, 16, 128], strides = [1, 1, 1]} : vector<6x18x128xbf16> to vector<4x16x128xbf16>
    %66 = vector.shape_cast %65 : vector<4x16x128xbf16> to vector<64x128xbf16>
    %c0_20 = arith.constant 0 : index
    %c0_21 = arith.constant 0 : index
    %c0_22 = arith.constant 0 : index
    %67 = vector.load %arg7[%c0_20, %c0_21, %c0_22] : memref<9x128x128xbf16, #tpu.memory_space<vmem>>, vector<1x128x128xbf16>
    %68 = vector.shape_cast %67 : vector<1x128x128xbf16> to vector<128x128xbf16>
    %cst_23 = arith.constant dense<0.000000e+00> : vector<64x128xf32>
    %69 = tpu.matmul %66, %68, %cst_23 {dimension_numbers = #tpu.dot_dimension_numbers<[1], [0], [0], [1], [0, 0, 1, 1], [], []>} : vector<64x128xbf16>, vector<128x128xbf16>, vector<64x128xf32> -> vector<64x128xf32>
    %70 = vector.extract_strided_slice %64 {offsets = [0, 1, 0], sizes = [4, 16, 128], strides = [1, 1, 1]} : vector<6x18x128xbf16> to vector<4x16x128xbf16>
    %71 = vector.shape_cast %70 : vector<4x16x128xbf16> to vector<64x128xbf16>
    %c1 = arith.constant 1 : index
    %c0_24 = arith.constant 0 : index
    %c0_25 = arith.constant 0 : index
    %72 = vector.load %arg7[%c1, %c0_24, %c0_25] : memref<9x128x128xbf16, #tpu.memory_space<vmem>>, vector<1x128x128xbf16>
    %73 = vector.shape_cast %72 : vector<1x128x128xbf16> to vector<128x128xbf16>
    %cst_26 = arith.constant dense<0.000000e+00> : vector<64x128xf32>
    %74 = tpu.matmul %71, %73, %cst_26 {dimension_numbers = #tpu.dot_dimension_numbers<[1], [0], [0], [1], [0, 0, 1, 1], [], []>} : vector<64x128xbf16>, vector<128x128xbf16>, vector<64x128xf32> -> vector<64x128xf32>
    %75 = arith.addf %69, %74 : vector<64x128xf32>
    %76 = vector.extract_strided_slice %64 {offsets = [0, 2, 0], sizes = [4, 16, 128], strides = [1, 1, 1]} : vector<6x18x128xbf16> to vector<4x16x128xbf16>
    %77 = vector.shape_cast %76 : vector<4x16x128xbf16> to vector<64x128xbf16>
    %c2 = arith.constant 2 : index
    %c0_27 = arith.constant 0 : index
    %c0_28 = arith.constant 0 : index
    %78 = vector.load %arg7[%c2, %c0_27, %c0_28] : memref<9x128x128xbf16, #tpu.memory_space<vmem>>, vector<1x128x128xbf16>
    %79 = vector.shape_cast %78 : vector<1x128x128xbf16> to vector<128x128xbf16>
    %cst_29 = arith.constant dense<0.000000e+00> : vector<64x128xf32>
    %80 = tpu.matmul %77, %79, %cst_29 {dimension_numbers = #tpu.dot_dimension_numbers<[1], [0], [0], [1], [0, 0, 1, 1], [], []>} : vector<64x128xbf16>, vector<128x128xbf16>, vector<64x128xf32> -> vector<64x128xf32>
    %81 = arith.addf %75, %80 : vector<64x128xf32>
    %82 = vector.extract_strided_slice %64 {offsets = [1, 0, 0], sizes = [4, 16, 128], strides = [1, 1, 1]} : vector<6x18x128xbf16> to vector<4x16x128xbf16>
    %83 = vector.shape_cast %82 : vector<4x16x128xbf16> to vector<64x128xbf16>
    %c3 = arith.constant 3 : index
    %c0_30 = arith.constant 0 : index
    %c0_31 = arith.constant 0 : index
    %84 = vector.load %arg7[%c3, %c0_30, %c0_31] : memref<9x128x128xbf16, #tpu.memory_space<vmem>>, vector<1x128x128xbf16>
    %85 = vector.shape_cast %84 : vector<1x128x128xbf16> to vector<128x128xbf16>
    %cst_32 = arith.constant dense<0.000000e+00> : vector<64x128xf32>
    %86 = tpu.matmul %83, %85, %cst_32 {dimension_numbers = #tpu.dot_dimension_numbers<[1], [0], [0], [1], [0, 0, 1, 1], [], []>} : vector<64x128xbf16>, vector<128x128xbf16>, vector<64x128xf32> -> vector<64x128xf32>
    %87 = arith.addf %81, %86 : vector<64x128xf32>
    %88 = vector.extract_strided_slice %64 {offsets = [1, 1, 0], sizes = [4, 16, 128], strides = [1, 1, 1]} : vector<6x18x128xbf16> to vector<4x16x128xbf16>
    %89 = vector.shape_cast %88 : vector<4x16x128xbf16> to vector<64x128xbf16>
    %c4 = arith.constant 4 : index
    %c0_33 = arith.constant 0 : index
    %c0_34 = arith.constant 0 : index
    %90 = vector.load %arg7[%c4, %c0_33, %c0_34] : memref<9x128x128xbf16, #tpu.memory_space<vmem>>, vector<1x128x128xbf16>
    %91 = vector.shape_cast %90 : vector<1x128x128xbf16> to vector<128x128xbf16>
    %cst_35 = arith.constant dense<0.000000e+00> : vector<64x128xf32>
    %92 = tpu.matmul %89, %91, %cst_35 {dimension_numbers = #tpu.dot_dimension_numbers<[1], [0], [0], [1], [0, 0, 1, 1], [], []>} : vector<64x128xbf16>, vector<128x128xbf16>, vector<64x128xf32> -> vector<64x128xf32>
    %93 = arith.addf %87, %92 : vector<64x128xf32>
    %94 = vector.extract_strided_slice %64 {offsets = [1, 2, 0], sizes = [4, 16, 128], strides = [1, 1, 1]} : vector<6x18x128xbf16> to vector<4x16x128xbf16>
    %95 = vector.shape_cast %94 : vector<4x16x128xbf16> to vector<64x128xbf16>
    %c5 = arith.constant 5 : index
    %c0_36 = arith.constant 0 : index
    %c0_37 = arith.constant 0 : index
    %96 = vector.load %arg7[%c5, %c0_36, %c0_37] : memref<9x128x128xbf16, #tpu.memory_space<vmem>>, vector<1x128x128xbf16>
    %97 = vector.shape_cast %96 : vector<1x128x128xbf16> to vector<128x128xbf16>
    %cst_38 = arith.constant dense<0.000000e+00> : vector<64x128xf32>
    %98 = tpu.matmul %95, %97, %cst_38 {dimension_numbers = #tpu.dot_dimension_numbers<[1], [0], [0], [1], [0, 0, 1, 1], [], []>} : vector<64x128xbf16>, vector<128x128xbf16>, vector<64x128xf32> -> vector<64x128xf32>
    %99 = arith.addf %93, %98 : vector<64x128xf32>
    %100 = vector.extract_strided_slice %64 {offsets = [2, 0, 0], sizes = [4, 16, 128], strides = [1, 1, 1]} : vector<6x18x128xbf16> to vector<4x16x128xbf16>
    %101 = vector.shape_cast %100 : vector<4x16x128xbf16> to vector<64x128xbf16>
    %c6 = arith.constant 6 : index
    %c0_39 = arith.constant 0 : index
    %c0_40 = arith.constant 0 : index
    %102 = vector.load %arg7[%c6, %c0_39, %c0_40] : memref<9x128x128xbf16, #tpu.memory_space<vmem>>, vector<1x128x128xbf16>
    %103 = vector.shape_cast %102 : vector<1x128x128xbf16> to vector<128x128xbf16>
    %cst_41 = arith.constant dense<0.000000e+00> : vector<64x128xf32>
    %104 = tpu.matmul %101, %103, %cst_41 {dimension_numbers = #tpu.dot_dimension_numbers<[1], [0], [0], [1], [0, 0, 1, 1], [], []>} : vector<64x128xbf16>, vector<128x128xbf16>, vector<64x128xf32> -> vector<64x128xf32>
    %105 = arith.addf %99, %104 : vector<64x128xf32>
    %106 = vector.extract_strided_slice %64 {offsets = [2, 1, 0], sizes = [4, 16, 128], strides = [1, 1, 1]} : vector<6x18x128xbf16> to vector<4x16x128xbf16>
    %107 = vector.shape_cast %106 : vector<4x16x128xbf16> to vector<64x128xbf16>
    %c7 = arith.constant 7 : index
    %c0_42 = arith.constant 0 : index
    %c0_43 = arith.constant 0 : index
    %108 = vector.load %arg7[%c7, %c0_42, %c0_43] : memref<9x128x128xbf16, #tpu.memory_space<vmem>>, vector<1x128x128xbf16>
    %109 = vector.shape_cast %108 : vector<1x128x128xbf16> to vector<128x128xbf16>
    %cst_44 = arith.constant dense<0.000000e+00> : vector<64x128xf32>
    %110 = tpu.matmul %107, %109, %cst_44 {dimension_numbers = #tpu.dot_dimension_numbers<[1], [0], [0], [1], [0, 0, 1, 1], [], []>} : vector<64x128xbf16>, vector<128x128xbf16>, vector<64x128xf32> -> vector<64x128xf32>
    %111 = arith.addf %105, %110 : vector<64x128xf32>
    %112 = vector.extract_strided_slice %64 {offsets = [2, 2, 0], sizes = [4, 16, 128], strides = [1, 1, 1]} : vector<6x18x128xbf16> to vector<4x16x128xbf16>
    %113 = vector.shape_cast %112 : vector<4x16x128xbf16> to vector<64x128xbf16>
    %c8 = arith.constant 8 : index
    %c0_45 = arith.constant 0 : index
    %c0_46 = arith.constant 0 : index
    %114 = vector.load %arg7[%c8, %c0_45, %c0_46] : memref<9x128x128xbf16, #tpu.memory_space<vmem>>, vector<1x128x128xbf16>
    %115 = vector.shape_cast %114 : vector<1x128x128xbf16> to vector<128x128xbf16>
    %cst_47 = arith.constant dense<0.000000e+00> : vector<64x128xf32>
    %116 = tpu.matmul %113, %115, %cst_47 {dimension_numbers = #tpu.dot_dimension_numbers<[1], [0], [0], [1], [0, 0, 1, 1], [], []>} : vector<64x128xbf16>, vector<128x128xbf16>, vector<64x128xf32> -> vector<64x128xf32>
    %117 = arith.addf %111, %116 : vector<64x128xf32>
    %118 = vector.shape_cast %117 : vector<64x128xf32> to vector<4x16x128xf32>
    %119 = arith.truncf %118 : vector<4x16x128xf32> to vector<4x16x128xbf16>
    %c0_48 = arith.constant 0 : index
    %c0_49 = arith.constant 0 : index
    %c0_50 = arith.constant 0 : index
    %c0_51 = arith.constant 0 : index
    %120 = vector.load %arg10[%c0_48, %c0_49, %c0_50, %c0_51] : memref<1x4x16x128xbf16, #tpu.memory_space<vmem>>, vector<1x4x16x128xbf16>
    %121 = vector.shape_cast %120 : vector<1x4x16x128xbf16> to vector<4x16x128xbf16>
    %122 = vector.shape_cast %119 : vector<4x16x128xbf16> to vector<1x4x16x128xbf16>
    tpu.vector_store %arg10[%c0_48, %c0_49, %c0_50, %c0_51], %122 {strides = array<i32>} : memref<1x4x16x128xbf16, #tpu.memory_space<vmem>>, vector<1x4x16x128xbf16>,
    %c0_i32_52 = arith.constant 0 : i32
    %123 = arith.cmpi eq, %arg1, %c0_i32_52 : i32
    %124 = arith.extui %123 : i1 to i32
    %c0_i32_53 = arith.constant 0 : i32
    %125 = arith.cmpi ne, %124, %c0_i32_53 : i32
    scf.if %125 {
      %cst_91 = arith.constant 0.000000e+00 : f32
      %168 = vector.broadcast %cst_91 : f32 to vector<1x128xf32>
      %c0_92 = arith.constant 0 : index
      %c0_93 = arith.constant 0 : index
      %c0_94 = arith.constant 0 : index
      %169 = vector.load %arg11[%c0_92, %c0_93, %c0_94] : memref<1x1x128xf32, #tpu.memory_space<vmem>>, vector<1x1x128xf32>
      %170 = vector.shape_cast %169 : vector<1x1x128xf32> to vector<1x128xf32>
      %171 = vector.shape_cast %168 : vector<1x128xf32> to vector<1x1x128xf32>
      tpu.vector_store %arg11[%c0_92, %c0_93, %c0_94], %171 {strides = array<i32>} : memref<1x1x128xf32, #tpu.memory_space<vmem>>, vector<1x1x128xf32>,
      %cst_95 = arith.constant 0.000000e+00 : f32
      %172 = vector.broadcast %cst_95 : f32 to vector<1x128xf32>
      %c0_96 = arith.constant 0 : index
      %c0_97 = arith.constant 0 : index
      %c0_98 = arith.constant 0 : index
      %173 = vector.load %arg12[%c0_96, %c0_97, %c0_98] : memref<1x1x128xf32, #tpu.memory_space<vmem>>, vector<1x1x128xf32>
      %174 = vector.shape_cast %173 : vector<1x1x128xf32> to vector<1x128xf32>
      %175 = vector.shape_cast %172 : vector<1x128xf32> to vector<1x1x128xf32>
      tpu.vector_store %arg12[%c0_96, %c0_97, %c0_98], %175 {strides = array<i32>} : memref<1x1x128xf32, #tpu.memory_space<vmem>>, vector<1x1x128xf32>,
    } else {
    }
    %c0_54 = arith.constant 0 : index
    %c0_55 = arith.constant 0 : index
    %c0_56 = arith.constant 0 : index
    %126 = vector.load %arg11[%c0_54, %c0_55, %c0_56] : memref<1x1x128xf32, #tpu.memory_space<vmem>>, vector<1x1x128xf32>
    %127 = vector.shape_cast %126 : vector<1x1x128xf32> to vector<1x128xf32>
    %cst_57 = arith.constant dense<0.000000e+00> : vector<128xf32>
    %128 = vector.multi_reduction <add>, %117, %cst_57 [0] : vector<64x128xf32> to vector<128xf32>
    %129 = vector.shape_cast %128 : vector<128xf32> to vector<1x128xf32>
    %130 = arith.addf %127, %129 : vector<1x128xf32>
    %c0_58 = arith.constant 0 : index
    %c0_59 = arith.constant 0 : index
    %c0_60 = arith.constant 0 : index
    %131 = vector.load %arg11[%c0_58, %c0_59, %c0_60] : memref<1x1x128xf32, #tpu.memory_space<vmem>>, vector<1x1x128xf32>
    %132 = vector.shape_cast %131 : vector<1x1x128xf32> to vector<1x128xf32>
    %133 = vector.shape_cast %130 : vector<1x128xf32> to vector<1x1x128xf32>
    tpu.vector_store %arg11[%c0_58, %c0_59, %c0_60], %133 {strides = array<i32>} : memref<1x1x128xf32, #tpu.memory_space<vmem>>, vector<1x1x128xf32>,
    %c0_61 = arith.constant 0 : index
    %c0_62 = arith.constant 0 : index
    %c0_63 = arith.constant 0 : index
    %134 = vector.load %arg12[%c0_61, %c0_62, %c0_63] : memref<1x1x128xf32, #tpu.memory_space<vmem>>, vector<1x1x128xf32>
    %135 = vector.shape_cast %134 : vector<1x1x128xf32> to vector<1x128xf32>
    %136 = arith.mulf %117, %117 : vector<64x128xf32>
    %cst_64 = arith.constant dense<0.000000e+00> : vector<128xf32>
    %137 = vector.multi_reduction <add>, %136, %cst_64 [0] : vector<64x128xf32> to vector<128xf32>
    %138 = vector.shape_cast %137 : vector<128xf32> to vector<1x128xf32>
    %139 = arith.addf %135, %138 : vector<1x128xf32>
    %c0_65 = arith.constant 0 : index
    %c0_66 = arith.constant 0 : index
    %c0_67 = arith.constant 0 : index
    %140 = vector.load %arg12[%c0_65, %c0_66, %c0_67] : memref<1x1x128xf32, #tpu.memory_space<vmem>>, vector<1x1x128xf32>
    %141 = vector.shape_cast %140 : vector<1x1x128xf32> to vector<1x128xf32>
    %142 = vector.shape_cast %139 : vector<1x128xf32> to vector<1x1x128xf32>
    tpu.vector_store %arg12[%c0_65, %c0_66, %c0_67], %142 {strides = array<i32>} : memref<1x1x128xf32, #tpu.memory_space<vmem>>, vector<1x1x128xf32>,
    %c0_68 = arith.constant 0 : index
    %c0_69 = arith.constant 0 : index
    %c0_70 = arith.constant 0 : index
    %c0_71 = arith.constant 0 : index
    %143 = vector.load %arg8[%c0_68, %c0_69, %c0_70, %c0_71] : memref<1x4x16x128xbf16, #tpu.memory_space<vmem>>, vector<1x4x16x128xbf16>
    %144 = vector.shape_cast %143 : vector<1x4x16x128xbf16> to vector<4x16x128xbf16>
    %145 = vector.shape_cast %144 : vector<4x16x128xbf16> to vector<64x128xbf16>
    %c0_72 = arith.constant 0 : index
    %c0_73 = arith.constant 0 : index
    %146 = vector.load %arg9[%c0_72, %c0_73] : memref<128x128xbf16, #tpu.memory_space<vmem>>, vector<128x128xbf16>
    %cst_74 = arith.constant dense<0.000000e+00> : vector<64x128xf32>
    %147 = tpu.matmul %145, %146, %cst_74 {dimension_numbers = #tpu.dot_dimension_numbers<[1], [0], [0], [1], [0, 0, 1, 1], [], []>} : vector<64x128xbf16>, vector<128x128xbf16>, vector<64x128xf32> -> vector<64x128xf32>
    %c0_i32_75 = arith.constant 0 : i32
    %148 = arith.cmpi eq, %arg1, %c0_i32_75 : i32
    %149 = arith.extui %148 : i1 to i32
    %c0_i32_76 = arith.constant 0 : i32
    %150 = arith.cmpi ne, %149, %c0_i32_76 : i32
    scf.if %150 {
      %cst_91 = arith.constant 0.000000e+00 : f32
      %168 = vector.broadcast %cst_91 : f32 to vector<1x128xf32>
      %c0_92 = arith.constant 0 : index
      %c0_93 = arith.constant 0 : index
      %c0_94 = arith.constant 0 : index
      %169 = vector.load %arg13[%c0_92, %c0_93, %c0_94] : memref<1x1x128xf32, #tpu.memory_space<vmem>>, vector<1x1x128xf32>
      %170 = vector.shape_cast %169 : vector<1x1x128xf32> to vector<1x128xf32>
      %171 = vector.shape_cast %168 : vector<1x128xf32> to vector<1x1x128xf32>
      tpu.vector_store %arg13[%c0_92, %c0_93, %c0_94], %171 {strides = array<i32>} : memref<1x1x128xf32, #tpu.memory_space<vmem>>, vector<1x1x128xf32>,
      %cst_95 = arith.constant 0.000000e+00 : f32
      %172 = vector.broadcast %cst_95 : f32 to vector<1x128xf32>
      %c0_96 = arith.constant 0 : index
      %c0_97 = arith.constant 0 : index
      %c0_98 = arith.constant 0 : index
      %173 = vector.load %arg14[%c0_96, %c0_97, %c0_98] : memref<1x1x128xf32, #tpu.memory_space<vmem>>, vector<1x1x128xf32>
      %174 = vector.shape_cast %173 : vector<1x1x128xf32> to vector<1x128xf32>
      %175 = vector.shape_cast %172 : vector<1x128xf32> to vector<1x1x128xf32>
      tpu.vector_store %arg14[%c0_96, %c0_97, %c0_98], %175 {strides = array<i32>} : memref<1x1x128xf32, #tpu.memory_space<vmem>>, vector<1x1x128xf32>,
    } else {
    }
    %c0_77 = arith.constant 0 : index
    %c0_78 = arith.constant 0 : index
    %c0_79 = arith.constant 0 : index
    %151 = vector.load %arg13[%c0_77, %c0_78, %c0_79] : memref<1x1x128xf32, #tpu.memory_space<vmem>>, vector<1x1x128xf32>
    %152 = vector.shape_cast %151 : vector<1x1x128xf32> to vector<1x128xf32>
    %cst_80 = arith.constant dense<0.000000e+00> : vector<128xf32>
    %153 = vector.multi_reduction <add>, %147, %cst_80 [0] : vector<64x128xf32> to vector<128xf32>
    %154 = vector.shape_cast %153 : vector<128xf32> to vector<1x128xf32>
    %155 = arith.addf %152, %154 : vector<1x128xf32>
    %c0_81 = arith.constant 0 : index
    %c0_82 = arith.constant 0 : index
    %c0_83 = arith.constant 0 : index
    %156 = vector.load %arg13[%c0_81, %c0_82, %c0_83] : memref<1x1x128xf32, #tpu.memory_space<vmem>>, vector<1x1x128xf32>
    %157 = vector.shape_cast %156 : vector<1x1x128xf32> to vector<1x128xf32>
    %158 = vector.shape_cast %155 : vector<1x128xf32> to vector<1x1x128xf32>
    tpu.vector_store %arg13[%c0_81, %c0_82, %c0_83], %158 {strides = array<i32>} : memref<1x1x128xf32, #tpu.memory_space<vmem>>, vector<1x1x128xf32>,
    %c0_84 = arith.constant 0 : index
    %c0_85 = arith.constant 0 : index
    %c0_86 = arith.constant 0 : index
    %159 = vector.load %arg14[%c0_84, %c0_85, %c0_86] : memref<1x1x128xf32, #tpu.memory_space<vmem>>, vector<1x1x128xf32>
    %160 = vector.shape_cast %159 : vector<1x1x128xf32> to vector<1x128xf32>
    %161 = arith.mulf %147, %147 : vector<64x128xf32>
    %cst_87 = arith.constant dense<0.000000e+00> : vector<128xf32>
    %162 = vector.multi_reduction <add>, %161, %cst_87 [0] : vector<64x128xf32> to vector<128xf32>
    %163 = vector.shape_cast %162 : vector<128xf32> to vector<1x128xf32>
    %164 = arith.addf %160, %163 : vector<1x128xf32>
    %c0_88 = arith.constant 0 : index
    %c0_89 = arith.constant 0 : index
    %c0_90 = arith.constant 0 : index
    %165 = vector.load %arg14[%c0_88, %c0_89, %c0_90] : memref<1x1x128xf32, #tpu.memory_space<vmem>>, vector<1x1x128xf32>
    %166 = vector.shape_cast %165 : vector<1x1x128xf32> to vector<1x128xf32>
    %167 = vector.shape_cast %164 : vector<1x128xf32> to vector<1x1x128xf32>
    tpu.vector_store %arg14[%c0_88, %c0_89, %c0_90], %167 {strides = array<i32>} : memref<1x1x128xf32, #tpu.memory_space<vmem>>, vector<1x1x128xf32>,
    return
  }
  func.func @transform_0(%arg0: i32, %arg1: i32) -> (i32, i32, i32, i32) {
    %c0_i32 = arith.constant 0 : i32
    %c0_i32_0 = arith.constant 0 : i32
    %c0_i32_1 = arith.constant 0 : i32
    return %arg0, %arg1, %c0_i32, %c0_i32_0 : i32, i32, i32, i32
  }
  func.func @transform_1(%arg0: i32, %arg1: i32) -> (i32, i32, i32, i32) {
    %c4_i32 = arith.constant 4 : i32
    %0 = arith.muli %arg1, %c4_i32 : i32
    %c1_i32 = arith.constant 1 : i32
    %1 = arith.subi %0, %c1_i32 : i32
    %c0_i32 = arith.constant 0 : i32
    %2 = arith.maxsi %1, %c0_i32 : i32
    %c0_i32_0 = arith.constant 0 : i32
    %c0_i32_1 = arith.constant 0 : i32
    %c0_i32_2 = arith.constant 0 : i32
    return %arg0, %2, %c0_i32_0, %c0_i32_1 : i32, i32, i32, i32
  }
  func.func @transform_2(%arg0: i32, %arg1: i32) -> (i32, i32, i32, i32) {
    %c1_i32 = arith.constant 1 : i32
    %0 = arith.addi %arg1, %c1_i32 : i32
    %c4_i32 = arith.constant 4 : i32
    %1 = arith.muli %0, %c4_i32 : i32
    %c15_i32 = arith.constant 15 : i32
    %2 = arith.minsi %1, %c15_i32 : i32
    %c0_i32 = arith.constant 0 : i32
    %c0_i32_0 = arith.constant 0 : i32
    %c0_i32_1 = arith.constant 0 : i32
    return %arg0, %2, %c0_i32, %c0_i32_0 : i32, i32, i32, i32
  }
  func.func @transform_3(%arg0: i32, %arg1: i32) -> (i32, i32) {
    %c0_i32 = arith.constant 0 : i32
    %c0_i32_0 = arith.constant 0 : i32
    %c0_i32_1 = arith.constant 0 : i32
    return %c0_i32, %c0_i32_0 : i32, i32
  }
  func.func @transform_4(%arg0: i32, %arg1: i32) -> (i32, i32) {
    %c0_i32 = arith.constant 0 : i32
    %c0_i32_0 = arith.constant 0 : i32
    %c0_i32_1 = arith.constant 0 : i32
    return %c0_i32, %c0_i32_0 : i32, i32
  }
  func.func @transform_5(%arg0: i32, %arg1: i32) -> (i32, i32, i32) {
    %c0_i32 = arith.constant 0 : i32
    %c0_i32_0 = arith.constant 0 : i32
    %c0_i32_1 = arith.constant 0 : i32
    %c0_i32_2 = arith.constant 0 : i32
    return %c0_i32, %c0_i32_0, %c0_i32_1 : i32, i32, i32
  }
  func.func @transform_6(%arg0: i32, %arg1: i32) -> (i32, i32, i32, i32) {
    %c0_i32 = arith.constant 0 : i32
    %c0_i32_0 = arith.constant 0 : i32
    %c0_i32_1 = arith.constant 0 : i32
    return %arg0, %arg1, %c0_i32, %c0_i32_0 : i32, i32, i32, i32
  }
  func.func @transform_7(%arg0: i32, %arg1: i32) -> (i32, i32) {
    %c0_i32 = arith.constant 0 : i32
    %c0_i32_0 = arith.constant 0 : i32
    %c0_i32_1 = arith.constant 0 : i32
    return %c0_i32, %c0_i32_0 : i32, i32
  }
  func.func @transform_8(%arg0: i32, %arg1: i32) -> (i32, i32, i32, i32) {
    %c0_i32 = arith.constant 0 : i32
    %c0_i32_0 = arith.constant 0 : i32
    %c0_i32_1 = arith.constant 0 : i32
    return %arg0, %arg1, %c0_i32, %c0_i32_0 : i32, i32, i32, i32
  }
  func.func @transform_9(%arg0: i32, %arg1: i32) -> (i32, i32, i32) {
    %c0_i32 = arith.constant 0 : i32
    %c0_i32_0 = arith.constant 0 : i32
    %c0_i32_1 = arith.constant 0 : i32
    return %arg0, %c0_i32, %c0_i32_0 : i32, i32, i32
  }
  func.func @transform_10(%arg0: i32, %arg1: i32) -> (i32, i32, i32) {
    %c0_i32 = arith.constant 0 : i32
    %c0_i32_0 = arith.constant 0 : i32
    %c0_i32_1 = arith.constant 0 : i32
    return %arg0, %c0_i32, %c0_i32_0 : i32, i32, i32
  }
  func.func @transform_11(%arg0: i32, %arg1: i32) -> (i32, i32, i32) {
    %c0_i32 = arith.constant 0 : i32
    %c0_i32_0 = arith.constant 0 : i32
    %c0_i32_1 = arith.constant 0 : i32
    return %arg0, %c0_i32, %c0_i32_0 : i32, i32, i32
  }
  func.func @transform_12(%arg0: i32, %arg1: i32) -> (i32, i32, i32) {
    %c0_i32 = arith.constant 0 : i32
    %c0_i32_0 = arith.constant 0 : i32
    %c0_i32_1 = arith.constant 0 : i32
    return %arg0, %c0_i32, %c0_i32_0 : i32, i32, i32
  }
}

module attributes {stable_mosaic.version = 11 : i64} {
  func.func @_bn_skipconv_relu_kernel(%arg0: i32, %arg1: i32, %arg2: memref<1x16x16x128xbf16, #tpu.memory_space<vmem>>, %arg3: memref<1x128xf32, #tpu.memory_space<vmem>>, %arg4: memref<1x128xf32, #tpu.memory_space<vmem>>, %arg5: memref<1x16x16x128xbf16, #tpu.memory_space<vmem>>, %arg6: memref<128x128xbf16, #tpu.memory_space<vmem>>, %arg7: memref<1x128xf32, #tpu.memory_space<vmem>>, %arg8: memref<1x128xf32, #tpu.memory_space<vmem>>, %arg9: memref<1x16x16x128xf32, #tpu.memory_space<vmem>>) attributes {dimension_semantics = [#tpu.dimension_semantics<parallel>, #tpu.dimension_semantics<parallel>], iteration_bounds = array<i64: 2, 1>, scalar_prefetch = 0 : i64, scratch_operands = 0 : i64, tpu.core_type = #tpu.core_type<tc>, window_params = [{transform_indices = @transform_0, window_bounds = array<i64: 1, 16, 16, 128>}, {pipeline_mode = #tpu.pipeline_mode<synchronous>, transform_indices = @transform_1, window_bounds = array<i64: 1, 128>}, {pipeline_mode = #tpu.pipeline_mode<synchronous>, transform_indices = @transform_2, window_bounds = array<i64: 1, 128>}, {transform_indices = @transform_3, window_bounds = array<i64: 1, 16, 16, 128>}, {pipeline_mode = #tpu.pipeline_mode<synchronous>, transform_indices = @transform_4, window_bounds = array<i64: 128, 128>}, {pipeline_mode = #tpu.pipeline_mode<synchronous>, transform_indices = @transform_5, window_bounds = array<i64: 1, 128>}, {pipeline_mode = #tpu.pipeline_mode<synchronous>, transform_indices = @transform_6, window_bounds = array<i64: 1, 128>}, {transform_indices = @transform_7, window_bounds = array<i64: 1, 16, 16, 128>}]} {
    %c0 = arith.constant 0 : index
    %c0_0 = arith.constant 0 : index
    %c0_1 = arith.constant 0 : index
    %c0_2 = arith.constant 0 : index
    %0 = vector.load %arg2[%c0, %c0_0, %c0_1, %c0_2] : memref<1x16x16x128xbf16, #tpu.memory_space<vmem>>, vector<1x16x16x128xbf16>
    %1 = vector.shape_cast %0 : vector<1x16x16x128xbf16> to vector<16x16x128xbf16>
    %2 = arith.extf %1 : vector<16x16x128xbf16> to vector<16x16x128xf32>
    %c0_3 = arith.constant 0 : index
    %c0_4 = arith.constant 0 : index
    %3 = vector.load %arg3[%c0_3, %c0_4] : memref<1x128xf32, #tpu.memory_space<vmem>>, vector<1x128xf32>
    %4 = vector.shape_cast %3 : vector<1x128xf32> to vector<1x1x128xf32>
    %5 = vector.broadcast %4 : vector<1x1x128xf32> to vector<16x16x128xf32>
    %6 = arith.mulf %2, %5 : vector<16x16x128xf32>
    %c0_5 = arith.constant 0 : index
    %c0_6 = arith.constant 0 : index
    %7 = vector.load %arg4[%c0_5, %c0_6] : memref<1x128xf32, #tpu.memory_space<vmem>>, vector<1x128xf32>
    %8 = vector.shape_cast %7 : vector<1x128xf32> to vector<1x1x128xf32>
    %9 = vector.broadcast %8 : vector<1x1x128xf32> to vector<16x16x128xf32>
    %10 = arith.addf %6, %9 : vector<16x16x128xf32>
    %c0_7 = arith.constant 0 : index
    %c0_8 = arith.constant 0 : index
    %c0_9 = arith.constant 0 : index
    %c0_10 = arith.constant 0 : index
    %11 = vector.load %arg5[%c0_7, %c0_8, %c0_9, %c0_10] : memref<1x16x16x128xbf16, #tpu.memory_space<vmem>>, vector<1x16x16x128xbf16>
    %12 = vector.shape_cast %11 : vector<1x16x16x128xbf16> to vector<16x16x128xbf16>
    %13 = vector.shape_cast %12 : vector<16x16x128xbf16> to vector<256x128xbf16>
    %c0_11 = arith.constant 0 : index
    %c0_12 = arith.constant 0 : index
    %14 = vector.load %arg6[%c0_11, %c0_12] : memref<128x128xbf16, #tpu.memory_space<vmem>>, vector<128x128xbf16>
    %cst = arith.constant dense<0.000000e+00> : vector<256x128xf32>
    %15 = tpu.matmul %13, %14, %cst {dimension_numbers = #tpu.dot_dimension_numbers<[1], [0], [0], [1], [0, 0, 1, 1], [], []>} : vector<256x128xbf16>, vector<128x128xbf16>, vector<256x128xf32> -> vector<256x128xf32>
    %16 = vector.shape_cast %15 : vector<256x128xf32> to vector<16x16x128xf32>
    %c0_13 = arith.constant 0 : index
    %c0_14 = arith.constant 0 : index
    %17 = vector.load %arg7[%c0_13, %c0_14] : memref<1x128xf32, #tpu.memory_space<vmem>>, vector<1x128xf32>
    %18 = vector.shape_cast %17 : vector<1x128xf32> to vector<1x1x128xf32>
    %19 = vector.broadcast %18 : vector<1x1x128xf32> to vector<16x16x128xf32>
    %20 = arith.mulf %16, %19 : vector<16x16x128xf32>
    %21 = arith.addf %10, %20 : vector<16x16x128xf32>
    %c0_15 = arith.constant 0 : index
    %c0_16 = arith.constant 0 : index
    %22 = vector.load %arg8[%c0_15, %c0_16] : memref<1x128xf32, #tpu.memory_space<vmem>>, vector<1x128xf32>
    %23 = vector.shape_cast %22 : vector<1x128xf32> to vector<1x1x128xf32>
    %24 = vector.broadcast %23 : vector<1x1x128xf32> to vector<16x16x128xf32>
    %25 = arith.addf %21, %24 : vector<16x16x128xf32>
    %cst_17 = arith.constant 0.000000e+00 : f32
    %26 = vector.broadcast %cst_17 : f32 to vector<16x16x128xf32>
    %27 = arith.maximumf %25, %26 : vector<16x16x128xf32>
    %c0_18 = arith.constant 0 : index
    %c0_19 = arith.constant 0 : index
    %c0_20 = arith.constant 0 : index
    %c0_21 = arith.constant 0 : index
    %28 = vector.load %arg9[%c0_18, %c0_19, %c0_20, %c0_21] : memref<1x16x16x128xf32, #tpu.memory_space<vmem>>, vector<1x16x16x128xf32>
    %29 = vector.shape_cast %28 : vector<1x16x16x128xf32> to vector<16x16x128xf32>
    %30 = vector.shape_cast %27 : vector<16x16x128xf32> to vector<1x16x16x128xf32>
    tpu.vector_store %arg9[%c0_18, %c0_19, %c0_20, %c0_21], %30 {strides = array<i32>} : memref<1x16x16x128xf32, #tpu.memory_space<vmem>>, vector<1x16x16x128xf32>,
    return
  }
  func.func @transform_0(%arg0: i32, %arg1: i32) -> (i32, i32, i32, i32) {
    %c0_i32 = arith.constant 0 : i32
    %c0_i32_0 = arith.constant 0 : i32
    %c0_i32_1 = arith.constant 0 : i32
    return %arg0, %arg1, %c0_i32, %c0_i32_0 : i32, i32, i32, i32
  }
  func.func @transform_1(%arg0: i32, %arg1: i32) -> (i32, i32) {
    %c0_i32 = arith.constant 0 : i32
    %c0_i32_0 = arith.constant 0 : i32
    %c0_i32_1 = arith.constant 0 : i32
    return %c0_i32, %c0_i32_0 : i32, i32
  }
  func.func @transform_2(%arg0: i32, %arg1: i32) -> (i32, i32) {
    %c0_i32 = arith.constant 0 : i32
    %c0_i32_0 = arith.constant 0 : i32
    %c0_i32_1 = arith.constant 0 : i32
    return %c0_i32, %c0_i32_0 : i32, i32
  }
  func.func @transform_3(%arg0: i32, %arg1: i32) -> (i32, i32, i32, i32) {
    %c0_i32 = arith.constant 0 : i32
    %c0_i32_0 = arith.constant 0 : i32
    %c0_i32_1 = arith.constant 0 : i32
    return %arg0, %arg1, %c0_i32, %c0_i32_0 : i32, i32, i32, i32
  }
  func.func @transform_4(%arg0: i32, %arg1: i32) -> (i32, i32) {
    %c0_i32 = arith.constant 0 : i32
    %c0_i32_0 = arith.constant 0 : i32
    %c0_i32_1 = arith.constant 0 : i32
    return %c0_i32, %c0_i32_0 : i32, i32
  }
  func.func @transform_5(%arg0: i32, %arg1: i32) -> (i32, i32) {
    %c0_i32 = arith.constant 0 : i32
    %c0_i32_0 = arith.constant 0 : i32
    %c0_i32_1 = arith.constant 0 : i32
    return %c0_i32, %c0_i32_0 : i32, i32
  }
  func.func @transform_6(%arg0: i32, %arg1: i32) -> (i32, i32) {
    %c0_i32 = arith.constant 0 : i32
    %c0_i32_0 = arith.constant 0 : i32
    %c0_i32_1 = arith.constant 0 : i32
    return %c0_i32, %c0_i32_0 : i32, i32
  }
  func.func @transform_7(%arg0: i32, %arg1: i32) -> (i32, i32, i32, i32) {
    %c0_i32 = arith.constant 0 : i32
    %c0_i32_0 = arith.constant 0 : i32
    %c0_i32_1 = arith.constant 0 : i32
    return %arg0, %arg1, %c0_i32, %c0_i32_0 : i32, i32, i32, i32
  }
}

</mosaic_0001>

<bundles_post_ra>
// kernel: residual_block_pallas.5
= control target key start
LH: loop header
LB: loop body
LE: loop exit
PB: predicated region body
PF: predicated region fallthrough
CT: control target
= control target key end

     0   :  { %s1472_s24 = smov 0   ;;  %s1474_s25 = smov 0   ;;  %s1854_s0 = inlined_call_operand.vmem [shape: bf16[2,16,16,128], index: 0, kind: input, shape index: {}]   ;;  %s1855_s1 = inlined_call_operand.vmem [shape: f32[1,128], index: 1, kind: input, shape index: {}]   ;;  %s1856_s2 = inlined_call_operand.vmem [shape: f32[1,128], index: 2, kind: input, shape index: {}]   ;;  %s1857_s3 = inlined_call_operand.vmem [shape: bf16[2,16,16,128], index: 3, kind: input, shape index: {}]   ;;  %s1858_s4 = inlined_call_operand.vmem [shape: bf16[128,128], index: 4, kind: input, shape index: {}]   ;;  %s1859_s5 = inlined_call_operand.vmem [shape: f32[1,128], index: 5, kind: input, shape index: {}]   ;;  %s1860_s6 = inlined_call_operand.vmem [shape: f32[1,128], index: 6, kind: input, shape index: {}]   ;;  %s1861_s7 = inlined_call_operand.vmem [shape: f32[2,16,16,128], index: 7, kind: output, shape index: {}]  }
   0x1   :  { %s1476_s26 = smov 0  }
   0x2 LB: > { %s29_s27 = sadd.s32 1, %s1426_s25  ;;  %p1153_p0 = scmp.ge.s32.totalorder %s1430_s26, 1  ;;  %s1430_s26 = sphi %s1476_s26, %s17_s26   ;;  %s1426_s25 = sphi %s1474_s25, %s1863_s25   ;;  %s1422_s24 = sphi %s1472_s24, %s1862_s24  }
   0x3   : > { %p31_p1 = scmp.ge.s32.totalorder %s29_s27, 2  ;;  %p277_p2 = scmp.lt.s32.totalorder %s1430_s26, 3 }
   0x5   : > { %s1865_s27 = smov (%p31_p1, %s29_s27), 0  ;;  %p278_p3 = pnand %p1153_p0, %p277_p2 }
   0x6   : > { %p330_p4 = scmp.lt.s32.totalorder (!%p278_p3), %s1422_s24, 1 }
   0x7   : > { %281 = sbr.rel (%p278_p3) target bundleno = 279 (0x117), region = 48 }
   0xc   : > { %v1384_v0 = vld [vmem:[%s1858_s4 + $0x38] sm:$0xff]   ;;  %v1385_v1 = vld [vmem:[%s1858_s4 + $0x30] sm:$0xff]   ;;  %s1867_s24 = smov (!%p330_p4, %s1422_s24), 1  ;;  %v1386_v2 = vld [vmem:[%s1858_s4 + $0x28] sm:$0xff]  }
   0xd   : > { %1296 = vmatprep.subr.bf16.mxu0 %v1384_v0  ;;  %1344 = vmatprep.subr.bf16.mxu1 %v1384_v0  ;;  %s1190_s11 = sshll.u32 %s1867_s24, 7  ;;  %v1387_v3 = vld [vmem:[%s1858_s4 + $0x20] sm:$0xff]   ;;  %v1388_v6 = vld [vmem:[%s1858_s4 + $0x18] sm:$0xff]   ;;  %v1389_v7 = vld [vmem:[%s1858_s4 + $0x10] sm:$0xff]   ;;  %s1192_s17 = sshll.u32 %s1867_s24, 8 }
   0xe   : > { %1297 = vmatpush3.bf16.msra.mxu0 %v1384_v0  ;;  %1352 = vmatpush3.bf16.msra.mxu1 %v1384_v0  ;;  %s1507_s14 = scalar_lea.vmem %s1857_s3, %s1190_s11  ;;  %v1390_v8 = vld [vmem:[%s1858_s4 + $0x8] sm:$0xff]   ;;  %v1391_v9 = vld [vmem:[%s1858_s4] sm:$0xff]   ;;  %s1545_s8 = scalar_lea.vmem %s1854_s0, %s1190_s11 }
   0xf   : > { %1298 = vmatprep.subr.bf16.mxu0 %v1385_v1  ;;  %1345 = vmatprep.subr.bf16.mxu1 %v1385_v1  ;;  %v1392_v4 = vld [vmem:[%s1507_s14] sm:$0xff]   ;;  %v1394_v10 = vld [vmem:[%s1507_s14 + $0x8] sm:$0xff]   ;;  %v1396_v12 = vld [vmem:[%s1507_s14 + $0x10] sm:$0xff]   ;;  %s1719_s19 = scalar_lea.vmem %s1861_s7, %s1192_s17 }
  0x10   : > { %v1393_v5 = vld [vmem:[%s1507_s14 + $0x40] sm:$0xff]   ;;  %1312 = vmatprep.mubr.bf16.mxu0 %v1392_v4  ;;  %v1395_v11 = vld [vmem:[%s1507_s14 + $0x48] sm:$0xff]   ;;  %v1397_v13 = vld [vmem:[%s1507_s14 + $0x50] sm:$0xff]  }
  0x11   : > { %1328 = vmatprep.mubr.bf16.mxu1 %v1393_v5  ;;  %v1398_v14 = vld [vmem:[%s1507_s14 + $0x18] sm:$0xff]   ;;  %v1400_v16 = vld [vmem:[%s1507_s14 + $0x20] sm:$0xff]   ;;  %v1402_v18 = vld [vmem:[%s1507_s14 + $0x28] sm:$0xff]  }
  0x12   : > { %1299 = vmatpush3.bf16.msra.mxu0 %v1385_v1  ;;  %1353 = vmatpush3.bf16.msra.mxu1 %v1385_v1  ;;  %v1399_v15 = vld [vmem:[%s1507_s14 + $0x58] sm:$0xff]   ;;  %v1401_v17 = vld [vmem:[%s1507_s14 + $0x60] sm:$0xff]   ;;  %v1403_v19 = vld [vmem:[%s1507_s14 + $0x68] sm:$0xff]  }
  0x13   : > { %1300 = vmatprep.subr.bf16.mxu0 %v1386_v2  ;;  %1346 = vmatprep.subr.bf16.mxu1 %v1386_v2  ;;  %v1404_v20 = vld [vmem:[%s1507_s14 + $0x30] sm:$0xff]   ;;  %v1406_v22 = vld [vmem:[%s1507_s14 + $0x38] sm:$0xff]   ;;  %v1257_v24 = vld [vmem:[%s1545_s8 + $0x8] sm:$0xff]  }
  0x14   : > { %v1405_v21 = vld [vmem:[%s1507_s14 + $0x70] sm:$0xff]   ;;  %v1407_v23 = vld [vmem:[%s1507_s14 + $0x78] sm:$0xff]   ;;  %v1265_v25 = vld [vmem:[%s1545_s8 + $0x48] sm:$0xff]   ;;  %v1199_v28 = vunpack.c.l.bf16 %v1257_v24  ;;  %v1200_v33 = vunpack.c.h.bf16 %v1257_v24 }
  0x15   : > { %v1194_v26 = vld [vmem:[%s1545_s8] sm:$0xff]   ;;  %v1231_v29 = vunpack.c.l.bf16 %v1265_v25  ;;  %v1232_v34 = vunpack.c.h.bf16 %v1265_v25  ;;  %v1259_v35 = vld [vmem:[%s1545_s8 + $0x18] sm:$0xff]   ;;  %v1258_v41 = vld [vmem:[%s1545_s8 + $0x10] sm:$0xff]  }
  0x16   : > { %1301 = vmatpush3.bf16.msra.mxu0 %v1386_v2  ;;  %1354 = vmatpush3.bf16.msra.mxu1 %v1386_v2  ;;  %v1264_v27 = vld [vmem:[%s1545_s8 + $0x40] sm:$0xff]   ;;  %v1195_v31 = vunpack.c.l.bf16 %v1194_v26  ;;  %v1267_v36 = vld [vmem:[%s1545_s8 + $0x58] sm:$0xff]   ;;  %v1196_v39 = vunpack.c.h.bf16 %v1194_v26  ;;  %v1266_v42 = vld [vmem:[%s1545_s8 + $0x50] sm:$0xff]   ;;  %v1207_v44 = vunpack.c.l.bf16 %v1259_v35  ;;  %v1203_v50 = vunpack.c.l.bf16 %v1258_v41 }
  0x17   : > { %1302 = vmatprep.subr.bf16.mxu0 %v1387_v3  ;;  %1347 = vmatprep.subr.bf16.mxu1 %v1387_v3  ;;  %v1554_v30 = vld [vmem:[%s1855_s1] ss:$0 sm:$0xff]  ;;  %v1227_v32 = vunpack.c.l.bf16 %v1264_v27  ;;  %v1228_v40 = vunpack.c.h.bf16 %v1264_v27  ;;  %v1239_v45 = vunpack.c.l.bf16 %v1267_v36  ;;  %v1235_v51 = vunpack.c.l.bf16 %v1266_v42  ;;  %v1261_v62 = vld [vmem:[%s1545_s8 + $0x28] sm:$0xff]  }
  0x18   : > { %v436_v37 = vmul.f32 %v1199_v28, %v1554_v30  ;;  %v452_v38 = vmul.f32 %v1231_v29, %v1554_v30  ;;  %v1565_v43 = vld [vmem:[%s1856_s2] ss:$0 sm:$0xff]  ;;  %v434_v46 = vmul.f32 %v1195_v31, %v1554_v30  ;;  %v437_v48 = vmul.f32 %v1200_v33, %v1554_v30  ;;  %v1269_v63 = vld [vmem:[%s1545_s8 + $0x68] sm:$0xff]   ;;  %v1262_v33 = vld [vmem:[%s1545_s8 + $0x30] sm:$0xff]  }
  0x19   : > { %v450_v47 = vmul.f32 %v1227_v32, %v1554_v30  ;;  %v453_v49 = vmul.f32 %v1232_v34, %v1554_v30  ;;  %v1208_v52 = vunpack.c.h.bf16 %v1259_v35  ;;  %v1240_v53 = vunpack.c.h.bf16 %v1267_v36  ;;  %v1270_v34 = vld [vmem:[%s1545_s8 + $0x70] sm:$0xff]  }
  0x1a   : > { %1303 = vmatpush3.bf16.msra.mxu0 %v1387_v3  ;;  %1355 = vmatpush3.bf16.msra.mxu1 %v1387_v3  ;;  %v1572_v54 = vadd.f32 %v1565_v43, %v436_v37  ;;  %v1575_v55 = vadd.f32 %v1565_v43, %v452_v38  ;;  %v435_v56 = vmul.f32 %v1196_v39, %v1554_v30  ;;  %v1204_v60 = vunpack.c.h.bf16 %v1258_v41 }
  0x1b   : > { %1304 = vmatprep.subr.bf16.mxu0 %v1388_v6  ;;  %1348 = vmatprep.subr.bf16.mxu1 %v1388_v6  ;;  %v451_v57 = vmul.f32 %v1228_v40, %v1554_v30  ;;  %v440_v58 = vmul.f32 %v1207_v44, %v1554_v30  ;;  %v456_v59 = vmul.f32 %v1239_v45, %v1554_v30  ;;  %v1236_v61 = vunpack.c.h.bf16 %v1266_v42 }
  0x1c   : > { %v1584_v0 = vadd.f32 %v1565_v43, %v434_v46  ;;  %v1587_v1 = vadd.f32 %v1565_v43, %v450_v47  ;;  %v1590_v2 = vadd.f32 %v1565_v43, %v437_v48  ;;  %v1593_v3 = vadd.f32 %v1565_v43, %v453_v49 }
  0x1d   : > { %v438_v4 = vmul.f32 %v1203_v50, %v1554_v30  ;;  %v454_v5 = vmul.f32 %v1235_v51, %v1554_v30  ;;  %v1219_v44 = vunpack.c.l.bf16 %v1262_v33  ;;  %v1251_v45 = vunpack.c.l.bf16 %v1270_v34 }
  0x1e   : > { %1305 = vmatpush3.bf16.msra.mxu0 %v1388_v6  ;;  %1356 = vmatpush3.bf16.msra.mxu1 %v1388_v6  ;;  %v441_v6 = vmul.f32 %v1208_v52, %v1554_v30  ;;  %v1654_v52 = vld [vmem:[%s1859_s5] ss:$0 sm:$0xff] }
  0x1f   : > { %1306 = vmatprep.subr.bf16.mxu0 %v1389_v7  ;;  %1349 = vmatprep.subr.bf16.mxu1 %v1389_v7  ;;  %v1618_v24 = vadd.f32 %v1565_v43, %v438_v4  ;;  %v1621_v25 = vadd.f32 %v1565_v43, %v454_v5  ;;  %v446_v5 = vmul.f32 %v1219_v44, %v1554_v30 }
  0x20   : > { %v1624_v26 = vadd.f32 %v1565_v43, %v441_v6  ;;  %v462_v6 = vmul.f32 %v1251_v45, %v1554_v30 }
  0x22   : > { %1307 = vmatpush3.bf16.msra.mxu0 %v1389_v7  ;;  %1357 = vmatpush3.bf16.msra.mxu1 %v1389_v7  ;;  %v457_v7 = vmul.f32 %v1240_v53, %v1554_v30 }
  0x23   : > { %1308 = vmatprep.subr.bf16.mxu0 %v1390_v8  ;;  %1350 = vmatprep.subr.bf16.mxu1 %v1390_v8 }
  0x24   : > { %v1627_v27 = vadd.f32 %v1565_v43, %v457_v7 }
  0x26   : > { %1309 = vmatpush3.bf16.msra.mxu0 %v1390_v8  ;;  %1358 = vmatpush3.bf16.msra.mxu1 %v1390_v8  ;;  %v1260_v8 = vld [vmem:[%s1545_s8 + $0x20] sm:$0xff]  }
  0x27   : > { %1310 = vmatprep.subr.bf16.mxu0 %v1391_v9  ;;  %1351 = vmatprep.subr.bf16.mxu1 %v1391_v9  ;;  %v1212_v31 = vunpack.c.h.bf16 %v1260_v8 }
  0x29   : > { %v443_v50 = vmul.f32 %v1212_v31, %v1554_v30 }
  0x2a   : > { %1311 = vmatpush3.bf16.msra.mxu0 %v1391_v9  ;;  %1359 = vmatpush3.bf16.msra.mxu1 %v1391_v9  ;;  %v1268_v9 = vld [vmem:[%s1545_s8 + $0x60] sm:$0xff]  }
  0x2b   : > { %v1244_v32 = vunpack.c.h.bf16 %v1268_v9 }
  0x2d   : > { %1313 = vmatmul.mubr.bf16.vlgmr.msra.gmra.mxu0 %v1394_v10  ;;  %1329 = vmatmul.mubr.bf16.vlgmr.msra.gmra.mxu1 %v1395_v11  ;;  %v1602_v10 = vadd.f32 %v1565_v43, %v435_v56  ;;  %v1605_v11 = vadd.f32 %v1565_v43, %v451_v57  ;;  %v459_v51 = vmul.f32 %v1244_v32, %v1554_v30  ;;  %v1220_v57 = vunpack.c.h.bf16 %v1262_v33 }
  0x2e   : > { %1316 = vmatprep.mubr.bf16.mxu0 %v1396_v12  ;;  %1332 = vmatprep.mubr.bf16.mxu1 %v1397_v13  ;;  %v1215_v12 = vunpack.c.l.bf16 %v1261_v62  ;;  %v1247_v13 = vunpack.c.l.bf16 %v1269_v63 }
  0x30   : > { %v444_v28 = vmul.f32 %v1215_v12, %v1554_v30  ;;  %v460_v29 = vmul.f32 %v1247_v13, %v1554_v30  ;;  %v1677_v13 = vadd.f32 %v1565_v43, %v443_v50 }
  0x32   : > { %v1644_v48 = vadd.f32 %v1565_v43, %v444_v28  ;;  %v1647_v49 = vadd.f32 %v1565_v43, %v460_v29 }
  0x35   : > { %1317 = vmatmul.mubr.bf16.gmra.mxu0 %v1398_v14  ;;  %1333 = vmatmul.mubr.bf16.gmra.mxu1 %v1399_v15  ;;  %v1608_v14 = vadd.f32 %v1565_v43, %v440_v58  ;;  %v1611_v15 = vadd.f32 %v1565_v43, %v456_v59  ;;  %v1252_v58 = vunpack.c.h.bf16 %v1270_v34 }
  0x36   : > { %1320 = vmatprep.mubr.bf16.mxu0 %v1400_v16  ;;  %1336 = vmatprep.mubr.bf16.mxu1 %v1401_v17  ;;  %v439_v16 = vmul.f32 %v1204_v60, %v1554_v30  ;;  %v455_v17 = vmul.f32 %v1236_v61, %v1554_v30 }
  0x38   : > { %v1634_v35 = vadd.f32 %v1565_v43, %v439_v16  ;;  %v1637_v36 = vadd.f32 %v1565_v43, %v455_v17  ;;  %v1680_v16 = vadd.f32 %v1565_v43, %v459_v51  ;;  %v1685_v17 = vld [vmem:[%s1860_s6] ss:$0 sm:$0xff] }
  0x3d   : > { %1321 = vmatmul.mubr.bf16.gmra.mxu0 %v1402_v18  ;;  %1337 = vmatmul.mubr.bf16.gmra.mxu1 %v1403_v19  ;;  %v1211_v18 = vunpack.c.l.bf16 %v1260_v8  ;;  %v1243_v19 = vunpack.c.l.bf16 %v1268_v9 }
  0x3e   : > { %1324 = vmatprep.mubr.bf16.mxu0 %v1404_v20  ;;  %1340 = vmatprep.mubr.bf16.mxu1 %v1405_v21  ;;  %v1216_v20 = vunpack.c.h.bf16 %v1261_v62  ;;  %v1248_v21 = vunpack.c.h.bf16 %v1269_v63 }
  0x3f   : > { %v442_v39 = vmul.f32 %v1211_v18, %v1554_v30  ;;  %v458_v40 = vmul.f32 %v1243_v19, %v1554_v30 }
  0x40   : > { %v445_v41 = vmul.f32 %v1216_v20, %v1554_v30  ;;  %v461_v42 = vmul.f32 %v1248_v21, %v1554_v30 }
  0x41   : > { %v1659_v59 = vadd.f32 %v1565_v43, %v442_v39  ;;  %v1662_v60 = vadd.f32 %v1565_v43, %v458_v40 }
  0x42   : > { %v1665_v61 = vadd.f32 %v1565_v43, %v445_v41  ;;  %v1668_v62 = vadd.f32 %v1565_v43, %v461_v42 }
  0x45   : > { %1325 = vmatmul.mubr.bf16.gmra.mxu0 %v1406_v22  ;;  %1341 = vmatmul.mubr.bf16.gmra.mxu1 %v1407_v23  ;;  %v1263_v22 = vld [vmem:[%s1545_s8 + $0x38] sm:$0xff]  }
  0x46   : > { %v1271_v23 = vld [vmem:[%s1545_s8 + $0x78] sm:$0xff]   ;;  %v1223_v37 = vunpack.c.l.bf16 %v1263_v22  ;;  %v1224_v46 = vunpack.c.h.bf16 %v1263_v22  ;;  %v447_v22 = vmul.f32 %v1220_v57, %v1554_v30 }
  0x47   : > { %v1255_v38 = vunpack.c.l.bf16 %v1271_v23  ;;  %v1256_v47 = vunpack.c.h.bf16 %v1271_v23  ;;  %v463_v23 = vmul.f32 %v1252_v58, %v1554_v30 }
  0x48   : > { %v448_v53 = vmul.f32 %v1223_v37, %v1554_v30  ;;  %v449_v7 = vmul.f32 %v1224_v46, %v1554_v30  ;;  %v1701_v37 = vadd.f32 %v1565_v43, %v446_v5 }
  0x49   : > { %v464_v56 = vmul.f32 %v1255_v38, %v1554_v30  ;;  %v465_v8 = vmul.f32 %v1256_v47, %v1554_v30  ;;  %v1704_v38 = vadd.f32 %v1565_v43, %v462_v6  ;;  %v1724_v47 = vadd.f32 %v1565_v43, %v447_v22 }
  0x4a   : > { %v1688_v20 = vadd.f32 %v1565_v43, %v448_v53  ;;  %v1707_v39 = vadd.f32 %v1565_v43, %v449_v7 }
  0x4b   : > { %v1691_v21 = vadd.f32 %v1565_v43, %v464_v56  ;;  %v1710_v30 = vadd.f32 %v1565_v43, %v465_v8 }
  0xed   : > { %v1314_v63 = vpop.f32.mrf.mxu0  ;;  %v1330_v4 = vpop.f32.mrf.mxu1 }
  0xee   : > { %v867_v9 = vmul.f32 %v1314_v63, %v1654_v52  ;;  %v883_v12 = vmul.f32 %v1330_v4, %v1654_v52 }
  0xef   : > { %v731_v18 = vpop.f32.mrf.mxu0  ;;  %v795_v19 = vpop.f32.mrf.mxu1 }
  0xf0   : > { %v899_v28 = vadd.f32 %v867_v9, %v1572_v54  ;;  %v915_v29 = vadd.f32 %v883_v12, %v1575_v55  ;;  %v865_v31 = vmul.f32 %v1654_v52, %v731_v18  ;;  %v881_v32 = vmul.f32 %v1654_v52, %v795_v19 }
  0xf1   : > { %v1315_v33 = vpop.f32.mrf.mxu0  ;;  %v1331_v34 = vpop.f32.mrf.mxu1 }
  0xf2   : > { %v938_v54 = vadd.f32 %v1685_v17, %v899_v28  ;;  %v954_v55 = vadd.f32 %v1685_v17, %v915_v29  ;;  %v897_v40 = vadd.f32 %v865_v31, %v1584_v0  ;;  %v913_v41 = vadd.f32 %v881_v32, %v1587_v1 }
  0xf3   : > { %v868_v42 = vmul.f32 %v1315_v33, %v1654_v52  ;;  %v884_v44 = vmul.f32 %v1331_v34, %v1654_v52  ;;  %v734_v45 = vpop.f32.mrf.mxu0  ;;  %v798_v46 = vpop.f32.mrf.mxu1  ;;  %v1727_v0 = vadd.f32 %v1565_v43, %v463_v23 }
  0xf4   : > { %v970_v1 = vmax.f32 %v938_v54, 0.0  ;;  %v986_v50 = vmax.f32 %v954_v55, 0.0  ;;  %v936_v51 = vadd.f32 %v1685_v17, %v897_v40  ;;  %v952_v53 = vadd.f32 %v1685_v17, %v913_v41 }
  0xf5   : > { %v900_v56 = vadd.f32 %v868_v42, %v1590_v2  ;;  %v916_v57 = vadd.f32 %v884_v44, %v1593_v3  ;;  %v866_v58 = vmul.f32 %v1654_v52, %v734_v45  ;;  %v882_v63 = vmul.f32 %v1654_v52, %v798_v46  ;;  %v1318_v4 = vpop.f32.mrf.mxu0  ;;  %v1334_v5 = vpop.f32.mrf.mxu1 }
  0xf6   : > { %1002 = vst [vmem:[%s1719_s19 + $0x10] sm:$0xff] %v970_v1  ;;  %1018 = vst [vmem:[%s1719_s19 + $0x90] sm:$0xff] %v986_v50  ;;  %v968_v43 = vmax.f32 %v936_v51, 0.0  ;;  %v984_v6 = vmax.f32 %v952_v53, 0.0  ;;  %v871_v7 = vmul.f32 %v1318_v4, %v1654_v52  ;;  %v887_v8 = vmul.f32 %v1334_v5, %v1654_v52 }
  0xf7   : > { %v939_v2 = vadd.f32 %v1685_v17, %v900_v56  ;;  %v955_v3 = vadd.f32 %v1685_v17, %v916_v57  ;;  %v898_v9 = vadd.f32 %v866_v58, %v1602_v10  ;;  %v914_v12 = vadd.f32 %v882_v63, %v1605_v11  ;;  %v747_v18 = vpop.f32.mrf.mxu0  ;;  %v811_v19 = vpop.f32.mrf.mxu1 }
  0xf8   : > { %1000 = vst [vmem:[%s1719_s19] sm:$0xff] %v968_v43  ;;  %1016 = vst [vmem:[%s1719_s19 + $0x80] sm:$0xff] %v984_v6  ;;  %v903_v22 = vadd.f32 %v871_v7, %v1608_v14  ;;  %v919_v23 = vadd.f32 %v887_v8, %v1611_v15  ;;  %v869_v28 = vmul.f32 %v1654_v52, %v747_v18 }
  0xf9   : > { %v885_v29 = vmul.f32 %v1654_v52, %v811_v19  ;;  %v971_v31 = vmax.f32 %v939_v2, 0.0  ;;  %v987_v32 = vmax.f32 %v955_v3, 0.0  ;;  %v937_v10 = vadd.f32 %v1685_v17, %v898_v9  ;;  %v1319_v33 = vpop.f32.mrf.mxu0  ;;  %v1335_v34 = vpop.f32.mrf.mxu1 }
  0xfa   : > { %v953_v11 = vadd.f32 %v1685_v17, %v914_v12  ;;  %v942_v54 = vadd.f32 %v1685_v17, %v903_v22  ;;  %v958_v55 = vadd.f32 %v1685_v17, %v919_v23  ;;  %v901_v14 = vadd.f32 %v869_v28, %v1618_v24 }
  0xfb   : > { %v917_v15 = vadd.f32 %v885_v29, %v1621_v25  ;;  %1003 = vst [vmem:[%s1719_s19 + $0x18] sm:$0xff] %v971_v31  ;;  %1019 = vst [vmem:[%s1719_s19 + $0x98] sm:$0xff] %v987_v32  ;;  %v969_v40 = vmax.f32 %v937_v10, 0.0  ;;  %v872_v42 = vmul.f32 %v1319_v33, %v1654_v52  ;;  %v888_v44 = vmul.f32 %v1335_v34, %v1654_v52  ;;  %v750_v45 = vpop.f32.mrf.mxu0  ;;  %v814_v46 = vpop.f32.mrf.mxu1 }
  0xfc   : > { %v985_v41 = vmax.f32 %v953_v11, 0.0  ;;  %v974_v1 = vmax.f32 %v942_v54, 0.0  ;;  %v990_v50 = vmax.f32 %v958_v55, 0.0  ;;  %v940_v51 = vadd.f32 %v1685_v17, %v901_v14 }
  0xfd   : > { %v956_v24 = vadd.f32 %v1685_v17, %v917_v15  ;;  %1001 = vst [vmem:[%s1719_s19 + $0x8] sm:$0xff] %v969_v40  ;;  %v904_v25 = vadd.f32 %v872_v42, %v1624_v26  ;;  %v920_v53 = vadd.f32 %v888_v44, %v1627_v27  ;;  %v870_v56 = vmul.f32 %v1654_v52, %v750_v45  ;;  %v1322_v58 = vpop.f32.mrf.mxu0  ;;  %v1338_v63 = vpop.f32.mrf.mxu1 }
  0xfe   : > { %1017 = vst [vmem:[%s1719_s19 + $0x88] sm:$0xff] %v985_v41  ;;  %v886_v57 = vmul.f32 %v1654_v52, %v814_v46  ;;  %1006 = vst [vmem:[%s1719_s19 + $0x30] sm:$0xff] %v974_v1  ;;  %v972_v4 = vmax.f32 %v940_v51, 0.0  ;;  %v875_v43 = vmul.f32 %v1322_v58, %v1654_v52  ;;  %v891_v6 = vmul.f32 %v1338_v63, %v1654_v52 }
  0xff   : > { %1022 = vst [vmem:[%s1719_s19 + $0xb0] sm:$0xff] %v990_v50  ;;  %v988_v5 = vmax.f32 %v956_v24, 0.0  ;;  %v943_v26 = vadd.f32 %v1685_v17, %v904_v25  ;;  %v959_v27 = vadd.f32 %v1685_v17, %v920_v53  ;;  %v902_v7 = vadd.f32 %v870_v56, %v1634_v35  ;;  %v763_v2 = vpop.f32.mrf.mxu0  ;;  %v827_v3 = vpop.f32.mrf.mxu1 }
 0x100   : > { %v918_v8 = vadd.f32 %v886_v57, %v1637_v36  ;;  %1004 = vst [vmem:[%s1719_s19 + $0x20] sm:$0xff] %v972_v4  ;;  %v907_v9 = vadd.f32 %v875_v43, %v1644_v48  ;;  %v923_v12 = vadd.f32 %v891_v6, %v1647_v49  ;;  %v873_v18 = vmul.f32 %v1654_v52, %v763_v2 }
 0x101   : > { %1020 = vst [vmem:[%s1719_s19 + $0xa0] sm:$0xff] %v988_v5  ;;  %v889_v19 = vmul.f32 %v1654_v52, %v827_v3  ;;  %v975_v22 = vmax.f32 %v943_v26, 0.0  ;;  %v991_v23 = vmax.f32 %v959_v27, 0.0  ;;  %v941_v35 = vadd.f32 %v1685_v17, %v902_v7  ;;  %v1323_v28 = vpop.f32.mrf.mxu0  ;;  %v1339_v29 = vpop.f32.mrf.mxu1 }
 0x102   : > { %v957_v36 = vadd.f32 %v1685_v17, %v918_v8  ;;  %v946_v31 = vadd.f32 %v1685_v17, %v907_v9  ;;  %v962_v32 = vadd.f32 %v1685_v17, %v923_v12  ;;  %v905_v48 = vadd.f32 %v873_v18, %v1659_v59 }
 0x103   : > { %v921_v49 = vadd.f32 %v889_v19, %v1662_v60  ;;  %1007 = vst [vmem:[%s1719_s19 + $0x38] sm:$0xff] %v975_v22  ;;  %1023 = vst [vmem:[%s1719_s19 + $0xb8] sm:$0xff] %v991_v23  ;;  %v973_v10 = vmax.f32 %v941_v35, 0.0  ;;  %v876_v33 = vmul.f32 %v1323_v28, %v1654_v52  ;;  %v892_v34 = vmul.f32 %v1339_v29, %v1654_v52  ;;  %v766_v54 = vpop.f32.mrf.mxu0  ;;  %v830_v55 = vpop.f32.mrf.mxu1 }
 0x104   : > { %v989_v11 = vmax.f32 %v957_v36, 0.0  ;;  %v978_v14 = vmax.f32 %v946_v31, 0.0  ;;  %v994_v15 = vmax.f32 %v962_v32, 0.0  ;;  %v944_v40 = vadd.f32 %v1685_v17, %v905_v48 }
 0x105   : > { %v960_v59 = vadd.f32 %v1685_v17, %v921_v49  ;;  %1005 = vst [vmem:[%s1719_s19 + $0x28] sm:$0xff] %v973_v10  ;;  %v908_v60 = vadd.f32 %v876_v33, %v1665_v61  ;;  %v924_v41 = vadd.f32 %v892_v34, %v1668_v62  ;;  %v874_v42 = vmul.f32 %v1654_v52, %v766_v54  ;;  %v1326_v45 = vpop.f32.mrf.mxu0  ;;  %v1342_v46 = vpop.f32.mrf.mxu1 }
 0x106   : > { %1021 = vst [vmem:[%s1719_s19 + $0xa8] sm:$0xff] %v989_v11  ;;  %v890_v44 = vmul.f32 %v1654_v52, %v830_v55  ;;  %1010 = vst [vmem:[%s1719_s19 + $0x50] sm:$0xff] %v978_v14  ;;  %v976_v1 = vmax.f32 %v944_v40, 0.0  ;;  %v879_v51 = vmul.f32 %v1326_v45, %v1654_v52  ;;  %v895_v24 = vmul.f32 %v1342_v46, %v1654_v52 }
 0x107   : > { %1026 = vst [vmem:[%s1719_s19 + $0xd0] sm:$0xff] %v994_v15  ;;  %v992_v50 = vmax.f32 %v960_v59, 0.0  ;;  %v947_v61 = vadd.f32 %v1685_v17, %v908_v60  ;;  %v963_v62 = vadd.f32 %v1685_v17, %v924_v41  ;;  %v906_v25 = vadd.f32 %v874_v42, %v1677_v13  ;;  %v779_v56 = vpop.f32.mrf.mxu0  ;;  %v843_v57 = vpop.f32.mrf.mxu1 }
 0x108   : > { %v922_v53 = vadd.f32 %v890_v44, %v1680_v16  ;;  %1008 = vst [vmem:[%s1719_s19 + $0x40] sm:$0xff] %v976_v1  ;;  %v911_v58 = vadd.f32 %v879_v51, %v1688_v20  ;;  %v927_v63 = vadd.f32 %v895_v24, %v1691_v21  ;;  %v877_v4 = vmul.f32 %v1654_v52, %v779_v56 }
 0x109   : > { %1024 = vst [vmem:[%s1719_s19 + $0xc0] sm:$0xff] %v992_v50  ;;  %v893_v5 = vmul.f32 %v1654_v52, %v843_v57  ;;  %v979_v43 = vmax.f32 %v947_v61, 0.0  ;;  %v995_v6 = vmax.f32 %v963_v62, 0.0  ;;  %v945_v13 = vadd.f32 %v1685_v17, %v906_v25  ;;  %v1327_v26 = vpop.f32.mrf.mxu0  ;;  %v1343_v27 = vpop.f32.mrf.mxu1 }
 0x10a   : > { %v961_v16 = vadd.f32 %v1685_v17, %v922_v53  ;;  %v950_v7 = vadd.f32 %v1685_v17, %v911_v58  ;;  %v966_v8 = vadd.f32 %v1685_v17, %v927_v63  ;;  %v909_v20 = vadd.f32 %v877_v4, %v1701_v37 }
 0x10b   : > { %v925_v21 = vadd.f32 %v893_v5, %v1704_v38  ;;  %1011 = vst [vmem:[%s1719_s19 + $0x58] sm:$0xff] %v979_v43  ;;  %1027 = vst [vmem:[%s1719_s19 + $0xd8] sm:$0xff] %v995_v6  ;;  %v977_v2 = vmax.f32 %v945_v13, 0.0  ;;  %v880_v9 = vmul.f32 %v1327_v26, %v1654_v52  ;;  %v896_v12 = vmul.f32 %v1343_v27, %v1654_v52  ;;  %v782_v18 = vpop.f32.mrf.mxu0  ;;  %v846_v19 = vpop.f32.mrf.mxu1 }
 0x10c   : > { %v993_v3 = vmax.f32 %v961_v16, 0.0  ;;  %v982_v22 = vmax.f32 %v950_v7, 0.0  ;;  %v998_v23 = vmax.f32 %v966_v8, 0.0  ;;  %v948_v35 = vadd.f32 %v1685_v17, %v909_v20 }
 0x10d   : > { %v964_v37 = vadd.f32 %v1685_v17, %v925_v21  ;;  %1009 = vst [vmem:[%s1719_s19 + $0x48] sm:$0xff] %v977_v2  ;;  %v912_v38 = vadd.f32 %v880_v9, %v1707_v39  ;;  %v928_v36 = vadd.f32 %v896_v12, %v1710_v30  ;;  %v878_v28 = vmul.f32 %v1654_v52, %v782_v18 }
 0x10e   : > { %1025 = vst [vmem:[%s1719_s19 + $0xc8] sm:$0xff] %v993_v3  ;;  %v894_v29 = vmul.f32 %v1654_v52, %v846_v19  ;;  %1014 = vst [vmem:[%s1719_s19 + $0x70] sm:$0xff] %v982_v22  ;;  %v980_v31 = vmax.f32 %v948_v35, 0.0 }
 0x10f   : > { %1030 = vst [vmem:[%s1719_s19 + $0xf0] sm:$0xff] %v998_v23  ;;  %v996_v32 = vmax.f32 %v964_v37, 0.0  ;;  %v951_v48 = vadd.f32 %v1685_v17, %v912_v38  ;;  %v967_v49 = vadd.f32 %v1685_v17, %v928_v36  ;;  %v910_v39 = vadd.f32 %v878_v28, %v1724_v47 }
 0x110   : > { %v926_v30 = vadd.f32 %v894_v29, %v1727_v0  ;;  %1012 = vst [vmem:[%s1719_s19 + $0x60] sm:$0xff] %v980_v31 }
 0x111   : > { %1028 = vst [vmem:[%s1719_s19 + $0xe0] sm:$0xff] %v996_v32  ;;  %v983_v10 = vmax.f32 %v951_v48, 0.0  ;;  %v999_v11 = vmax.f32 %v967_v49, 0.0  ;;  %v949_v52 = vadd.f32 %v1685_v17, %v910_v39 }
 0x112   : > { %v965_v33 = vadd.f32 %v1685_v17, %v926_v30 }
 0x113   : > { %1015 = vst [vmem:[%s1719_s19 + $0x78] sm:$0xff] %v983_v10  ;;  %1031 = vst [vmem:[%s1719_s19 + $0xf8] sm:$0xff] %v999_v11  ;;  %v981_v34 = vmax.f32 %v949_v52, 0.0 }
 0x114   : > { %v997_v54 = vmax.f32 %v965_v33, 0.0 }
 0x115   : > { %1013 = vst [vmem:[%s1719_s19 + $0x68] sm:$0xff] %v981_v34 }
 0x116   : > { %1029 = vst [vmem:[%s1719_s19 + $0xe8] sm:$0xff] %v997_v54 }
 0x117 PF: > { %s17_s26 = sadd.s32 1, %s1430_s26   ;;  %s1862_s24 = smov %s1426_s25 }
 0x118   : > { %p14_p5 = scmp.ge.s32.totalorder %s17_s26, 4   ;;  %s1863_s25 = smov %s1865_s27 }
 0x11a   :  { %16 = sbr.rel (!%p14_p5) target bundleno = 2 (0x2), region = 81 }

// kernel: residual_block_pallas.3
= control target key start
LH: loop header
LB: loop body
LE: loop exit
PB: predicated region body
PF: predicated region fallthrough
CT: control target
= control target key end

     0   :  { %s3159_s21 = smov 0   ;;  %s3161_s22 = smov 0   ;;  %s3875_s0 = inlined_call_operand.vmem [shape: bf16[2,16,18,128], index: 0, kind: input, shape index: {}, may-alias: {0,1,2}]   ;;  %s3876_s1 = inlined_call_operand.vmem [shape: bf16[2,16,18,128], index: 1, kind: input, shape index: {}, may-alias: {0,1,2}]   ;;  %s3877_s2 = inlined_call_operand.vmem [shape: bf16[2,16,18,128], index: 2, kind: input, shape index: {}, may-alias: {0,1,2}]   ;;  %s3878_s3 = inlined_call_operand.vmem [shape: bf16[9,128,128], index: 3, kind: input, shape index: {}]   ;;  %s3879_s4 = inlined_call_operand.vmem [shape: bf16[2,16,18,128], index: 4, kind: output, shape index: {0}]   ;;  %s3880_s5 = inlined_call_operand.vmem [shape: f32[2,1,128], index: 5, kind: output, shape index: {1}]   ;;  %s3881_s6 = inlined_call_operand.vmem [shape: f32[2,1,128], index: 6, kind: output, shape index: {2}]  }
   0x1   :  { %3883 = sst [smem:[#allocation10_spill]] %s3875_s0  ;;  %s3163_s23 = smov 0  }
   0x2   :  { %s3165_s24 = smov 0   ;;  %s3167_s25 = smov 0  }
   0x3 LB: > { %s26_s26 = sadd.s32 1, %s3113_s23  ;;  %s29_s27 = sadd.s32 1, %s3117_s24  ;;  %s3121_s25 = sphi %s3167_s25, %s17_s25   ;;  %s3117_s24 = sphi %s3165_s24, %s3912_s24   ;;  %s3113_s23 = sphi %s3163_s23, %s3911_s23   ;;  %s3109_s22 = sphi %s3161_s22, %s3910_s22   ;;  %s3105_s21 = sphi %s3159_s21, %s3909_s21  }
   0x4   : > { %p27_p0 = scmp.ge.s32.totalorder %s26_s26, 4  ;;  %p2357_p1 = scmp.ge.s32.totalorder %s3121_s25, 1 }
   0x5   : > { %p303_p2 = scmp.lt.s32.totalorder %s3121_s25, 9 }
   0x6   : > { %s3914_s26 = smov (%p27_p0, %s26_s26), 0  ;;  %s3916_s27 = smov (!%p27_p0, %s29_s27), %s3117_s24 }
   0x7   : > { %p304_p3 = pnand %p2357_p1, %p303_p2  ;;  %p31_p4 = scmp.ge.s32.totalorder %s3916_s27, 2 }
   0x9   : > { %s3918_s27 = smov (%p31_p4, %s3916_s27), 0  ;;  %307 = sbr.rel (%p304_p3) target bundleno = 428 (0x1ac), region = 36 }
   0xe   : > { %v3007_v0 = vld [vmem:[%s3878_s3 + $0x78] sm:$0xff]   ;;  %s3195_s30 = sshll.u32 %s3105_s21, 2  ;;  %p376_p5 = scmp.lt.s32.totalorder %s3109_s22, 1  ;;  %v3009_v2 = vld [vmem:[%s3878_s3 + $0x70] sm:$0xff]   ;;  %v3011_v4 = vld [vmem:[%s3878_s3 + $0x68] sm:$0xff]   ;;  %vm898_vm3 = vcmask 1042432  }
   0xf   : > { %v3008_v1 = vld [vmem:[%s3878_s3 + $0x38] sm:$0xff]   ;;  %2730 = vmatprep.subr.bf16.mxu0 %v3007_v0  ;;  %p378_p6 = scmp.lt.s32.totalorder %s3195_s30, 15  ;;  %v3010_v3 = vld [vmem:[%s3878_s3 + $0x30] sm:$0xff]   ;;  %v3012_v5 = vld [vmem:[%s3878_s3 + $0x28] sm:$0xff]   ;;  %s2361_s10 = sadd.s32 4294967295, %s3195_s30  ;;  %vm899_vm4 = vcmask 1046532  }
  0x10   : > { %2754 = vmatprep.subr.bf16.mxu1 %v3008_v1  ;;  %2731 = vmatpush3.bf16.msra.mxu0 %v3007_v0  ;;  %s3920_s22 = smov (!%p376_p5, %s3109_s22), 1  ;;  %v3013_v6 = vld [vmem:[%s3878_s3 + $0x60] sm:$0xff]   ;;  %p388_p7 = scmp.gt.s32.totalorder %s2361_s10, 0  ;;  %v3015_v8 = vld [vmem:[%s3878_s3 + $0x58] sm:$0xff]   ;;  %v3017_v10 = vld [vmem:[%s3878_s3 + $0x50] sm:$0xff]   ;;  %vm2043_vm6 = vcmask 1040384  }
  0x11   : > { %2755 = vmatpush3.bf16.msra.mxu1 %v3008_v1  ;;  %2732 = vmatprep.subr.bf16.mxu0 %v3009_v2  ;;  %s379_s15 = scalar_select %p378_p6, %s3195_s30, 15  ;;  %v3014_v7 = vld [vmem:[%s3878_s3 + $0x20] sm:$0xff]   ;;  %v3016_v9 = vld [vmem:[%s3878_s3 + $0x18] sm:$0xff]   ;;  %v3018_v11 = vld [vmem:[%s3878_s3 + $0x10] sm:$0xff]   ;;  %vm512_vm0 = vsmask.f32 3328 }
  0x12   : > { %2756 = vmatprep.subr.bf16.mxu1 %v3010_v3  ;;  %s3214_s18 = smul.u32 48, %s3920_s22  ;;  %s3219_s28 = scalar_lea.vmem %s3880_s5, %s3920_s22  ;;  %v3019_v20 = vld [vmem:[%s3878_s3 + $0x48] sm:$0xff]   ;;  %vm513_vm1 = vsmask.f32 7440  ;;  %v3021_v26 = vld [vmem:[%s3878_s3 + $0x40] sm:$0xff]   ;;  %v3312_v39 = vld [vmem:[%s3878_s3 + $0xb8] sm:$0xff]  }
  0x13   : > { %s2962_s29 = smul.u32 3, %s379_s15  ;;  %s3224_s9 = scalar_lea.vmem %s3881_s6, %s3920_s22  ;;  %v3020_v21 = vld [vmem:[%s3878_s3 + $0x8] sm:$0xff]   ;;  %v3022_v30 = vld [vmem:[%s3878_s3] sm:$0xff]   ;;  %vm3298_vm2 = vmor %vm512_vm0, %vm513_vm1  ;;  %vm2044_vm7 = vsmask.f32 256 }
  0x14   : > { %2733 = vmatpush3.bf16.msra.mxu0 %v3009_v2  ;;  %p2362_p8 = scmp.lt.s32.totalorder %s2361_s10, 15  ;;  %s3922_s10 = smov (!%p388_p7, %s2361_s10), 0  ;;  %v3025_v40 = vld [vmem:[%s3878_s3 + $0xf8] sm:$0xff]   ;;  %v3027_v62 = vld [vmem:[%s3878_s3 + $0xf0] sm:$0xff]   ;;  %vm3403_vm5 = vmor %vm898_vm3, %vm899_vm4 }
  0x15   : > { %2757 = vmatpush3.bf16.msra.mxu1 %v3010_v3  ;;  %2734 = vmatprep.subr.bf16.mxu0 %v3011_v4  ;;  %s3231_s13 = sadd.s32 %s3214_s18, %s2962_s29  ;;  %p456_p9 = scmp.gt.s32.totalorder %s3105_s21, 0  ;;  %v3079_v31 = vld [vmem:[%s3878_s3 + $0x218] sm:$0xff]   ;;  %vm3794_vm8 = vmand %vm2043_vm6, %vm2044_vm7 }
  0x16   : > { %2758 = vmatprep.subr.bf16.mxu1 %v3012_v5  ;;  %s3882_s22 = sshll.u32 %s3231_s13, 2  ;;  %s3924_s10 = smov (!%p2362_p8, %s3922_s10), 15 }
  0x17   : > { %s3884_s0 = sld [smem:[#allocation10_spill]]  ;;  %s2964_s11 = smul.u32 3, %s3924_s10 }
  0x18   : > { %2735 = vmatpush3.bf16.msra.mxu0 %v3011_v4  ;;  %s457_s15 = scalar_select %p456_p9, 1, 0 }
  0x19   : > { %2759 = vmatpush3.bf16.msra.mxu1 %v3012_v5  ;;  %2736 = vmatprep.subr.bf16.mxu0 %v3013_v6  ;;  %s3264_s19 = sadd.s32 %s2964_s11, %s3214_s18  ;;  %p476_p12 = scmp.lt.s32.totalorder %s3105_s21, 3 }
  0x1a   : > { %2760 = vmatprep.subr.bf16.mxu1 %v3014_v7  ;;  %s3266_s10 = scvt.s32.f32 %s457_s15  ;;  %s2367_s12 = sshll.u32 %s3264_s19, 2 }
  0x1b   : > { %s398_s7 = scalar_lea.vmem %s3876_s1, %s2367_s12  ;;  %p2611_p0 = scmp.ne.s32.totalorder %s3105_s21, 0 }
  0x1c   : > { %2737 = vmatpush3.bf16.msra.mxu0 %v3013_v6  ;;  %s461_s14 = sshrl.u32 %s3266_s10, 16  ;;  %p460_p10 = scmp.ne.f32.partialorder %s3266_s10, %s3266_s10  ;;  %v450_v34 = vld [vmem:[%s398_s7] sm:$0xf]  ;;  %v451_v35 = vld [vmem:[%s398_s7 + $0x4] sm:$0xf] }
  0x1d   : > { %s3249_s8 = scalar_lea.vmem %s3884_s0, %s3882_s22  ;;  %2761 = vmatpush3.bf16.msra.mxu1 %v3014_v7  ;;  %2738 = vmatprep.subr.bf16.mxu0 %v3015_v8  ;;  %s462_s17 = sand.u32 1, %s461_s14  ;;  %v452_v36 = vld [vmem:[%s398_s7 + $0x8] sm:$0x1] }
  0x1e   : > { %2762 = vmatprep.subr.bf16.mxu1 %v3016_v9  ;;  %v3258_v12 = vld [vmem:[%s3249_s8] sm:$0xf]  ;;  %v3261_v13 = vld [vmem:[%s3249_s8 + $0x4] sm:$0xf]  ;;  %v3269_v14 = vld [vmem:[%s3249_s8 + $0x8] sm:$0x1] }
  0x1f   : > { %v540_v15 = vshrl.u32 %v3258_v12, 16  ;;  %v543_v16 = vshll.u32 %v3258_v12, 16  ;;  %v549_v17 = vshll.u32 %v3261_v13, 16  ;;  %v553_v18 = vshrl.u32 %v3261_v13, 16  ;;  %s463_s20 = sadd.s32 32767, %s462_s17 }
  0x20   : > { %2739 = vmatpush3.bf16.msra.mxu0 %v3015_v8  ;;  %v559_v19 = vshll.u32 %v3269_v14, 16  ;;  %s464_s11 = sadd.s32 %s463_s20, %s3266_s10  ;;  %v3321_v43 = vcombine.low %v3258_v12, %v3261_v13  ;;  %v3324_v44 = vld [vmem:[%s3249_s8 + $0xc] sm:$0xf]  ;;  %v3334_v48 = vld [vmem:[%s3249_s8 + $0x10] sm:$0xf] }
  0x21   : > { %2763 = vmatpush3.bf16.msra.mxu1 %v3016_v9  ;;  %2740 = vmatprep.subr.bf16.mxu0 %v3017_v10  ;;  %v542_v22 = vrot.slane %v540_v15, 4  ;;  %v545_v23 = vrot.slane %v543_v16, 5  ;;  %v551_v24 = vrot.slane %v549_v17, 5  ;;  %v555_v25 = vrot.slane %v553_v18, 4  ;;  %s465_s14 = sand.u32 4294901760, %s464_s11  ;;  %v3029_v18 = vld [vmem:[%s3878_s3 + $0xe8] sm:$0xff]  }
  0x22   : > { %2764 = vmatprep.subr.bf16.mxu1 %v3018_v11  ;;  %v561_v29 = vrot.slane %v559_v19, 5  ;;  %s3926_s14 = smov (%p460_p10, %s465_s14), 2143289344  ;;  %v3337_v49 = vld [vmem:[%s3249_s8 + $0x14] sm:$0x1]  ;;  %v564_v50 = vshrl.u32 %v3324_v44, 16  ;;  %v567_v51 = vshll.u32 %v3324_v44, 16  ;;  %v3363_v16 = vcombine.low %v3324_v44, %v3334_v48 }
  0x23   : > { %v546_v27 = vor.u32 %v545_v23, %v542_v22  ;;  %v556_v28 = vor.u32 %v555_v25, %v551_v24  ;;  %s468_s12 = sshrl.u32 %s3926_s14, 16  ;;  %v573_v52 = vshll.u32 %v3334_v48, 16  ;;  %v577_v53 = vshrl.u32 %v3334_v48, 16  ;;  %v3349_v59 = vld [vmem:[%s3249_s8 + $0x18] sm:$0xf] }
  0x24   : > { %2741 = vmatpush3.bf16.msra.mxu0 %v3017_v10  ;;  %s469_s10 = sshll.u32 %s468_s12, 16  ;;  %v583_v54 = vshll.u32 %v3337_v49, 16  ;;  %v566_v63 = vrot.slane %v564_v50, 4  ;;  %v569_v0 = vrot.slane %v567_v51, 5  ;;  %v3358_v1 = vld [vmem:[%s3249_s8 + $0x1c] sm:$0xf] }
  0x25   : > { %2765 = vmatpush3.bf16.msra.mxu1 %v3018_v11  ;;  %2742 = vmatprep.subr.bf16.mxu0 %v3019_v20  ;;  %v547_v32 = vrot.slane %v546_v27, 4  ;;  %v557_v33 = vrot.slane %v556_v28, 4  ;;  %s470_s7 = sor.u32 %s469_s10, %s468_s12  ;;  %v575_v8 = vrot.slane %v573_v52, 5  ;;  %v579_v9 = vrot.slane %v577_v53, 4  ;;  %v3366_v17 = vld [vmem:[%s3249_s8 + $0x20] sm:$0x1] }
  0x26   : > { %2766 = vmatprep.subr.bf16.mxu1 %v3020_v21  ;;  %v471_v41 = vstv %s470_s7  ;;  %v570_v7 = vor.u32 %v569_v0, %v566_v63  ;;  %v585_v15 = vrot.slane %v583_v54, 5  ;;  %v591_v22 = vshll.u32 %v3349_v59, 16  ;;  %v3031_v50 = vld [vmem:[%s3878_s3 + $0xe0] sm:$0xff]   ;;  %v3033_v63 = vld [vmem:[%s3878_s3 + $0xd8] sm:$0xff]   ;;  %s2621_s12 = sadd.s32 4, %s3195_s30 }
  0x27   : > { %v552_v37 = vsel %vm3298_vm2, %v547_v32, %v551_v24  ;;  %v562_v38 = vsel %vm3298_vm2, %v557_v33, %v561_v29  ;;  %v3326_v45 = vmul.bf16 %v471_v41, %v450_v34  ;;  %v3328_v46 = vmul.bf16 %v471_v41, %v451_v35  ;;  %p3462_p11 = scmp.lt.s32.totalorder %s2621_s12, 15 }
  0x28   : > { %2743 = vmatpush3.bf16.msra.mxu0 %v3019_v20  ;;  %v3317_v42 = vcombine.low %v552_v37, %v562_v38  ;;  %v3330_v47 = vmul.bf16 %v471_v41, %v452_v36  ;;  %v571_v19 = vrot.slane %v570_v7, 4  ;;  %v580_v20 = vor.u32 %v579_v9, %v575_v8  ;;  %v3026_v37 = vld [vmem:[%s3878_s3 + $0xb0] sm:$0xff]   ;;  %s477_s14 = scalar_select %p476_p12, 1, 0 }
  0x29   : > { %2767 = vmatpush3.bf16.msra.mxu1 %v3020_v21  ;;  %2744 = vmatprep.subr.bf16.mxu0 %v3021_v26  ;;  %v516_v55 = vshrl.u32 %v3326_v45, 16  ;;  %v519_v56 = vshll.u32 %v3326_v45, 16  ;;  %v525_v57 = vshll.u32 %v3328_v46, 16  ;;  %v529_v58 = vshrl.u32 %v3328_v46, 16  ;;  %v3036_v7 = vld [vmem:[%s3878_s3 + $0x90] sm:$0xff]   ;;  %s3928_s12 = smov (!%p3462_p11, %s2621_s12), 15 }
  0x2a   : > { %2768 = vmatprep.subr.bf16.mxu1 %v3022_v30  ;;  %v535_v60 = vshll.u32 %v3330_v47, 16  ;;  %v2403_v61 = vcombine.low %v3326_v45, %v3328_v46  ;;  %v588_v21 = vshrl.u32 %v3349_v59, 16  ;;  %v597_v25 = vshll.u32 %v3358_v1, 16  ;;  %s3930_s12 = smov (!%p3462_p11, %s3928_s12), 15  ;;  %s478_s17 = scvt.s32.f32 %s477_s14 }
  0x2b   : > { %v518_v2 = vrot.slane %v516_v55, 4  ;;  %v521_v3 = vrot.slane %v519_v56, 5  ;;  %v527_v4 = vrot.slane %v525_v57, 5  ;;  %v531_v5 = vrot.slane %v529_v58, 4  ;;  %s2965_s11 = smul.u32 3, %s3930_s12  ;;  %s3908_s12 = sshll.u32 %s3231_s13, 2 }
  0x2c   : > { %2745 = vmatpush3.bf16.msra.mxu0 %v3021_v26  ;;  %v537_v6 = vrot.slane %v535_v60, 5  ;;  %2770 = vmatprep.mubr.bf16.mxu1 %v2403_v61  ;;  %v601_v26 = vshrl.u32 %v3358_v1, 16  ;;  %v576_v27 = vsel %vm3298_vm2, %v571_v19, %v575_v8  ;;  %v581_v28 = vrot.slane %v580_v20, 4  ;;  %v3041_v8 = vld [vmem:[%s3878_s3 + $0xc0] sm:$0xff]   ;;  %s481_s29 = sshrl.u32 %s478_s17, 16  ;;  %p480_p13 = scmp.ne.f32.partialorder %s478_s17, %s478_s17 }
  0x2d   : > { %2769 = vmatpush3.bf16.msra.mxu1 %v3022_v30  ;;  %2778 = vmatprep.subr.bf16.mxu0 %v3312_v39  ;;  %v522_v10 = vor.u32 %v521_v3, %v518_v2  ;;  %v532_v11 = vor.u32 %v531_v5, %v527_v4  ;;  %v590_v29 = vrot.slane %v588_v21, 4  ;;  %v593_v30 = vrot.slane %v591_v22, 5  ;;  %v3030_v3 = vld [vmem:[%s3878_s3 + $0xa0] sm:$0xff]   ;;  %v3032_v5 = vld [vmem:[%s3878_s3 + $0x98] sm:$0xff]   ;;  %s413_s19 = sadd.s32 %s2965_s11, %s3214_s18  ;;  %s482_s7 = sand.u32 1, %s481_s29 }
  0x2e   : > { %2802 = vmatprep.subr.bf16.mxu1 %v3025_v40  ;;  %v599_v34 = vrot.slane %v597_v25, 5  ;;  %v603_v35 = vrot.slane %v601_v26, 4  ;;  %v586_v38 = vsel %vm3298_vm2, %v581_v28, %v585_v15  ;;  %v607_v41 = vshll.u32 %v3366_v17, 16  ;;  %v3484_v26 = vld [vmem:[%s3249_s8 + $0x28] sm:$0xf]  ;;  %s483_s15 = sadd.s32 32767, %s482_s7  ;;  %s3807_s10 = scalar_lea.vmem %s3879_s4, %s3908_s12 }
  0x2f   : > { %v523_v23 = vrot.slane %v522_v10, 4  ;;  %v533_v24 = vrot.slane %v532_v11, 4  ;;  %v3391_v51 = vcombine.low %v576_v27, %v586_v38  ;;  %v3395_v53 = vcombine.low %v3349_v59, %v3358_v1  ;;  %v3038_v10 = vld [vmem:[%s3878_s3 + $0x88] sm:$0xff]   ;;  %v3043_v11 = vld [vmem:[%s3878_s3 + $0x178] sm:$0xff]   ;;  %s2372_s30 = sshll.u32 %s413_s19, 2  ;;  %s484_s20 = sadd.s32 %s483_s15, %s478_s17 }
  0x30   : > { %2771 = vmatmul.mubr.bf16.vlgmr.msra.gmra.mxu1 %v3321_v43  ;;  %v604_v52 = vor.u32 %v603_v35, %v599_v34  ;;  %v609_v55 = vrot.slane %v607_v41, 5  ;;  %v2415_v56 = vrot.slane %v3326_v45, 9  ;;  %v903_v57 = vrot.slane %v3328_v46, 5  ;;  %v3028_v45 = vld [vmem:[%s3878_s3 + $0xa8] sm:$0xff]   ;;  %v3044_v35 = vld [vmem:[%s3878_s3 + $0x130] sm:$0xff]   ;;  %v3052_v38 = vld [vmem:[%s3878_s3 + $0x158] sm:$0xff]   ;;  %s415_s7 = scalar_lea.vmem %s3877_s2, %s2372_s30 }
  0x31   : > { %2803 = vmatpush3.bf16.msra.mxu1 %v3025_v40  ;;  %2774 = vmatprep.mubr.bf16.mxu1 %v3363_v16  ;;  %v528_v32 = vsel %vm3298_vm2, %v523_v23, %v527_v4  ;;  %v538_v33 = vsel %vm3298_vm2, %v533_v24, %v537_v6  ;;  %v594_v40 = vor.u32 %v593_v30, %v590_v29  ;;  %v906_v61 = vrot.slane %v3330_v47, 5  ;;  %v3039_v6 = vld [vmem:[%s3878_s3 + $0xc8] sm:$0xff]   ;;  %v3042_v23 = vld [vmem:[%s3878_s3 + $0x138] sm:$0xff]   ;;  %v3477_v24 = vld [vmem:[%s3249_s8 + $0x24] sm:$0xf]  ;;  %s485_s11 = sand.u32 4294901760, %s484_s20 }
  0x32   : > { %2804 = vmatprep.subr.bf16.mxu1 %v3027_v62  ;;  %v2391_v36 = vcombine.low %v528_v32, %v538_v33  ;;  %v605_v58 = vrot.slane %v604_v52, 4  ;;  %v904_v0 = vsel %vm3403_vm5, %v2415_v56, %v903_v57  ;;  %v910_v9 = vrot.slane %v3261_v13, 5  ;;  %v3040_v13 = vld [vmem:[%s3878_s3 + $0x80] sm:$0xff]   ;;  %v3047_v27 = vld [vmem:[%s3878_s3 + $0x168] sm:$0xff]   ;;  %v3051_v52 = vld [vmem:[%s3878_s3 + $0x118] sm:$0xff]   ;;  %s3932_s11 = smov (%p480_p13, %s485_s11), 2143289344 }
  0x33   : > { %v595_v54 = vrot.slane %v594_v40, 4  ;;  %v917_v15 = vrot.slane %v3334_v48, 5  ;;  %v2416_v19 = vrot.slane %v3258_v12, 9  ;;  %v2417_v48 = vrot.slane %v3324_v44, 9  ;;  %v3049_v41 = vld [vmem:[%s3878_s3 + $0x120] sm:$0xff]   ;;  %s488_s19 = sshrl.u32 %s3932_s11, 16 }
  0x34   : > { %2746 = vmatprep.mubr.bf16.mxu0 %v2391_v36  ;;  %v610_v47 = vsel %vm3298_vm2, %v605_v58, %v609_v55  ;;  %v912_v20 = vrot.slane %v910_v9, 4  ;;  %v920_v12 = vrot.slane %v3337_v49, 5  ;;  %v924_v22 = vrot.slane %v3358_v1, 5  ;;  %v3058_v55 = vld [vmem:[%s3878_s3 + $0x140] sm:$0xff]   ;;  %s489_s16 = sshll.u32 %s488_s19, 16 }
  0x35   : > { %2805 = vmatpush3.bf16.msra.mxu1 %v3027_v62  ;;  %2747 = vmatmul.mubr.bf16.vlgmr.msra.gmra.mxu0 %v3317_v42  ;;  %v600_v46 = vsel %vm3298_vm2, %v595_v54, %v599_v34  ;;  %v905_v62 = vrot.slane %v903_v57, 4  ;;  %v919_v21 = vrot.slane %v917_v15, 4  ;;  %v911_v44 = vsel %vm3403_vm5, %v2416_v19, %v910_v9  ;;  %v3056_v54 = vld [vmem:[%s3878_s3 + $0x148] sm:$0xff]   ;;  %v453_v58 = vld [vmem:[%s415_s7] sm:$0xf]  ;;  %s490_s14 = sor.u32 %s489_s16, %s488_s19 }
  0x36   : > { %2806 = vmatprep.subr.bf16.mxu1 %v3029_v18  ;;  %2779 = vmatpush3.bf16.msra.mxu0 %v3312_v39  ;;  %v3421_v39 = vcombine.low %v600_v46, %v610_v47  ;;  %v918_v49 = vsel %vm3403_vm5, %v2417_v48, %v917_v15  ;;  %v2418_v29 = vrot.slane %v3349_v59, 9  ;;  %v3501_v30 = vcombine.low %v3477_v24, %v3484_v26  ;;  %v3050_v59 = vld [vmem:[%s3878_s3 + $0x160] sm:$0xff]   ;;  %v3055_v47 = vld [vmem:[%s3878_s3 + $0x108] sm:$0xff]  }
  0x37   : > { %2780 = vmatprep.subr.bf16.mxu0 %v3026_v37  ;;  %2750 = vmatprep.mubr.bf16.mxu0 %v3391_v51  ;;  %v907_v2 = vsel %vm3403_vm5, %v905_v62, %v906_v61  ;;  %v921_v1 = vsel %vm3403_vm5, %v919_v21, %v920_v12  ;;  %v926_v33 = vrot.slane %v924_v22, 4  ;;  %v927_v34 = vrot.slane %v3366_v17, 5  ;;  %v454_v46 = vld [vmem:[%s415_s7 + $0x4] sm:$0xf] }
  0x38   : > { %2775 = vmatmul.mubr.bf16.gmra.mxu1 %v3395_v53  ;;  %v2435_v4 = vcombine.low %v904_v0, %v907_v2  ;;  %v3503_v32 = vcombine.low %v918_v49, %v921_v1  ;;  %v925_v17 = vsel %vm3403_vm5, %v2418_v29, %v924_v22  ;;  %v1228_v56 = vshrl.u32 %v3477_v24, 16  ;;  %v3060_v0 = vld [vmem:[%s3878_s3 + $0x1f8] sm:$0xff]  }
  0x39   : > { %2807 = vmatpush3.bf16.msra.mxu1 %v3029_v18  ;;  %2818 = vmatprep.mubr.bf16.mxu1 %v3321_v43  ;;  %v3037_v43 = vld [vmem:[%s3878_s3 + $0xd0] sm:$0xff]   ;;  %v913_v18 = vrot.slane %v3269_v14, 5  ;;  %v928_v36 = vsel %vm3403_vm5, %v926_v33, %v927_v34  ;;  %v1231_v57 = vshll.u32 %v3477_v24, 16  ;;  %v1241_v61 = vshrl.u32 %v3484_v26, 16 }
  0x3a   : > { %2808 = vmatprep.subr.bf16.mxu1 %v3031_v50  ;;  %2781 = vmatpush3.bf16.msra.mxu0 %v3026_v37  ;;  %v3045_v14 = vld [vmem:[%s3878_s3 + $0x170] sm:$0xff]   ;;  %v3046_v37 = vld [vmem:[%s3878_s3 + $0x128] sm:$0xff]   ;;  %v3529_v40 = vcombine.low %v925_v17, %v928_v36  ;;  %v491_v62 = vstv %s490_s14  ;;  %v2497_v19 = vrot.slane %v3477_v24, 9  ;;  %v3068_v36 = vld [vmem:[%s3878_s3 + $0x1d8] sm:$0xff]  }
  0x3b   : > { %2782 = vmatprep.subr.bf16.mxu0 %v3028_v45  ;;  %v914_v25 = vsel %vm3403_vm5, %v912_v20, %v913_v18  ;;  %v3565_v2 = vmul.bf16 %v491_v62, %v453_v58  ;;  %v3061_v33 = vld [vmem:[%s3878_s3 + $0x1b0] sm:$0xff]   ;;  %v3063_v17 = vld [vmem:[%s3878_s3 + $0x1a8] sm:$0xff]  }
  0x3c   : > { %v2436_v28 = vcombine.low %v911_v44, %v914_v25  ;;  %v3059_v44 = vld [vmem:[%s3878_s3 + $0x1b8] sm:$0xff]   ;;  %v3064_v25 = vld [vmem:[%s3878_s3 + $0x1e8] sm:$0xff]  }
  0x3d   : > { %2809 = vmatpush3.bf16.msra.mxu1 %v3031_v50  ;;  %2751 = vmatmul.mubr.bf16.gmra.mxu0 %v3421_v39  ;;  %v3054_v50 = vld [vmem:[%s3878_s3 + $0x150] sm:$0xff]   ;;  %v2573_v9 = vrot.slane %v3565_v2, 9 }
  0x3e   : > { %2810 = vmatprep.subr.bf16.mxu1 %v3033_v63  ;;  %2783 = vmatpush3.bf16.msra.mxu0 %v3028_v45  ;;  %v1237_v45 = vshll.u32 %v3484_v26, 16 }
  0x3f   : > { %2784 = vmatprep.subr.bf16.mxu0 %v3030_v3  ;;  %2794 = vmatprep.mubr.bf16.mxu0 %v2435_v4  ;;  %v3568_v4 = vmul.bf16 %v491_v62, %v454_v46  ;;  %v3071_v46 = vld [vmem:[%s3878_s3 + $0x188] sm:$0xff]  }
  0x41   : > { %2811 = vmatpush3.bf16.msra.mxu1 %v3033_v63  ;;  %v455_v63 = vld [vmem:[%s415_s7 + $0x8] sm:$0x1]  ;;  %v1856_v18 = vrot.slane %v3568_v4, 5 }
  0x42   : > { %2812 = vmatprep.subr.bf16.mxu1 %v3037_v43  ;;  %2785 = vmatpush3.bf16.msra.mxu0 %v3030_v3  ;;  %v1230_v3 = vrot.slane %v1228_v56, 4  ;;  %v3074_v56 = vld [vmem:[%s3878_s3 + $0x1c0] sm:$0xff]  }
  0x43   : > { %2786 = vmatprep.subr.bf16.mxu0 %v3032_v5  ;;  %v3585_v48 = vsel %vm3403_vm5, %v2573_v9, %v1856_v18  ;;  %v1858_v21 = vrot.slane %v1856_v18, 4 }
  0x45   : > { %2813 = vmatpush3.bf16.msra.mxu1 %v3037_v43  ;;  %v1396_v43 = vrot.slane %v3484_v26, 5 }
  0x46   : > { %2814 = vmatprep.subr.bf16.mxu1 %v3039_v6  ;;  %2787 = vmatpush3.bf16.msra.mxu0 %v3032_v5  ;;  %v3570_v5 = vmul.bf16 %v491_v62, %v455_v63  ;;  %v3075_v62 = vld [vmem:[%s3878_s3 + $0x238] sm:$0xff]  }
  0x47   : > { %2788 = vmatprep.subr.bf16.mxu0 %v3036_v7  ;;  %v1398_v20 = vrot.slane %v1396_v43, 4  ;;  %v1397_v49 = vsel %vm3403_vm5, %v2497_v19, %v1396_v43  ;;  %v3076_v43 = vld [vmem:[%s3878_s3 + $0x230] sm:$0xff]  }
  0x48   : > { %v1859_v15 = vrot.slane %v3570_v5, 5 }
  0x49   : > { %2815 = vmatpush3.bf16.msra.mxu1 %v3039_v6  ;;  %v1233_v6 = vrot.slane %v1231_v57, 5 }
  0x4a   : > { %2816 = vmatprep.subr.bf16.mxu1 %v3041_v8  ;;  %2789 = vmatpush3.bf16.msra.mxu0 %v3036_v7  ;;  %v1239_v7 = vrot.slane %v1237_v45, 5  ;;  %v3593_v24 = vsel %vm3403_vm5, %v1858_v21, %v1859_v15  ;;  %v2539_v15 = vcombine.low %v3565_v2, %v3568_v4 }
  0x4b   : > { %2790 = vmatprep.subr.bf16.mxu0 %v3038_v10  ;;  %v1234_v12 = vor.u32 %v1233_v6, %v1230_v3  ;;  %v2590_v26 = vcombine.low %v3585_v48, %v3593_v24  ;;  %v3073_v3 = vld [vmem:[%s3878_s3 + $0x180] sm:$0xff]  }
  0x4d   : > { %2817 = vmatpush3.bf16.msra.mxu1 %v3041_v8  ;;  %v1243_v8 = vrot.slane %v1241_v61, 4 }
  0x4e   : > { %2850 = vmatprep.subr.bf16.mxu1 %v3043_v11  ;;  %2791 = vmatpush3.bf16.msra.mxu0 %v3038_v10  ;;  %v3057_v10 = vld [vmem:[%s3878_s3 + $0x100] sm:$0xff]  }
  0x4f   : > { %2792 = vmatprep.subr.bf16.mxu0 %v3040_v13  ;;  %v1244_v22 = vor.u32 %v1243_v8, %v1239_v7 }
  0x50   : > { %2819 = vmatmul.mubr.bf16.vlgmr.msra.gmra.mxu1 %v3363_v16 }
  0x51   : > { %2851 = vmatpush3.bf16.msra.mxu1 %v3043_v11  ;;  %2822 = vmatprep.mubr.bf16.mxu1 %v3395_v53  ;;  %v449_v11 = vld [vmem:[%s3249_s8 + $0x2c] sm:$0x1] }
  0x52   : > { %2852 = vmatprep.subr.bf16.mxu1 %v3045_v14  ;;  %2793 = vmatpush3.bf16.msra.mxu0 %v3040_v13  ;;  %v3062_v13 = vld [vmem:[%s3878_s3 + $0x1f0] sm:$0xff]  }
  0x53   : > { %2826 = vmatprep.subr.bf16.mxu0 %v3042_v23 }
  0x55   : > { %2853 = vmatpush3.bf16.msra.mxu1 %v3045_v14  ;;  %2795 = vmatmul.mubr.bf16.vlgmr.msra.gmra.mxu0 %v2436_v28  ;;  %v1399_v14 = vrot.slane %v449_v11, 5 }
  0x56   : > { %2854 = vmatprep.subr.bf16.mxu1 %v3047_v27  ;;  %2827 = vmatpush3.bf16.msra.mxu0 %v3042_v23  ;;  %v1247_v23 = vshll.u32 %v449_v11, 16 }
  0x57   : > { %2798 = vmatprep.mubr.bf16.mxu0 %v3503_v32  ;;  %2828 = vmatprep.subr.bf16.mxu0 %v3044_v35  ;;  %v1400_v1 = vsel %vm3403_vm5, %v1398_v20, %v1399_v14 }
  0x58   : > { %2823 = vmatmul.mubr.bf16.gmra.mxu1 %v3501_v30  ;;  %v1249_v29 = vrot.slane %v1247_v23, 5  ;;  %v3608_v34 = vcombine.low %v1397_v49, %v1400_v1 }
  0x59   : > { %2855 = vmatpush3.bf16.msra.mxu1 %v3047_v27  ;;  %2866 = vmatprep.mubr.bf16.mxu1 %v2436_v28  ;;  %v1235_v27 = vrot.slane %v1234_v12, 4  ;;  %v1245_v28 = vrot.slane %v1244_v22, 4 }
  0x5a   : > { %2856 = vmatprep.subr.bf16.mxu1 %v3050_v59  ;;  %2829 = vmatpush3.bf16.msra.mxu0 %v3044_v35  ;;  %v3066_v35 = vld [vmem:[%s3878_s3 + $0x1e0] sm:$0xff]  }
  0x5b   : > { %2830 = vmatprep.subr.bf16.mxu0 %v3046_v37  ;;  %v1240_v60 = vsel %vm3298_vm2, %v1235_v27, %v1239_v7 }
  0x5d   : > { %2857 = vmatpush3.bf16.msra.mxu1 %v3050_v59  ;;  %2799 = vmatmul.mubr.bf16.gmra.mxu0 %v3529_v40  ;;  %v1250_v59 = vsel %vm3298_vm2, %v1245_v28, %v1249_v29 }
  0x5e   : > { %2858 = vmatprep.subr.bf16.mxu1 %v3052_v38  ;;  %2831 = vmatpush3.bf16.msra.mxu0 %v3046_v37  ;;  %v2488_v37 = vcombine.low %v1240_v60, %v1250_v59 }
  0x5f   : > { %2842 = vmatprep.mubr.bf16.mxu0 %v3317_v42  ;;  %2832 = vmatprep.subr.bf16.mxu0 %v3049_v41  ;;  %v3053_v42 = vld [vmem:[%s3878_s3 + $0x110] sm:$0xff]  }
  0x61   : > { %2859 = vmatpush3.bf16.msra.mxu1 %v3052_v38  ;;  %v3065_v38 = vld [vmem:[%s3878_s3 + $0x1a0] sm:$0xff]  }
  0x62   : > { %2860 = vmatprep.subr.bf16.mxu1 %v3054_v50  ;;  %2833 = vmatpush3.bf16.msra.mxu0 %v3049_v41  ;;  %v3070_v41 = vld [vmem:[%s3878_s3 + $0x1d0] sm:$0xff]  }
  0x63   : > { %2834 = vmatprep.subr.bf16.mxu0 %v3051_v52 }
  0x65   : > { %2861 = vmatpush3.bf16.msra.mxu1 %v3054_v50  ;;  %v3072_v50 = vld [vmem:[%s3878_s3 + $0x1c8] sm:$0xff]  }
  0x66   : > { %2862 = vmatprep.subr.bf16.mxu1 %v3056_v54  ;;  %2835 = vmatpush3.bf16.msra.mxu0 %v3051_v52  ;;  %v1688_v52 = vshrl.u32 %v3565_v2, 16 }
  0x67   : > { %2836 = vmatprep.subr.bf16.mxu0 %v3053_v42 }
  0x68   : > { %v1690_v57 = vrot.slane %v1688_v52, 4 }
  0x69   : > { %2863 = vmatpush3.bf16.msra.mxu1 %v3056_v54  ;;  %v1691_v54 = vshll.u32 %v3565_v2, 16  ;;  %v3082_v2 = vld [vmem:[%s3878_s3 + $0x200] sm:$0xff]  }
  0x6a   : > { %2864 = vmatprep.subr.bf16.mxu1 %v3058_v55  ;;  %2837 = vmatpush3.bf16.msra.mxu0 %v3053_v42  ;;  %v1697_v42 = vshll.u32 %v3568_v4, 16 }
  0x6b   : > { %2838 = vmatprep.subr.bf16.mxu0 %v3055_v47  ;;  %v1693_v58 = vrot.slane %v1691_v54, 5 }
  0x6c   : > { %v1699_v61 = vrot.slane %v1697_v42, 5 }
  0x6d   : > { %2865 = vmatpush3.bf16.msra.mxu1 %v3058_v55  ;;  %v1701_v55 = vshrl.u32 %v3568_v4, 16  ;;  %v1694_v63 = vor.u32 %v1693_v58, %v1690_v57 }
  0x6e   : > { %2898 = vmatprep.subr.bf16.mxu1 %v3060_v0  ;;  %2839 = vmatpush3.bf16.msra.mxu0 %v3055_v47 }
  0x6f   : > { %2840 = vmatprep.subr.bf16.mxu0 %v3057_v10  ;;  %v1703_v45 = vrot.slane %v1701_v55, 4  ;;  %v1695_v6 = vrot.slane %v1694_v63, 4 }
  0x70   : > { %2867 = vmatmul.mubr.bf16.vlgmr.msra.gmra.mxu1 %v3503_v32 }
  0x71   : > { %2899 = vmatpush3.bf16.msra.mxu1 %v3060_v0  ;;  %2870 = vmatprep.mubr.bf16.mxu1 %v3529_v40  ;;  %v1704_v47 = vor.u32 %v1703_v45, %v1699_v61  ;;  %v1707_v0 = vshll.u32 %v3570_v5, 16  ;;  %v3077_v5 = vld [vmem:[%s3878_s3 + $0x228] sm:$0xff]   ;;  %v1700_v9 = vsel %vm3298_vm2, %v1695_v6, %v1699_v61 }
  0x72   : > { %2900 = vmatprep.subr.bf16.mxu1 %v3062_v13  ;;  %2841 = vmatpush3.bf16.msra.mxu0 %v3057_v10 }
  0x73   : > { %2874 = vmatprep.subr.bf16.mxu0 %v3059_v44  ;;  %v1705_v7 = vrot.slane %v1704_v47, 4  ;;  %v1709_v8 = vrot.slane %v1707_v0, 5 }
  0x75   : > { %2901 = vmatpush3.bf16.msra.mxu1 %v3062_v13  ;;  %2843 = vmatmul.mubr.bf16.vlgmr.msra.gmra.mxu0 %v3391_v51  ;;  %v1710_v10 = vsel %vm3298_vm2, %v1705_v7, %v1709_v8 }
  0x76   : > { %2902 = vmatprep.subr.bf16.mxu1 %v3064_v25  ;;  %2875 = vmatpush3.bf16.msra.mxu0 %v3059_v44  ;;  %v2564_v11 = vcombine.low %v1700_v9, %v1710_v10 }
  0x77   : > { %2846 = vmatprep.mubr.bf16.mxu0 %v3421_v39  ;;  %2876 = vmatprep.subr.bf16.mxu0 %v3061_v33 }
  0x78   : > { %2871 = vmatmul.mubr.bf16.gmra.mxu1 %v3608_v34 }
  0x79   : > { %2903 = vmatpush3.bf16.msra.mxu1 %v3064_v25  ;;  %2914 = vmatprep.mubr.bf16.mxu1 %v3391_v51  ;;  %v3067_v51 = vld [vmem:[%s3878_s3 + $0x198] sm:$0xff]  }
  0x7a   : > { %2904 = vmatprep.subr.bf16.mxu1 %v3066_v35  ;;  %2877 = vmatpush3.bf16.msra.mxu0 %v3061_v33 }
  0x7b   : > { %2878 = vmatprep.subr.bf16.mxu0 %v3063_v17 }
  0x7d   : > { %2905 = vmatpush3.bf16.msra.mxu1 %v3066_v35  ;;  %2847 = vmatmul.mubr.bf16.gmra.mxu0 %v2488_v37 }
  0x7e   : > { %2906 = vmatprep.subr.bf16.mxu1 %v3068_v36  ;;  %2879 = vmatpush3.bf16.msra.mxu0 %v3063_v17 }
  0x7f   : > { %2890 = vmatprep.mubr.bf16.mxu0 %v3363_v16  ;;  %2880 = vmatprep.subr.bf16.mxu0 %v3065_v38  ;;  %v3069_v16 = vld [vmem:[%s3878_s3 + $0x190] sm:$0xff]  }
  0x81   : > { %2907 = vmatpush3.bf16.msra.mxu1 %v3068_v36 }
  0x82   : > { %2908 = vmatprep.subr.bf16.mxu1 %v3070_v41  ;;  %2881 = vmatpush3.bf16.msra.mxu0 %v3065_v38 }
  0x83   : > { %2882 = vmatprep.subr.bf16.mxu0 %v3067_v51 }
  0x85   : > { %2909 = vmatpush3.bf16.msra.mxu1 %v3070_v41 }
  0x86   : > { %2910 = vmatprep.subr.bf16.mxu1 %v3072_v50  ;;  %2883 = vmatpush3.bf16.msra.mxu0 %v3067_v51 }
  0x87   : > { %2884 = vmatprep.subr.bf16.mxu0 %v3069_v16 }
  0x89   : > { %2911 = vmatpush3.bf16.msra.mxu1 %v3072_v50 }
  0x8a   : > { %2912 = vmatprep.subr.bf16.mxu1 %v3074_v56  ;;  %2885 = vmatpush3.bf16.msra.mxu0 %v3069_v16 }
  0x8b   : > { %2886 = vmatprep.subr.bf16.mxu0 %v3071_v46 }
  0x8d   : > { %2913 = vmatpush3.bf16.msra.mxu1 %v3074_v56 }
  0x8e   : > { %2946 = vmatprep.subr.bf16.mxu1 %v3075_v62  ;;  %2887 = vmatpush3.bf16.msra.mxu0 %v3071_v46 }
  0x8f   : > { %2888 = vmatprep.subr.bf16.mxu0 %v3073_v3 }
  0x90   : > { %2915 = vmatmul.mubr.bf16.vlgmr.msra.gmra.mxu1 %v3421_v39  ;;  %v3078_v39 = vld [vmem:[%s3878_s3 + $0x220] sm:$0xff]  }
  0x91   : > { %2954 = vmatpush3.bf16.msra.mxu1 %v3075_v62  ;;  %2918 = vmatprep.mubr.bf16.mxu1 %v2488_v37 }
  0x92   : > { %2947 = vmatprep.subr.bf16.mxu1 %v3076_v43  ;;  %2889 = vmatpush3.bf16.msra.mxu0 %v3073_v3 }
  0x93   : > { %2922 = vmatprep.subr.bf16.mxu0 %v3075_v62 }
  0x95   : > { %2955 = vmatpush3.bf16.msra.mxu1 %v3076_v43  ;;  %2891 = vmatmul.mubr.bf16.vlgmr.msra.gmra.mxu0 %v3395_v53  ;;  %v3080_v53 = vld [vmem:[%s3878_s3 + $0x210] sm:$0xff]  }
  0x96   : > { %2948 = vmatprep.subr.bf16.mxu1 %v3077_v5  ;;  %2923 = vmatpush3.bf16.msra.mxu0 %v3075_v62 }
  0x97   : > { %2894 = vmatprep.mubr.bf16.mxu0 %v3501_v30  ;;  %2924 = vmatprep.subr.bf16.mxu0 %v3076_v43  ;;  %v3081_v30 = vld [vmem:[%s3878_s3 + $0x208] sm:$0xff]  }
  0x98   : > { %2919 = vmatmul.mubr.bf16.gmra.mxu1 %v2564_v11 }
  0x99   : > { %2956 = vmatpush3.bf16.msra.mxu1 %v3077_v5  ;;  %2942 = vmatprep.mubr.bf16.mxu1 %v3608_v34 }
  0x9a   : > { %2949 = vmatprep.subr.bf16.mxu1 %v3078_v39  ;;  %2925 = vmatpush3.bf16.msra.mxu0 %v3076_v43 }
  0x9b   : > { %2926 = vmatprep.subr.bf16.mxu0 %v3077_v5 }
  0x9d   : > { %2957 = vmatpush3.bf16.msra.mxu1 %v3078_v39  ;;  %2895 = vmatmul.mubr.bf16.gmra.mxu0 %v2539_v15 }
  0x9e   : > { %2950 = vmatprep.subr.bf16.mxu1 %v3079_v31  ;;  %2927 = vmatpush3.bf16.msra.mxu0 %v3077_v5 }
  0x9f   : > { %2938 = vmatprep.mubr.bf16.mxu0 %v3503_v32  ;;  %2928 = vmatprep.subr.bf16.mxu0 %v3078_v39 }
  0xa1   : > { %2958 = vmatpush3.bf16.msra.mxu1 %v3079_v31 }
  0xa2   : > { %2951 = vmatprep.subr.bf16.mxu1 %v3080_v53  ;;  %2929 = vmatpush3.bf16.msra.mxu0 %v3078_v39 }
  0xa3   : > { %2930 = vmatprep.subr.bf16.mxu0 %v3079_v31 }
  0xa5   : > { %2959 = vmatpush3.bf16.msra.mxu1 %v3080_v53 }
  0xa6   : > { %2952 = vmatprep.subr.bf16.mxu1 %v3081_v30  ;;  %2931 = vmatpush3.bf16.msra.mxu0 %v3079_v31 }
  0xa7   : > { %2932 = vmatprep.subr.bf16.mxu0 %v3080_v53 }
  0xa9   : > { %2960 = vmatpush3.bf16.msra.mxu1 %v3081_v30 }
  0xaa   : > { %2953 = vmatprep.subr.bf16.mxu1 %v3082_v2  ;;  %2933 = vmatpush3.bf16.msra.mxu0 %v3080_v53 }
  0xab   : > { %2934 = vmatprep.subr.bf16.mxu0 %v3081_v30 }
  0xad   : > { %2961 = vmatpush3.bf16.msra.mxu1 %v3082_v2 }
  0xae   : > { %2935 = vmatpush3.bf16.msra.mxu0 %v3081_v30 }
  0xaf   : > { %2936 = vmatprep.subr.bf16.mxu0 %v3082_v2 }
  0xb0   : > { %2943 = vmatmul.mubr.bf16.vlgmr.msra.gmra.mxu1 %v2590_v26 }
  0xb2   : > { %2937 = vmatpush3.bf16.msra.mxu0 %v3082_v2 }
  0xb5   : > { %2939 = vmatmul.mubr.bf16.vlgmr.msra.gmra.mxu0 %v3529_v40 }
  0xf0   : > { %v3698_v4 = vpop.f32.mrf.mxu1 }
  0xf2   : > { %v3702_v13 = vpop.f32.mrf.mxu1 }
  0xf4   : > { %v3706_v20 = vpop.f32.mrf.mxu1 }
  0xf5   : > { %v3696_v32 = vpop.f32.mrf.mxu0 }
  0xf6   : > { %v3710_v48 = vpop.f32.mrf.mxu1 }
  0xf7   : > { %v3700_v18 = vpop.f32.mrf.mxu0 }
  0xf8   : > { %v2776_v12 = vpop.f32.mrf.mxu1 }
  0xf9   : > { %v3704_v19 = vpop.f32.mrf.mxu0 }
  0xfa   : > { %v879_v40 = vpop.f32.mrf.mxu1 }
  0xfb   : > { %v3708_v14 = vpop.f32.mrf.mxu0 }
  0xfc   : > { %v2777_v44 = vpop.f32.mrf.mxu1 }
  0xfd   : > { %v2752_v21 = vpop.f32.mrf.mxu0 }
  0xfe   : > { %v882_v25 = vpop.f32.mrf.mxu1  ;;  %v888_v10 = vadd.f32 %v2776_v12, %v2752_v21 }
  0xff   : > { %v742_v22 = vpop.f32.mrf.mxu0 }
 0x100   : > { %v880_v15 = vadd.f32 %v879_v40, %v742_v22  ;;  %v864_v22 = vadd.f32 %v3702_v13, %v3700_v18  ;;  %v867_v40 = vadd.f32 %v3710_v48, %v3708_v14 }
 0x101   : > { %v2753_v23 = vpop.f32.mrf.mxu0 }
 0x102   : > { %v891_v11 = vadd.f32 %v2777_v44, %v2753_v23 }
 0x103   : > { %v745_v24 = vpop.f32.mrf.mxu0 }
 0x104   : > { %v883_v53 = vadd.f32 %v882_v25, %v745_v24 }
 0x110   : > { %v3712_v49 = vpop.f32.mrf.mxu1 }
 0x112   : > { %v3716_v27 = vpop.f32.mrf.mxu1 }
 0x114   : > { %v3718_v29 = vpop.f32.mrf.mxu1 }
 0x115   : > { %v2796_v26 = vpop.f32.mrf.mxu0 }
 0x116   : > { %v3722_v34 = vpop.f32.mrf.mxu1 }
 0x117   : > { %v3714_v1 = vpop.f32.mrf.mxu0 }
 0x118   : > { %v2824_v35 = vpop.f32.mrf.mxu1 }
 0x119   : > { %v2797_v28 = vpop.f32.mrf.mxu0 }
 0x11a   : > { %v1204_v59 = vpop.f32.mrf.mxu1 }
 0x11b   : > { %v3720_v33 = vpop.f32.mrf.mxu0 }
 0x11c   : > { %v2825_v36 = vpop.f32.mrf.mxu1 }
 0x11d   : > { %v2800_v60 = vpop.f32.mrf.mxu0 }
 0x11e   : > { %v1207_v38 = vpop.f32.mrf.mxu1  ;;  %v1081_v30 = vadd.f32 %v2800_v60, %v888_v10 }
 0x11f   : > { %v1060_v17 = vpop.f32.mrf.mxu0 }
 0x121   : > { %v2801_v37 = vpop.f32.mrf.mxu0 }
 0x122   : > { %v1082_v2 = vadd.f32 %v2801_v37, %v891_v11 }
 0x123   : > { %v1063_v41 = vpop.f32.mrf.mxu0 }
 0x130   : > { %v3724_v51 = vpop.f32.mrf.mxu1 }
 0x132   : > { %v3728_v52 = vpop.f32.mrf.mxu1 }
 0x134   : > { %v3732_v42 = vpop.f32.mrf.mxu1 }
 0x135   : > { %v3726_v50 = vpop.f32.mrf.mxu0 }
 0x136   : > { %v3734_v16 = vpop.f32.mrf.mxu1 }
 0x137   : > { %v3730_v54 = vpop.f32.mrf.mxu0  ;;  %3890 = vst [vmem:[#allocation2_spill] sm:$0xff] %v3734_v16  ;;  %v1225_v16 = vadd.f32 %v2824_v35, %v1081_v30 }
 0x138   : > { %v2872_v57 = vpop.f32.mrf.mxu1 }
 0x139   : > { %v2845_v55 = vpop.f32.mrf.mxu0 }
 0x13a   : > { %v1520_v61 = vpop.f32.mrf.mxu1 }
 0x13b   : > { %v3736_v56 = vpop.f32.mrf.mxu0 }
 0x13c   : > { %v2873_v46 = vpop.f32.mrf.mxu1 }
 0x13d   : > { %v2848_v58 = vpop.f32.mrf.mxu0 }
 0x13e   : > { %v1523_v63 = vpop.f32.mrf.mxu1  ;;  %v1391_v23 = vadd.f32 %v2848_v58, %v1225_v16 }
 0x13f   : > { %v1370_v45 = vpop.f32.mrf.mxu0 }
 0x141   : > { %v2849_v62 = vpop.f32.mrf.mxu0 }
 0x143   : > { %v1373_v0 = vpop.f32.mrf.mxu0 }
 0x150   : > { %v3738_v47 = vpop.f32.mrf.mxu1 }
 0x151   : > { %3891 = vst [vmem:[#allocation3_spill] sm:$0xff] %v3738_v47  ;;  %v1079_v47 = vadd.f32 %v1060_v17, %v880_v15 }
 0x152   : > { %v3742_v43 = vpop.f32.mrf.mxu1 }
 0x153   : > { %3893 = vst [vmem:[#allocation5_spill] sm:$0xff] %v3742_v43  ;;  %v1080_v43 = vadd.f32 %v1063_v41, %v883_v53  ;;  %v1223_v21 = vadd.f32 %v1204_v59, %v1079_v47 }
 0x154   : > { %v3748_v8 = vpop.f32.mrf.mxu1 }
 0x155   : > { %v3740_v3 = vpop.f32.mrf.mxu0  ;;  %3896 = vst [vmem:[#allocation8_spill] sm:$0xff] %v3748_v8  ;;  %v872_v8 = vadd.f32 %v3698_v4, %v3696_v32  ;;  %v1224_v12 = vadd.f32 %v1207_v38, %v1080_v43  ;;  %v1389_v17 = vadd.f32 %v1370_v45, %v1223_v21  ;;  %v1075_v32 = vadd.f32 %v3714_v1, %v864_v22 }
 0x156   : > { %3892 = vst [vmem:[#allocation4_spill] sm:$0xff] %v3740_v3  ;;  %v3752_v9 = vpop.f32.mrf.mxu1  ;;  %v1076_v4 = vadd.f32 %v3720_v33, %v867_v40 }
 0x157   : > { %v3744_v6 = vpop.f32.mrf.mxu0  ;;  %3897 = vst [vmem:[#allocation9_spill] sm:$0xff] %v3752_v9  ;;  %v875_v9 = vadd.f32 %v3706_v20, %v3704_v19  ;;  %v1077_v24 = vadd.f32 %v2796_v26, %v872_v8  ;;  %v1541_v19 = vadd.f32 %v2872_v57, %v1391_v23  ;;  %v1539_v38 = vadd.f32 %v1520_v61, %v1389_v17 }
 0x158   : > { %3894 = vst [vmem:[#allocation6_spill] sm:$0xff] %v3744_v6  ;;  %v2920_v31 = vpop.f32.mrf.mxu1  ;;  %v1220_v41 = vadd.f32 %v3722_v34, %v1076_v4  ;;  %v3902_v30 = vld [vmem:[#allocation3_spill] sm:$0xff] }
 0x159   : > { %v3746_v7 = vpop.f32.mrf.mxu0  ;;  %v1078_v25 = vadd.f32 %v2797_v28, %v875_v9  ;;  %v1221_v59 = vadd.f32 %v3712_v49, %v1077_v24  ;;  %v1219_v28 = vadd.f32 %v3716_v27, %v1075_v32 }
 0x15a   : > { %3895 = vst [vmem:[#allocation7_spill] sm:$0xff] %v3746_v7  ;;  %v1830_v6 = vpop.f32.mrf.mxu1  ;;  %v1226_v7 = vadd.f32 %v2825_v36, %v1082_v2  ;;  %v1390_v36 = vadd.f32 %v1373_v0, %v1224_v12 }
 0x15b   : > { %v3750_v5 = vpop.f32.mrf.mxu0  ;;  %v1222_v37 = vadd.f32 %v3718_v29, %v1078_v25  ;;  %v1387_v1 = vadd.f32 %v3726_v50, %v1221_v59  ;;  %v1385_v49 = vadd.f32 %v3730_v54, %v1219_v28  ;;  %v1386_v29 = vadd.f32 %v3736_v56, %v1220_v41  ;;  %v3898_v54 = vld [vmem:[#allocation2_spill] sm:$0xff]  ;;  %v3906_v25 = vld [vmem:[#allocation5_spill] sm:$0xff] }
 0x15c   : > { %v1392_v44 = vadd.f32 %v2849_v62, %v1226_v7  ;;  %v2921_v60 = vpop.f32.mrf.mxu1  ;;  %v1540_v14 = vadd.f32 %v1523_v63, %v1390_v36  ;;  %v3903_v21 = vld [vmem:[#allocation8_spill] sm:$0xff] }
 0x15d   : > { %v2896_v39 = vpop.f32.mrf.mxu0  ;;  %v1388_v16 = vadd.f32 %v2845_v55, %v1222_v37  ;;  %v1537_v62 = vadd.f32 %v3724_v51, %v1387_v1  ;;  %v1535_v0 = vadd.f32 %v3728_v52, %v1385_v49  ;;  %v3899_v56 = vld [vmem:[#allocation4_spill] sm:$0xff] }
 0x15e   : > { %v1542_v20 = vadd.f32 %v2873_v46, %v1392_v44  ;;  %v1833_v13 = vpop.f32.mrf.mxu1  ;;  %v1685_v48 = vadd.f32 %v2896_v39, %v1541_v19 }
 0x15f   : > { %v1664_v3 = vpop.f32.mrf.mxu0  ;;  %v1538_v63 = vadd.f32 %v3732_v42, %v1388_v16  ;;  %v1681_v43 = vadd.f32 %v3899_v56, %v1537_v62  ;;  %v3901_v11 = vld [vmem:[#allocation6_spill] sm:$0xff] }
 0x160   : > { %v1683_v57 = vadd.f32 %v1664_v3, %v1539_v38  ;;  %v1851_v46 = vadd.f32 %v2920_v31, %v1685_v48  ;;  %v1536_v3 = vadd.f32 %v3898_v54, %v1386_v29  ;;  %v1679_v39 = vadd.f32 %v3901_v11, %v1535_v0 }
 0x161   : > { %v2897_v35 = vpop.f32.mrf.mxu0  ;;  %v3900_v7 = vld [vmem:[#allocation7_spill] sm:$0xff]  ;;  %v1847_v2 = vadd.f32 %v3902_v30, %v1681_v43 }
 0x162   : > { %v1686_v26 = vadd.f32 %v2897_v35, %v1542_v20  ;;  %v1849_v34 = vadd.f32 %v1830_v6, %v1683_v57  ;;  %v1682_v8 = vadd.f32 %v3900_v7, %v1538_v63  ;;  %v1680_v52 = vadd.f32 %v3750_v5, %v1536_v3  ;;  %v3907_v35 = vld [vmem:[#allocation9_spill] sm:$0xff] }
 0x163   : > { %v1667_v18 = vpop.f32.mrf.mxu0  ;;  %v1845_v5 = vadd.f32 %v3906_v25, %v1679_v39 }
 0x164   : > { %v1684_v58 = vadd.f32 %v1667_v18, %v1540_v14  ;;  %v1852_v61 = vadd.f32 %v2921_v60, %v1686_v26  ;;  %v1848_v12 = vadd.f32 %v3903_v21, %v1682_v8  ;;  %v1846_v60 = vadd.f32 %v3907_v35, %v1680_v52 }
 0x166   : > { %v1850_v47 = vadd.f32 %v1833_v13, %v1684_v58 }
 0x170   : > { %v2944_v33 = vpop.f32.mrf.mxu1 }
 0x171   : > { %v3773_v50 = vadd.f32 %v2944_v33, %v1851_v46 }
 0x172   : > { %v1980_v45 = vpop.f32.mrf.mxu1 }
 0x173   : > { %v3781_v10 = vadd.f32 %v1980_v45, %v1849_v34 }
 0x174   : > { %v2945_v27 = vpop.f32.mrf.mxu1 }
 0x175   : > { %v3775_v55 = vadd.f32 %v2945_v27, %v1852_v61  ;;  %v2940_v51 = vpop.f32.mrf.mxu0 }
 0x176   : > { %v1983_v9 = vpop.f32.mrf.mxu1  ;;  %v1997_v17 = vadd.f32 %v2940_v51, %v1847_v2 }
 0x177   : > { %v2006_v42 = vpack.c.bf16 %v3775_v55, %v3773_v50  ;;  %v3785_v6 = vadd.f32 %v1983_v9, %v1850_v47  ;;  %v1964_v31 = vpop.f32.mrf.mxu0 }
 0x178   : > { %v1995_v38 = vadd.f32 %v1964_v31, %v1845_v5 }
 0x179   : > { %v2029_v15 = vshrl.u32 %v2006_v42, 16  ;;  %v2005_v53 = vpack.c.bf16 %v3785_v6, %v3781_v10  ;;  %v2941_v44 = vpop.f32.mrf.mxu0  ;;  %v2032_v40 = vshll.u32 %v2006_v42, 16 }
 0x17a   : > { %v3800_v36 = vadd.f32 %v2941_v44, %v1848_v12 }
 0x17b   : > { %v2031_v22 = vrot.slane %v2029_v15, 7  ;;  %v2022_v24 = vshrl.u32 %v2005_v53, 16  ;;  %v1967_v19 = vpop.f32.mrf.mxu0  ;;  %v2025_v59 = vshll.u32 %v2005_v53, 16 }
 0x17c   : > { %v2004_v37 = vpack.c.bf16 %v3800_v36, %v1997_v17  ;;  %v1996_v13 = vadd.f32 %v1967_v19, %v1846_v60 }
 0x17d   : > { %v2034_v32 = vor.u32 %v2032_v40, %v2031_v22  ;;  %v2053_v4 = vsel %vm3794_vm8, %v2031_v22, 0  ;;  %v2024_v20 = vrot.slane %v2022_v24, 7 }
 0x17e   : > { %v2610_v18 = vcombine.low %v2053_v4, %v2053_v4  ;;  %v2015_v28 = vshrl.u32 %v2004_v37, 16  ;;  %v2003_v16 = vpack.c.bf16 %v1996_v13, %v1995_v38  ;;  %v2018_v49 = vshll.u32 %v2004_v37, 16 }
 0x17f   : > { %v2049_v14 = vsel %vm3794_vm8, 0, %v2034_v32  ;;  %v2027_v48 = vor.u32 %v2025_v59, %v2024_v20  ;;  %v2052_v26 = vsel %vm3794_vm8, %v2024_v20, 0 }
 0x180   : > { %v2608_v41 = vcombine.low %v2049_v14, %v2049_v14  ;;  %v2609_v1 = vcombine.high %v2049_v14, %v2049_v14  ;;  %2109 = vst [vmem:[%s3807_s10 + $0x2c] sm:$0x1] %v2610_v18  ;;  %v2607_v57 = vcombine.low %v2052_v26, %v2052_v26  ;;  %v2017_v58 = vrot.slane %v2015_v28, 7 }
 0x181   : > { %v2048_v33 = vsel %vm3794_vm8, 0, %v2027_v48  ;;  %v2008_v46 = vshrl.u32 %v2003_v16, 16  ;;  %v2011_v34 = vshll.u32 %v2003_v16, 16 }
 0x182   : > { %2107 = vst [vmem:[%s3807_s10 + $0x24] sm:$0xf] %v2608_v41  ;;  %2108 = vst [vmem:[%s3807_s10 + $0x28] sm:$0xf] %v2609_v1  ;;  %v2605_v29 = vcombine.low %v2048_v33, %v2048_v33  ;;  %v2606_v45 = vcombine.high %v2048_v33, %v2048_v33  ;;  %v2020_v61 = vor.u32 %v2018_v49, %v2017_v58  ;;  %v2051_v62 = vsel %vm3794_vm8, %v2017_v58, 0 }
 0x183   : > { %2106 = vst [vmem:[%s3807_s10 + $0x20] sm:$0x1] %v2607_v57  ;;  %v2604_v63 = vcombine.low %v2051_v62, %v2051_v62  ;;  %v2010_v27 = vrot.slane %v2008_v46, 7 }
 0x184   : > { %2104 = vst [vmem:[%s3807_s10 + $0x18] sm:$0xf] %v2605_v29  ;;  %2105 = vst [vmem:[%s3807_s10 + $0x1c] sm:$0xf] %v2606_v45  ;;  %v2047_v47 = vsel %vm3794_vm8, 0, %v2020_v61 }
 0x185   : > { %v2602_v0 = vcombine.low %v2047_v47, %v2047_v47  ;;  %v2603_v54 = vcombine.high %v2047_v47, %v2047_v47  ;;  %2103 = vst [vmem:[%s3807_s10 + $0x14] sm:$0x1] %v2604_v63  ;;  %v2013_v3 = vor.u32 %v2011_v34, %v2010_v27  ;;  %v2050_v56 = vsel %vm3794_vm8, %v2010_v27, 0 }
 0x186   : > { %v2601_v43 = vcombine.low %v2050_v56, %v2050_v56  ;;  %2113 = sbr.rel (%p2611_p0) target bundleno = 397 (0x18d), region = 40 }
 0x187   : > { %2101 = vst [vmem:[%s3807_s10 + $0xc] sm:$0xf] %v2602_v0  ;;  %2102 = vst [vmem:[%s3807_s10 + $0x10] sm:$0xf] %v2603_v54  ;;  %v2046_v7 = vsel %vm3794_vm8, 0, %v2013_v3 }
 0x188   : > { %v2599_v8 = vcombine.low %v2046_v7, %v2046_v7  ;;  %v2600_v9 = vcombine.high %v2046_v7, %v2046_v7  ;;  %2100 = vst [vmem:[%s3807_s10 + $0x8] sm:$0x1] %v2601_v43 }
 0x18a   : > { %2098 = vst [vmem:[%s3807_s10] sm:$0xf] %v2599_v8  ;;  %2099 = vst [vmem:[%s3807_s10 + $0x4] sm:$0xf] %v2600_v9 }
 0x18b   : > { %v3123_v51 = vmov 0.0  }
 0x18c   : > { %2114 = vst [vmem:[%s3219_s28] sm:$0x1] %v3123_v51  ;;  %2115 = vst [vmem:[%s3224_s9] sm:$0x1] %v3123_v51 }
 0x18d PF: > { %v2117_v42 = vadd.f32 %v1996_v13, %v1995_v38  ;;  %v2133_v11 = vmul.f32 %v1995_v38, %v1995_v38  ;;  %v2134_v39 = vmul.f32 %v1996_v13, %v1996_v13  ;;  %v2135_v52 = vmul.f32 %v1997_v17, %v1997_v17 }
 0x18e   : > { %v2136_v15 = vmul.f32 %v3800_v36, %v3800_v36  ;;  %v2137_v2 = vmul.f32 %v3781_v10, %v3781_v10  ;;  %v2138_v23 = vmul.f32 %v3785_v6, %v3785_v6  ;;  %v2139_v40 = vmul.f32 %v3773_v50, %v3773_v50 }
 0x18f   : > { %v2118_v31 = vadd.f32 %v2117_v42, %v1997_v17  ;;  %v2141_v53 = vadd.f32 %v2134_v39, %v2133_v11  ;;  %v2140_v5 = vmul.f32 %v3775_v55, %v3775_v55 }
 0x191   : > { %v2119_v30 = vadd.f32 %v2118_v31, %v3800_v36  ;;  %v2142_v21 = vadd.f32 %v2141_v53, %v2135_v52 }
 0x193   : > { %v2120_v12 = vadd.f32 %v2119_v30, %v3781_v10  ;;  %v2143_v44 = vadd.f32 %v2142_v21, %v2136_v15  ;;  %v2116_v18 = vld [vmem:[%s3219_s28] sm:$0x1] }
 0x194   : > { %v2132_v14 = vld [vmem:[%s3224_s9] sm:$0x1] }
 0x195   : > { %v2121_v22 = vadd.f32 %v2120_v12, %v3785_v6  ;;  %v2144_v24 = vadd.f32 %v2143_v44, %v2137_v2 }
 0x197   : > { %v2122_v25 = vadd.f32 %v2121_v22, %v3773_v50  ;;  %v2145_v35 = vadd.f32 %v2144_v24, %v2138_v23 }
 0x199   : > { %v2123_v10 = vadd.f32 %v2122_v25, %v3775_v55  ;;  %v2146_v60 = vadd.f32 %v2145_v35, %v2139_v40 }
 0x19b   : > { %v2124_v17 = vrot.slane %v2123_v10, 4  ;;  %v2147_v36 = vadd.f32 %v2146_v60, %v2140_v5 }
 0x19d   : > { %v2125_v32 = vadd.f32 %v2124_v17, %v2123_v10  ;;  %v2148_v6 = vrot.slane %v2147_v36, 4 }
 0x19f   : > { %v2126_v4 = vrot.slane %v2125_v32, 2  ;;  %v2149_v19 = vadd.f32 %v2148_v6, %v2147_v36 }
 0x1a1   : > { %v2127_v20 = vadd.f32 %v2126_v4, %v2125_v32  ;;  %v2150_v59 = vrot.slane %v2149_v19, 2 }
 0x1a3   : > { %v2128_v37 = vrot.slane %v2127_v20, 1  ;;  %v2151_v50 = vadd.f32 %v2150_v59, %v2149_v19 }
 0x1a5   : > { %v2129_v13 = vadd.f32 %v2128_v37, %v2127_v20  ;;  %v2152_v38 = vrot.slane %v2151_v50, 1 }
 0x1a7   : > { %v2130_v48 = vadd.f32 %v2129_v13, %v2116_v18  ;;  %v2153_v26 = vadd.f32 %v2152_v38, %v2151_v50 }
 0x1a9   : > { %2131 = vst [vmem:[%s3219_s28] sm:$0x1] %v2130_v48  ;;  %v2154_v55 = vadd.f32 %v2153_v26, %v2132_v14 }
 0x1ab   : > { %2155 = vst [vmem:[%s3224_s9] sm:$0x1] %v2154_v55 }
 0x1ac PF: > { %s17_s25 = sadd.s32 1, %s3121_s25   ;;  %s3909_s21 = smov %s3113_s23 }
 0x1ad   : > { %p14_p1 = scmp.ge.s32.totalorder %s17_s25, 10   ;;  %s3910_s22 = smov %s3117_s24 }
 0x1ae   : > { %s3911_s23 = smov %s3914_s26  ;;  %s3912_s24 = smov %s3918_s27 }
 0x1af   :  { %16 = sbr.rel (!%p14_p1) target bundleno = 3 (0x3), region = 108 }

// kernel: residual_block_pallas.4
= control target key start
LH: loop header
LB: loop body
LE: loop exit
PB: predicated region body
PF: predicated region fallthrough
CT: control target
= control target key end

     0   :  { %s3662_s21 = smov 0   ;;  %s3664_s22 = smov 0   ;;  %s4320_s0 = inlined_call_operand.vmem [shape: bf16[2,16,18,128], index: 0, kind: input, shape index: {}, may-alias: {0,1,2}]   ;;  %s4321_s1 = inlined_call_operand.vmem [shape: bf16[2,16,18,128], index: 1, kind: input, shape index: {}, may-alias: {0,1,2}]   ;;  %s4322_s2 = inlined_call_operand.vmem [shape: bf16[2,16,18,128], index: 2, kind: input, shape index: {}, may-alias: {0,1,2}]   ;;  %s4323_s3 = inlined_call_operand.vmem [shape: f32[1,128], index: 3, kind: input, shape index: {}]   ;;  %s4324_s4 = inlined_call_operand.vmem [shape: f32[1,128], index: 4, kind: input, shape index: {}]   ;;  %s4325_s5 = inlined_call_operand.vmem [shape: bf16[9,128,128], index: 5, kind: input, shape index: {}]   ;;  %s4326_s6 = inlined_call_operand.vmem [shape: bf16[2,16,16,128], index: 6, kind: input, shape index: {}]   ;;  %s4327_s7 = inlined_call_operand.vmem [shape: bf16[128,128], index: 7, kind: input, shape index: {}]   ;;  %s4328_s8 = inlined_call_operand.vmem [shape: bf16[2,16,16,128], index: 8, kind: output, shape index: {0}]   ;;  %s4329_s9 = inlined_call_operand.vmem [shape: f32[2,1,128], index: 9, kind: output, shape index: {1}]   ;;  %s4330_s10 = inlined_call_operand.vmem [shape: f32[2,1,128], index: 10, kind: output, shape index: {2}]   ;;  %s4331_s11 = inlined_call_operand.vmem [shape: f32[2,1,128], index: 11, kind: output, shape index: {3}]   ;;  %s4332_s12 = inlined_call_operand.vmem [shape: f32[2,1,128], index: 12, kind: output, shape index: {4}]  }
   0x1   :  { %4336 = sst [smem:[#allocation12_spill]] %s4329_s9  ;;  %s3666_s23 = smov 0  }
   0x2   :  { %4337 = sst [smem:[#allocation13_spill]] %s4330_s10  ;;  %s3668_s24 = smov 0  }
   0x3   :  { %4338 = sst [smem:[#allocation14_spill]] %s4331_s11  ;;  %s3670_s25 = smov 0  }
   0x4 LB: > { %4339 = sst [smem:[#allocation2_spill]] %s3584_s23  ;;  %s32_s26 = sadd.s32 1, %s3584_s23  ;;  %s3592_s25 = sphi %s3670_s25, %s23_s25   ;;  %s3588_s24 = sphi %s3668_s24, %s4364_s24   ;;  %s3584_s23 = sphi %s3666_s23, %s4363_s23   ;;  %s3580_s22 = sphi %s3664_s22, %s4362_s22   ;;  %s3576_s21 = sphi %s3662_s21, %s4361_s21  }
   0x5   : > { %4340 = sst [smem:[#allocation3_spill]] %s3588_s24  ;;  %s35_s27 = sadd.s32 1, %s3588_s24 }
   0x6   : > { %4341 = sst [smem:[#allocation4_spill]] %s3592_s25  ;;  %p33_p0 = scmp.ge.s32.totalorder %s32_s26, 4 }
   0x7   : > { %p2727_p1 = scmp.ge.s32.totalorder %s3592_s25, 1  ;;  %p475_p2 = scmp.lt.s32.totalorder %s3592_s25, 9 }
   0x8   : > { %s4366_s26 = smov (%p33_p0, %s32_s26), 0  ;;  %s4368_s27 = smov (!%p33_p0, %s35_s27), %s3588_s24 }
   0x9   : > { %4342 = sst [smem:[#allocation5_spill]] %s4366_s26  ;;  %p476_p3 = pnand %p2727_p1, %p475_p2 }
   0xa   : > { %p37_p4 = scmp.ge.s32.totalorder %s4368_s27, 2 }
   0xb   : > { %479 = sbr.rel (%p476_p3) target bundleno = 670 (0x29e), region = 52 }
   0xc   : > { %s4370_s27 = smov (%p37_p4, %s4368_s27), 0 }
   0xd   : > { %4343 = sst [smem:[#allocation6_spill]] %s4370_s27 }
  0x10   : > { %v3470_v0 = vld [vmem:[%s4325_s5 + $0x78] sm:$0xff]   ;;  %s3698_s30 = sshll.u32 %s3576_s21, 2  ;;  %p576_p5 = scmp.lt.s32.totalorder %s3580_s22, 1  ;;  %v3472_v2 = vld [vmem:[%s4325_s5 + $0x70] sm:$0xff]   ;;  %v3474_v4 = vld [vmem:[%s4325_s5 + $0x68] sm:$0xff]   ;;  %v675_v9 = vlaneseq  ;;  %vm3594_vm3 = vmmov 1  }
  0x11   : > { %v3471_v1 = vld [vmem:[%s4325_s5 + $0x38] sm:$0xff]   ;;  %3183 = vmatprep.subr.bf16.mxu0 %v3470_v0  ;;  %p578_p6 = scmp.lt.s32.totalorder %s3698_s30, 15  ;;  %v3473_v3 = vld [vmem:[%s4325_s5 + $0x30] sm:$0xff]   ;;  %v3475_v5 = vld [vmem:[%s4325_s5 + $0x28] sm:$0xff]   ;;  %s4344_s9 = sld [smem:[#allocation12_spill]]  ;;  %vm1142_vm5 = vcmask 1046528  }
  0x12   : > { %3207 = vmatprep.subr.bf16.mxu1 %v3471_v1  ;;  %3184 = vmatpush3.bf16.msra.mxu0 %v3470_v0  ;;  %s4372_s22 = smov (!%p576_p5, %s3580_s22), 1  ;;  %s4345_s10 = sld [smem:[#allocation13_spill]]  ;;  %v3476_v6 = vld [vmem:[%s4325_s5 + $0x60] sm:$0xff]   ;;  %v3478_v8 = vld [vmem:[%s4325_s5 + $0x58] sm:$0xff]   ;;  %v3480_v11 = vld [vmem:[%s4325_s5 + $0x50] sm:$0xff]   ;;  %v3774_v13 = vshrl.u32 %v675_v9, 7 }
  0x13   : > { %3208 = vmatpush3.bf16.msra.mxu1 %v3471_v1  ;;  %3185 = vmatprep.subr.bf16.mxu0 %v3472_v2  ;;  %s3716_s28 = scalar_select %p578_p6, %s3698_s30, 15  ;;  %v3477_v7 = vld [vmem:[%s4325_s5 + $0x20] sm:$0xff]   ;;  %v3479_v10 = vld [vmem:[%s4325_s5 + $0x18] sm:$0xff]   ;;  %v3481_v12 = vld [vmem:[%s4325_s5 + $0x10] sm:$0xff]   ;;  %vm838_vm2 = vsmask.f32 7424 }
  0x14   : > { %3209 = vmatprep.subr.bf16.mxu1 %v3473_v3  ;;  %s3722_s14 = smul.u32 48, %s4372_s22  ;;  %s2731_s26 = sadd.s32 4294967295, %s3698_s30  ;;  %v3780_v14 = vld [vmem:[%s4323_s3] ss:$0 sm:$0xff]  ;;  %v3482_v17 = vld [vmem:[%s4325_s5 + $0x48] sm:$0xff]   ;;  %v3801_v25 = vadd.s32 16, %v3774_v13 }
  0x15   : > { %s3423_s18 = smul.u32 3, %s3716_s28  ;;  %s4346_s11 = sld [smem:[#allocation14_spill]]  ;;  %v3483_v21 = vld [vmem:[%s4325_s5 + $0x8] sm:$0xff]   ;;  %v3797_v22 = vld [vmem:[%s4324_s4] ss:$0 sm:$0xff]  ;;  %vm679_vm0 = vcmp.ge.s32.totalorder %v3774_v13, 1 }
  0x16   : > { %3186 = vmatpush3.bf16.msra.mxu0 %v3472_v2  ;;  %p588_p7 = scmp.gt.s32.totalorder %s2731_s26, 0  ;;  %s3755_s25 = scalar_lea.vmem %s4332_s12, %s4372_s22  ;;  %v3484_v35 = vld [vmem:[%s4325_s5 + $0x40] sm:$0xff]   ;;  %vm684_vm1 = vcmp.le.s32.totalorder %v3801_v25, 16  ;;  %v3841_v49 = vld [vmem:[%s4325_s5 + $0xb8] sm:$0xff]   ;;  %vm3878_vm4 = vmpackc.low %vm3594_vm3, %vm679_vm0 }
  0x17   : > { %s3728_s17 = scalar_lea.vmem %s4344_s9, %s4372_s22  ;;  %3210 = vmatpush3.bf16.msra.mxu1 %v3473_v3  ;;  %3187 = vmatprep.subr.bf16.mxu0 %v3474_v4  ;;  %s582_s16 = sadd.s32 %s3722_s14, %s3423_s18  ;;  %v3485_v42 = vld [vmem:[%s4325_s5] sm:$0xff]   ;;  %v3487_v54 = vld [vmem:[%s4325_s5 + $0xf8] sm:$0xff]  }
  0x18   : > { %s3735_s27 = scalar_lea.vmem %s4345_s10, %s4372_s22  ;;  %3211 = vmatprep.subr.bf16.mxu1 %v3475_v5  ;;  %s2729_s24 = sshll.u32 %s582_s16, 2 }
  0x19   : > { %p2732_p8 = scmp.lt.s32.totalorder %s2731_s26, 15  ;;  %s4374_s26 = smov (!%p588_p7, %s2731_s26), 0 }
  0x1a   : > { %3188 = vmatpush3.bf16.msra.mxu0 %v3474_v4  ;;  %s3766_s16 = scalar_lea.vmem %s4320_s0, %s2729_s24  ;;  %p796_p9 = scmp.gt.s32.totalorder %s3576_s21, 0 }
  0x1b   : > { %s3742_s13 = scalar_lea.vmem %s4346_s11, %s4372_s22  ;;  %3212 = vmatpush3.bf16.msra.mxu1 %v3475_v5  ;;  %3189 = vmatprep.subr.bf16.mxu0 %v3476_v6  ;;  %s4376_s26 = smov (!%p2732_p8, %s4374_s26), 15  ;;  %v3024_v15 = vld [vmem:[%s3766_s16] sm:$0xff]   ;;  %v657_v16 = vld [vmem:[%s3766_s16 + $0x8] sm:$0x1]  ;;  %v658_v60 = vld [vmem:[%s3766_s16 + $0xc] sm:$0xff]  }
  0x1c   : > { %3213 = vmatprep.subr.bf16.mxu1 %v3477_v7  ;;  %s3425_s19 = smul.u32 3, %s4376_s26  ;;  %v3025_v18 = vunpack.c.l.bf16 %v3024_v15  ;;  %v3026_v19 = vunpack.c.h.bf16 %v3024_v15  ;;  %v690_v20 = vunpack.c.l.bf16 %v657_v16  ;;  %s3014_s26 = sadd.s32 4, %s3698_s30  ;;  %v660_v61 = vld [vmem:[%s3766_s16 + $0x14] sm:$0x1]  ;;  %v691_v3 = vunpack.c.l.bf16 %v658_v60 }
  0x1d   : > { %p3822_p10 = scmp.lt.s32.totalorder %s3014_s26, 15  ;;  %v692_v4 = vunpack.c.h.bf16 %v658_v60  ;;  %v693_v5 = vunpack.c.l.bf16 %v660_v61  ;;  %v3489_v15 = vld [vmem:[%s4325_s5 + $0xf0] sm:$0xff]   ;;  %p803_p11 = scmp.lt.s32.totalorder %s3576_s21, 3 }
  0x1e   : > { %3190 = vmatpush3.bf16.msra.mxu0 %v3476_v6  ;;  %s596_s24 = sadd.s32 %s3425_s19, %s3722_s14  ;;  %v706_v26 = vmul.f32 %v3025_v18, %v3780_v14  ;;  %v707_v27 = vmul.f32 %v3026_v19, %v3780_v14  ;;  %v708_v28 = vmul.f32 %v3780_v14, %v690_v20  ;;  %v3059_v6 = vld [vmem:[%s3766_s16 + $0x18] sm:$0xff]   ;;  %v709_v16 = vmul.f32 %v3780_v14, %v691_v3  ;;  %s2744_s30 = sshll.u32 %s3716_s28, 1 }
  0x1f   : > { %3214 = vmatpush3.bf16.msra.mxu1 %v3477_v7  ;;  %3191 = vmatprep.subr.bf16.mxu0 %v3478_v8  ;;  %s2737_s11 = sshll.u32 %s596_s24, 2  ;;  %s4378_s26 = smov (!%p3822_p10, %s3014_s26), 15  ;;  %v663_v7 = vld [vmem:[%s3766_s16 + $0x20] sm:$0x1]  ;;  %v711_v18 = vmul.f32 %v3780_v14, %v693_v5  ;;  %v3029_v19 = vunpack.c.l.bf16 %v3059_v6 }
  0x20   : > { %3215 = vmatprep.subr.bf16.mxu1 %v3479_v10  ;;  %s598_s18 = scalar_lea.vmem %s4321_s1, %s2737_s11  ;;  %v724_v32 = vadd.f32 %v3797_v22, %v706_v26  ;;  %v725_v33 = vadd.f32 %v3797_v22, %v707_v27  ;;  %v726_v34 = vadd.f32 %v3797_v22, %v708_v28  ;;  %s4380_s26 = smov (!%p3822_p10, %s4378_s26), 15  ;;  %v727_v26 = vadd.f32 %v3797_v22, %v709_v16 }
  0x21   : > { %v3032_v23 = vld [vmem:[%s598_s18] sm:$0xff]   ;;  %v669_v24 = vld [vmem:[%s598_s18 + $0x8] sm:$0x1]  ;;  %s3805_s24 = scalar_select %p796_p9, 1, 0  ;;  %v729_v28 = vadd.f32 %v3797_v22, %v711_v18 }
  0x22   : > { %3192 = vmatpush3.bf16.msra.mxu0 %v3478_v8  ;;  %v3033_v29 = vunpack.c.l.bf16 %v3032_v23  ;;  %v3034_v30 = vunpack.c.h.bf16 %v3032_v23  ;;  %v768_v31 = vunpack.c.l.bf16 %v669_v24  ;;  %v736_v39 = vmax.f32 %v724_v32, 0.0  ;;  %s3889_s11 = smul.u32 3, %s4380_s26  ;;  %p2991_p12 = scmp.ne.s32.totalorder %s3576_s21, 0 }
  0x23   : > { %3216 = vmatpush3.bf16.msra.mxu1 %v3479_v10  ;;  %3193 = vmatprep.subr.bf16.mxu0 %v3480_v11  ;;  %s798_s10 = scvt.s32.f32 %s3805_s24  ;;  %v737_v40 = vmax.f32 %v725_v33, 0.0  ;;  %v738_v41 = vmax.f32 %v726_v34, 0.0  ;;  %v696_v32 = vunpack.c.l.bf16 %v663_v7  ;;  %v3491_v33 = vld [vmem:[%s4325_s5 + $0xe8] sm:$0xff]   ;;  %v739_v34 = vmax.f32 %v727_v26, 0.0 }
  0x24   : > { %3217 = vmatprep.subr.bf16.mxu1 %v3481_v12  ;;  %v769_v36 = vmul.f32 %v3033_v29, %v3780_v14  ;;  %v770_v37 = vmul.f32 %v3034_v30, %v3780_v14  ;;  %v771_v38 = vmul.f32 %v3780_v14, %v768_v31  ;;  %v754_v47 = vsel %vm679_vm0, %v736_v39, 0.0  ;;  %s613_s26 = sadd.s32 %s3889_s11, %s3722_s14 }
  0x25   : > { %v799_v46 = vstv %s798_s10  ;;  %v756_v48 = vsel %vm684_vm1, %v738_v41, 0.0  ;;  %v3843_v53 = vpack.c.bf16 %v737_v40, %v754_v47  ;;  %v3865_v2 = vpack.c.bf16 %v737_v40, %v736_v39  ;;  %v3488_v47 = vld [vmem:[%s4325_s5 + $0xb0] sm:$0xff]   ;;  %s2742_s19 = sshll.u32 %s613_s26, 2  ;;  %s2745_s10 = sshll.u32 %s4372_s22, 5 }
  0x26   : > { %3194 = vmatpush3.bf16.msra.mxu0 %v3480_v11  ;;  %v772_v43 = vadd.f32 %v3797_v22, %v769_v36  ;;  %v773_v44 = vadd.f32 %v3797_v22, %v770_v37  ;;  %v774_v45 = vadd.f32 %v3797_v22, %v771_v38  ;;  %v3854_v55 = vpack.c.bf16 %v756_v48, %v756_v48  ;;  %s615_s9 = scalar_lea.vmem %s4322_s2, %s2742_s19 }
  0x27   : > { %3218 = vmatpush3.bf16.msra.mxu1 %v3481_v12  ;;  %3195 = vmatprep.subr.bf16.mxu0 %v3482_v17  ;;  %v852_v59 = vshrl.u32 %v3843_v53, 16  ;;  %v854_v0 = vshll.u32 %v3843_v53, 16  ;;  %v3030_v29 = vunpack.c.h.bf16 %v3059_v6  ;;  %v741_v36 = vmax.f32 %v729_v28, 0.0  ;;  %v664_v6 = vld [vmem:[%s3766_s16 + $0x24] sm:$0xff]   ;;  %v3494_v28 = vld [vmem:[%s4325_s5 + $0x98] sm:$0xff]  }
  0x28   : > { %3219 = vmatprep.subr.bf16.mxu1 %v3483_v21  ;;  %v775_v50 = vmax.f32 %v772_v43, 0.0  ;;  %v776_v51 = vmax.f32 %v773_v44, 0.0  ;;  %v777_v52 = vmax.f32 %v774_v45, 0.0  ;;  %v859_v1 = vshll.u32 %v3854_v55, 16  ;;  %v3538_v12 = vld [vmem:[%s4325_s5 + $0x218] sm:$0xff]  }
  0x29   : > { %v856_v10 = vrot.slane %v854_v0, 1  ;;  %v712_v37 = vmul.f32 %v3029_v19, %v3780_v14  ;;  %v713_v40 = vmul.f32 %v3030_v29, %v3780_v14  ;;  %v714_v41 = vmul.f32 %v3780_v14, %v696_v32  ;;  %v3492_v19 = vld [vmem:[%s4325_s5 + $0xa0] sm:$0xff]  }
  0x2a   : > { %3196 = vmatpush3.bf16.msra.mxu0 %v3482_v17  ;;  %v778_v56 = vsel %vm679_vm0, %v775_v50, 0.0  ;;  %v780_v57 = vsel %vm684_vm1, %v777_v52, 0.0  ;;  %v801_v58 = vmul.f32 %v799_v46, %v776_v51  ;;  %v861_v11 = vrot.slane %v859_v1, 1  ;;  %v3493_v52 = vld [vmem:[%s4325_s5 + $0xe0] sm:$0xff]  }
  0x2b   : > { %3220 = vmatpush3.bf16.msra.mxu1 %v3483_v21  ;;  %3197 = vmatprep.subr.bf16.mxu0 %v3484_v35  ;;  %v800_v62 = vmul.f32 %v799_v46, %v778_v56  ;;  %v802_v63 = vmul.f32 %v799_v46, %v780_v57  ;;  %v710_v17 = vmul.f32 %v3780_v14, %v692_v4  ;;  %v759_v43 = vsel %vm684_vm1, %v741_v36, 0.0 }
  0x2c   : > { %3221 = vmatprep.subr.bf16.mxu1 %v3485_v42  ;;  %v857_v24 = vor.u32 %v856_v10, %v852_v59  ;;  %v730_v45 = vadd.f32 %v3797_v22, %v712_v37  ;;  %v3925_v50 = vpack.c.bf16 %v759_v43, %v759_v43  ;;  %v731_v51 = vadd.f32 %v3797_v22, %v713_v40  ;;  %v666_v43 = vld [vmem:[%s3766_s16 + $0x2c] sm:$0x1]  ;;  %s804_s16 = scalar_select %p803_p11, 1, 0 }
  0x2d   : > { %v3872_v8 = vpack.c.bf16 %v801_v58, %v800_v62  ;;  %v3874_v9 = vpack.c.bf16 %v802_v63, %v802_v63  ;;  %v728_v27 = vadd.f32 %v3797_v22, %v710_v17  ;;  %v3490_v63 = vld [vmem:[%s4325_s5 + $0xa8] sm:$0xff]   ;;  %v697_v18 = vunpack.c.l.bf16 %v664_v6 }
  0x2e   : > { %3198 = vmatpush3.bf16.msra.mxu0 %v3484_v35  ;;  %v3908_v39 = vsel %vm838_vm2, %v857_v24, %v861_v11  ;;  %v742_v56 = vmax.f32 %v730_v45, 0.0  ;;  %v871_v59 = vshll.u32 %v3925_v50, 16  ;;  %v743_v60 = vmax.f32 %v731_v51, 0.0  ;;  %v3505_v51 = vld [vmem:[%s4325_s5 + $0x170] sm:$0xff]   ;;  %s805_s20 = scvt.s32.f32 %s804_s16  ;;  %s4230_s16 = sadd.s32 %s2745_s10, %s2744_s30 }
  0x2f   : > { %3222 = vmatpush3.bf16.msra.mxu1 %v3485_v42  ;;  %3231 = vmatprep.subr.bf16.mxu0 %v3841_v49  ;;  %v840_v20 = vshrl.u32 %v3872_v8, 16  ;;  %v842_v21 = vshll.u32 %v3872_v8, 16  ;;  %v847_v23 = vshll.u32 %v3874_v9, 16  ;;  %v740_v35 = vmax.f32 %v728_v27, 0.0  ;;  %s2746_s15 = sshll.u32 %s4230_s16, 2 }
  0x30   : > { %3255 = vmatprep.subr.bf16.mxu1 %v3487_v54  ;;  %3223 = vmatprep.mubr.bf16.mxu1 %v3872_v8  ;;  %v757_v42 = vsel %vm679_vm0, %v739_v34, 0.0  ;;  %v760_v62 = vsel %vm679_vm0, %v742_v56, 0.0  ;;  %v873_v1 = vrot.slane %v871_v59, 1  ;;  %v3947_v4 = vpack.c.bf16 %v743_v60, %v742_v56  ;;  %s4238_s23 = scalar_lea.vmem %s4326_s6, %s2746_s15  ;;  %s640_s14 = scalar_lea.vmem %s4328_s8, %s2746_s15 }
  0x31   : > { %v844_v30 = vrot.slane %v842_v21, 1  ;;  %v849_v31 = vrot.slane %v847_v23, 1  ;;  %v3916_v44 = vpack.c.bf16 %v740_v35, %v739_v34  ;;  %v3923_v48 = vpack.c.bf16 %v740_v35, %v757_v42  ;;  %v3501_v35 = vld [vmem:[%s4325_s5 + $0xc0] sm:$0xff]  }
  0x32   : > { %3224 = vmatmul.mubr.msk.bf16.vlgmr.msra.gmra.mxu1 %vm3878_vm4, %v3865_v2  ;;  %v3945_v3 = vpack.c.bf16 %v743_v60, %v760_v62  ;;  %v1143_v16 = vrot.slane %v3872_v8, 1  ;;  %v1144_v17 = vrot.slane %v3874_v9, 1  ;;  %v698_v8 = vunpack.c.h.bf16 %v664_v6 }
  0x33   : > { %3256 = vmatpush3.bf16.msra.mxu1 %v3487_v54  ;;  %v845_v38 = vor.u32 %v844_v30, %v840_v20  ;;  %v732_v54 = vadd.f32 %v3797_v22, %v714_v41  ;;  %v864_v57 = vshrl.u32 %v3923_v48, 16  ;;  %v866_v58 = vshll.u32 %v3923_v48, 16  ;;  %3227 = vmatprep.mubr.msk.bf16.mxu1 %vm3878_vm4, %v3916_v44  ;;  %v3503_v41 = vld [vmem:[%s4325_s5 + $0x178] sm:$0xff]  }
  0x34   : > { %3257 = vmatprep.subr.bf16.mxu1 %v3489_v15  ;;  %v876_v11 = vshrl.u32 %v3945_v3, 16  ;;  %v715_v9 = vmul.f32 %v3780_v14, %v697_v18  ;;  %v1145_v27 = vsel %vm1142_vm5, %v1143_v16, %v1144_v17  ;;  %v716_v30 = vmul.f32 %v3780_v14, %v698_v8  ;;  %v3506_v16 = vld [vmem:[%s4325_s5 + $0x128] sm:$0xff]  }
  0x35   : > { %v850_v46 = vsel %vm838_vm2, %v845_v38, %v849_v31  ;;  %v744_v61 = vmax.f32 %v732_v54, 0.0  ;;  %v868_v0 = vrot.slane %v866_v58, 1  ;;  %v3499_v31 = vld [vmem:[%s4325_s5 + $0xc8] sm:$0xff]   ;;  %v699_v45 = vunpack.c.l.bf16 %v666_v43  ;;  %v3502_v54 = vld [vmem:[%s4325_s5 + $0x138] sm:$0xff]  }
  0x36   : > { %3199 = vmatprep.mubr.bf16.mxu0 %v850_v46  ;;  %v733_v32 = vadd.f32 %v3797_v22, %v715_v9  ;;  %v734_v34 = vadd.f32 %v3797_v22, %v716_v30  ;;  %v3498_v38 = vld [vmem:[%s4325_s5 + $0x88] sm:$0xff]   ;;  %v3500_v46 = vld [vmem:[%s4325_s5 + $0x80] sm:$0xff]   ;;  %v1149_v58 = vrot.slane %v3923_v48, 1  ;;  %v1150_v59 = vrot.slane %v3925_v50, 1  ;;  %v3504_v50 = vld [vmem:[%s4325_s5 + $0x130] sm:$0xff]  }
  0x37   : > { %3258 = vmatpush3.bf16.msra.mxu1 %v3489_v15  ;;  %3200 = vmatmul.mubr.bf16.vlgmr.msra.gmra.mxu0 %v3908_v39  ;;  %v762_v5 = vsel %vm684_vm1, %v744_v61, 0.0  ;;  %v869_v7 = vor.u32 %v868_v0, %v864_v57  ;;  %v878_v15 = vshll.u32 %v3945_v3, 16  ;;  %v1147_v57 = vrot.slane %v3854_v55, 1  ;;  %v3507_v55 = vld [vmem:[%s4325_s5 + $0x168] sm:$0xff]  }
  0x38   : > { %3259 = vmatprep.subr.bf16.mxu1 %v3491_v33  ;;  %3232 = vmatpush3.bf16.msra.mxu0 %v3841_v49  ;;  %v3495_v49 = vld [vmem:[%s4325_s5 + $0xd8] sm:$0xff]   ;;  %v3955_v10 = vpack.c.bf16 %v762_v5, %v762_v5  ;;  %v745_v36 = vmax.f32 %v733_v32, 0.0  ;;  %v746_v40 = vmax.f32 %v734_v34, 0.0  ;;  %v4046_v0 = vsel %vm1142_vm5, %v1149_v58, %v1150_v59 }
  0x39   : > { %3233 = vmatprep.subr.bf16.mxu0 %v3488_v47  ;;  %v3971_v20 = vsel %vm838_vm2, %v869_v7, %v873_v1  ;;  %v880_v21 = vrot.slane %v878_v15, 1  ;;  %v1152_v5 = vrot.slane %v3945_v3, 1  ;;  %v3509_v7 = vld [vmem:[%s4325_s5 + $0x160] sm:$0xff]   ;;  %v806_v32 = vstv %s805_s20 }
  0x3a   : > { %3228 = vmatmul.mubr.msk.bf16.gmra.mxu1 %vm3878_vm4, %v3947_v4  ;;  %v883_v23 = vshll.u32 %v3955_v10, 16  ;;  %3203 = vmatprep.mubr.bf16.mxu0 %v3971_v20  ;;  %v763_v37 = vsel %vm679_vm0, %v745_v36, 0.0  ;;  %v4048_v1 = vpack.c.bf16 %v746_v40, %v745_v36  ;;  %v1153_v6 = vrot.slane %v3955_v10, 1  ;;  %v3036_v10 = vld [vmem:[%s615_s9] sm:$0xff]  }
  0x3b   : > { %3260 = vmatpush3.bf16.msra.mxu1 %v3491_v33  ;;  %3271 = vmatprep.mubr.msk.bf16.mxu1 %vm3878_vm4, %v3865_v2  ;;  %v3497_v2 = vld [vmem:[%s4325_s5 + $0xd0] sm:$0xff]   ;;  %v881_v24 = vor.u32 %v880_v21, %v876_v11  ;;  %v4007_v42 = vpack.c.bf16 %v746_v40, %v763_v37  ;;  %v3037_v17 = vunpack.c.l.bf16 %v3036_v10  ;;  %v3038_v18 = vunpack.c.h.bf16 %v3036_v10 }
  0x3c   : > { %3261 = vmatprep.subr.bf16.mxu1 %v3493_v52  ;;  %3234 = vmatpush3.bf16.msra.mxu0 %v3488_v47  ;;  %v885_v26 = vrot.slane %v883_v23, 1  ;;  %v3496_v33 = vld [vmem:[%s4325_s5 + $0x90] sm:$0xff]   ;;  %v1146_v47 = vrot.slane %v3843_v53, 1  ;;  %v672_v23 = vld [vmem:[%s615_s9 + $0x8] sm:$0x1]  ;;  %v4078_v8 = vsel %vm1142_vm5, %v1152_v5, %v1153_v6 }
  0x3d   : > { %3235 = vmatprep.subr.bf16.mxu0 %v3490_v63  ;;  %v1438_v56 = vshll.u32 %v4007_v42, 16  ;;  %v1436_v61 = vshrl.u32 %v4007_v42, 16  ;;  %v785_v9 = vmul.f32 %v3038_v18, %v3780_v14  ;;  %v3523_v5 = vld [vmem:[%s4325_s5 + $0x1e8] sm:$0xff]   ;;  %v3520_v6 = vld [vmem:[%s4325_s5 + $0x1b0] sm:$0xff]   ;;  %v3532_v18 = vld [vmem:[%s4325_s5 + $0x180] sm:$0xff]  }
  0x3e   : > { %v3984_v29 = vsel %vm838_vm2, %v881_v24, %v885_v26  ;;  %v783_v24 = vunpack.c.l.bf16 %v672_v23  ;;  %v3508_v26 = vld [vmem:[%s4325_s5 + $0x120] sm:$0xff]   ;;  %v3528_v10 = vld [vmem:[%s4325_s5 + $0x190] sm:$0xff]  }
  0x3f   : > { %3262 = vmatpush3.bf16.msra.mxu1 %v3493_v52  ;;  %3204 = vmatmul.mubr.bf16.gmra.mxu0 %v3984_v29  ;;  %v717_v52 = vmul.f32 %v3780_v14, %v699_v45  ;;  %v1440_v62 = vrot.slane %v1438_v56, 1  ;;  %v3517_v45 = vld [vmem:[%s4325_s5 + $0x140] sm:$0xff]   ;;  %v3535_v23 = vld [vmem:[%s4325_s5 + $0x230] sm:$0xff]  }
  0x40   : > { %3263 = vmatprep.subr.bf16.mxu1 %v3495_v49  ;;  %3236 = vmatpush3.bf16.msra.mxu0 %v3490_v63  ;;  %v1148_v63 = vsel %vm1142_vm5, %v1146_v47, %v1147_v57  ;;  %v786_v30 = vmul.f32 %v3780_v14, %v783_v24 }
  0x41   : > { %3237 = vmatprep.subr.bf16.mxu0 %v3492_v19  ;;  %3247 = vmatprep.mubr.bf16.mxu0 %v1145_v27  ;;  %v735_v53 = vadd.f32 %v3797_v22, %v717_v52  ;;  %v1441_v11 = vor.u32 %v1440_v62, %v1436_v61  ;;  %v3514_v52 = vld [vmem:[%s4325_s5 + $0x108] sm:$0xff]   ;;  %v3521_v62 = vld [vmem:[%s4325_s5 + $0x1f0] sm:$0xff]  }
  0x43   : > { %3264 = vmatpush3.bf16.msra.mxu1 %v3495_v49  ;;  %v747_v60 = vmax.f32 %v735_v53, 0.0  ;;  %v3519_v53 = vld [vmem:[%s4325_s5 + $0x1f8] sm:$0xff]  }
  0x44   : > { %3265 = vmatprep.subr.bf16.mxu1 %v3497_v2  ;;  %3238 = vmatpush3.bf16.msra.mxu0 %v3492_v19  ;;  %v3511_v19 = vld [vmem:[%s4325_s5 + $0x158] sm:$0xff]  }
  0x45   : > { %3239 = vmatprep.subr.bf16.mxu0 %v3494_v28  ;;  %v765_v48 = vsel %vm684_vm1, %v747_v60, 0.0  ;;  %v3516_v60 = vld [vmem:[%s4325_s5 + $0x100] sm:$0xff]  }
  0x46   : > { %v4050_v49 = vpack.c.bf16 %v765_v48, %v765_v48  ;;  %v1588_v48 = vrot.slane %v4007_v42, 1  ;;  %v3525_v42 = vld [vmem:[%s4325_s5 + $0x1e0] sm:$0xff]  }
  0x47   : > { %3266 = vmatpush3.bf16.msra.mxu1 %v3497_v2  ;;  %v784_v2 = vmul.f32 %v3037_v17, %v3780_v14  ;;  %v3510_v14 = vld [vmem:[%s4325_s5 + $0x118] sm:$0xff]   ;;  %v3530_v17 = vld [vmem:[%s4325_s5 + $0x188] sm:$0xff]  }
  0x48   : > { %3267 = vmatprep.subr.bf16.mxu1 %v3499_v31  ;;  %3240 = vmatpush3.bf16.msra.mxu0 %v3494_v28  ;;  %v1443_v15 = vshll.u32 %v4050_v49, 16  ;;  %v788_v28 = vadd.f32 %v3797_v22, %v785_v9 }
  0x49   : > { %3241 = vmatprep.subr.bf16.mxu0 %v3496_v33  ;;  %v787_v27 = vadd.f32 %v3797_v22, %v784_v2 }
  0x4a   : > { %v1445_v3 = vrot.slane %v1443_v15, 1  ;;  %v791_v34 = vmax.f32 %v788_v28, 0.0  ;;  %v3524_v15 = vld [vmem:[%s4325_s5 + $0x1a0] sm:$0xff]  }
  0x4b   : > { %3268 = vmatpush3.bf16.msra.mxu1 %v3499_v31  ;;  %v3513_v31 = vld [vmem:[%s4325_s5 + $0x150] sm:$0xff]  }
  0x4c   : > { %3269 = vmatprep.subr.bf16.mxu1 %v3501_v35  ;;  %3242 = vmatpush3.bf16.msra.mxu0 %v3496_v33  ;;  %v4075_v21 = vsel %vm838_vm2, %v1441_v11, %v1445_v3  ;;  %v790_v33 = vmax.f32 %v787_v27, 0.0  ;;  %v808_v37 = vmul.f32 %v806_v32, %v791_v34  ;;  %v3527_v11 = vld [vmem:[%s4325_s5 + $0x1d8] sm:$0xff]   ;;  %v3531_v3 = vld [vmem:[%s4325_s5 + $0x1c8] sm:$0xff]  }
  0x4d   : > { %3243 = vmatprep.subr.bf16.mxu0 %v3498_v38 }
  0x4e   : > { %v793_v36 = vsel %vm679_vm0, %v790_v33, 0.0 }
  0x4f   : > { %3270 = vmatpush3.bf16.msra.mxu1 %v3501_v35  ;;  %v789_v35 = vadd.f32 %v3797_v22, %v786_v30  ;;  %v807_v40 = vmul.f32 %v806_v32, %v793_v36 }
  0x50   : > { %3303 = vmatprep.subr.bf16.mxu1 %v3503_v41  ;;  %3244 = vmatpush3.bf16.msra.mxu0 %v3498_v38 }
  0x51   : > { %3245 = vmatprep.subr.bf16.mxu0 %v3500_v46  ;;  %v792_v38 = vmax.f32 %v789_v35, 0.0  ;;  %v4107_v43 = vpack.c.bf16 %v808_v37, %v807_v40 }
  0x52   : > { %3272 = vmatmul.mubr.msk.bf16.vlgmr.msra.gmra.mxu1 %vm3878_vm4, %v3916_v44 }
  0x53   : > { %3304 = vmatpush3.bf16.msra.mxu1 %v3503_v41  ;;  %3275 = vmatprep.mubr.msk.bf16.mxu1 %vm3878_vm4, %v3947_v4  ;;  %v795_v22 = vsel %vm684_vm1, %v792_v38, 0.0  ;;  %v3512_v41 = vld [vmem:[%s4325_s5 + $0x110] sm:$0xff]   ;;  %v1869_v47 = vshrl.u32 %v4107_v43, 16  ;;  %v1871_v25 = vshll.u32 %v4107_v43, 16 }
  0x54   : > { %3305 = vmatprep.subr.bf16.mxu1 %v3505_v51  ;;  %3246 = vmatpush3.bf16.msra.mxu0 %v3500_v46  ;;  %v809_v13 = vmul.f32 %v806_v32, %v795_v22 }
  0x55   : > { %3279 = vmatprep.subr.bf16.mxu0 %v3502_v54 }
  0x56   : > { %v821_v46 = vpack.c.bf16 %v809_v13, %v809_v13 }
  0x57   : > { %3306 = vmatpush3.bf16.msra.mxu1 %v3505_v51  ;;  %3248 = vmatmul.mubr.bf16.vlgmr.msra.gmra.mxu0 %v1148_v63  ;;  %v2021_v51 = vrot.slane %v4107_v43, 1 }
  0x58   : > { %3307 = vmatprep.subr.bf16.mxu1 %v3507_v55  ;;  %3280 = vmatpush3.bf16.msra.mxu0 %v3502_v54  ;;  %v1873_v54 = vrot.slane %v1871_v25, 1  ;;  %v1876_v56 = vshll.u32 %v821_v46, 16  ;;  %v2022_v57 = vrot.slane %v821_v46, 1 }
  0x59   : > { %3251 = vmatprep.mubr.bf16.mxu0 %v4046_v0  ;;  %3281 = vmatprep.subr.bf16.mxu0 %v3504_v50 }
  0x5a   : > { %3276 = vmatmul.mubr.msk.bf16.gmra.mxu1 %vm3878_vm4, %v4048_v1  ;;  %v1874_v58 = vor.u32 %v1873_v54, %v1869_v47  ;;  %v1878_v59 = vrot.slane %v1876_v56, 1 }
  0x5b   : > { %3308 = vmatpush3.bf16.msra.mxu1 %v3507_v55  ;;  %3319 = vmatprep.mubr.bf16.mxu1 %v1148_v63  ;;  %v4122_v55 = vsel %vm1142_vm5, %v2021_v51, %v2022_v57  ;;  %v3518_v63 = vld [vmem:[%s4325_s5 + $0x1b8] sm:$0xff]  }
  0x5c   : > { %3309 = vmatprep.subr.bf16.mxu1 %v3509_v7  ;;  %3282 = vmatpush3.bf16.msra.mxu0 %v3504_v50  ;;  %v4128_v61 = vsel %vm838_vm2, %v1874_v58, %v1878_v59  ;;  %v1589_v50 = vrot.slane %v4050_v49, 1  ;;  %v3522_v49 = vld [vmem:[%s4325_s5 + $0x1a8] sm:$0xff]  }
  0x5d   : > { %3283 = vmatprep.subr.bf16.mxu0 %v3506_v16 }
  0x5f   : > { %3310 = vmatpush3.bf16.msra.mxu1 %v3509_v7  ;;  %3252 = vmatmul.mubr.bf16.gmra.mxu0 %v4078_v8  ;;  %v4147_v7 = vsel %vm1142_vm5, %v1588_v48, %v1589_v50 }
  0x60   : > { %3311 = vmatprep.subr.bf16.mxu1 %v3511_v19  ;;  %3284 = vmatpush3.bf16.msra.mxu0 %v3506_v16  ;;  %v3529_v16 = vld [vmem:[%s4325_s5 + $0x1d0] sm:$0xff]  }
  0x61   : > { %3295 = vmatprep.mubr.bf16.mxu0 %v3908_v39  ;;  %3285 = vmatprep.subr.bf16.mxu0 %v3508_v26  ;;  %v3515_v39 = vld [vmem:[%s4325_s5 + $0x148] sm:$0xff]  }
  0x63   : > { %3312 = vmatpush3.bf16.msra.mxu1 %v3511_v19  ;;  %v3534_v19 = vld [vmem:[%s4325_s5 + $0x238] sm:$0xff]  }
  0x64   : > { %3313 = vmatprep.subr.bf16.mxu1 %v3513_v31  ;;  %3286 = vmatpush3.bf16.msra.mxu0 %v3508_v26 }
  0x65   : > { %3287 = vmatprep.subr.bf16.mxu0 %v3510_v14 }
  0x67   : > { %3314 = vmatpush3.bf16.msra.mxu1 %v3513_v31 }
  0x68   : > { %3315 = vmatprep.subr.bf16.mxu1 %v3515_v39  ;;  %3288 = vmatpush3.bf16.msra.mxu0 %v3510_v14 }
  0x69   : > { %3289 = vmatprep.subr.bf16.mxu0 %v3512_v41 }
  0x6b   : > { %3316 = vmatpush3.bf16.msra.mxu1 %v3515_v39 }
  0x6c   : > { %3317 = vmatprep.subr.bf16.mxu1 %v3517_v45  ;;  %3290 = vmatpush3.bf16.msra.mxu0 %v3512_v41 }
  0x6d   : > { %3291 = vmatprep.subr.bf16.mxu0 %v3514_v52 }
  0x6f   : > { %3318 = vmatpush3.bf16.msra.mxu1 %v3517_v45 }
  0x70   : > { %3351 = vmatprep.subr.bf16.mxu1 %v3519_v53  ;;  %3292 = vmatpush3.bf16.msra.mxu0 %v3514_v52 }
  0x71   : > { %3293 = vmatprep.subr.bf16.mxu0 %v3516_v60 }
  0x72   : > { %3320 = vmatmul.mubr.bf16.vlgmr.msra.gmra.mxu1 %v4046_v0 }
  0x73   : > { %3352 = vmatpush3.bf16.msra.mxu1 %v3519_v53  ;;  %3323 = vmatprep.mubr.bf16.mxu1 %v4078_v8 }
  0x74   : > { %3353 = vmatprep.subr.bf16.mxu1 %v3521_v62  ;;  %3294 = vmatpush3.bf16.msra.mxu0 %v3516_v60 }
  0x75   : > { %3327 = vmatprep.subr.bf16.mxu0 %v3518_v63 }
  0x77   : > { %3354 = vmatpush3.bf16.msra.mxu1 %v3521_v62  ;;  %3296 = vmatmul.mubr.bf16.vlgmr.msra.gmra.mxu0 %v3971_v20 }
  0x78   : > { %3355 = vmatprep.subr.bf16.mxu1 %v3523_v5  ;;  %3328 = vmatpush3.bf16.msra.mxu0 %v3518_v63 }
  0x79   : > { %3299 = vmatprep.mubr.bf16.mxu0 %v3984_v29  ;;  %3329 = vmatprep.subr.bf16.mxu0 %v3520_v6 }
  0x7a   : > { %3324 = vmatmul.mubr.bf16.gmra.mxu1 %v4147_v7 }
  0x7b   : > { %3356 = vmatpush3.bf16.msra.mxu1 %v3523_v5  ;;  %3367 = vmatprep.mubr.bf16.mxu1 %v3971_v20  ;;  %v3526_v20 = vld [vmem:[%s4325_s5 + $0x198] sm:$0xff]  }
  0x7c   : > { %3357 = vmatprep.subr.bf16.mxu1 %v3525_v42  ;;  %3330 = vmatpush3.bf16.msra.mxu0 %v3520_v6 }
  0x7d   : > { %3331 = vmatprep.subr.bf16.mxu0 %v3522_v49 }
  0x7f   : > { %3358 = vmatpush3.bf16.msra.mxu1 %v3525_v42  ;;  %3300 = vmatmul.mubr.bf16.gmra.mxu0 %v4075_v21 }
  0x80   : > { %3359 = vmatprep.subr.bf16.mxu1 %v3527_v11  ;;  %3332 = vmatpush3.bf16.msra.mxu0 %v3522_v49 }
  0x81   : > { %3343 = vmatprep.mubr.msk.bf16.mxu0 %vm3878_vm4, %v3916_v44  ;;  %3333 = vmatprep.subr.bf16.mxu0 %v3524_v15  ;;  %v3533_v44 = vld [vmem:[%s4325_s5 + $0x1c0] sm:$0xff]  }
  0x83   : > { %3360 = vmatpush3.bf16.msra.mxu1 %v3527_v11 }
  0x84   : > { %3361 = vmatprep.subr.bf16.mxu1 %v3529_v16  ;;  %3334 = vmatpush3.bf16.msra.mxu0 %v3524_v15 }
  0x85   : > { %3335 = vmatprep.subr.bf16.mxu0 %v3526_v20 }
  0x87   : > { %3362 = vmatpush3.bf16.msra.mxu1 %v3529_v16 }
  0x88   : > { %3363 = vmatprep.subr.bf16.mxu1 %v3531_v3  ;;  %3336 = vmatpush3.bf16.msra.mxu0 %v3526_v20 }
  0x89   : > { %3337 = vmatprep.subr.bf16.mxu0 %v3528_v10 }
  0x8b   : > { %3364 = vmatpush3.bf16.msra.mxu1 %v3531_v3 }
  0x8c   : > { %3365 = vmatprep.subr.bf16.mxu1 %v3533_v44  ;;  %3338 = vmatpush3.bf16.msra.mxu0 %v3528_v10 }
  0x8d   : > { %3339 = vmatprep.subr.bf16.mxu0 %v3530_v17 }
  0x8f   : > { %3366 = vmatpush3.bf16.msra.mxu1 %v3533_v44 }
  0x90   : > { %3340 = vmatpush3.bf16.msra.mxu0 %v3530_v17 }
  0x91   : > { %3341 = vmatprep.subr.bf16.mxu0 %v3532_v18 }
  0x92   : > { %3368 = vmatmul.mubr.bf16.vlgmr.msra.gmra.mxu1 %v3984_v29  ;;  %v3536_v29 = vld [vmem:[%s4325_s5 + $0x228] sm:$0xff]  }
  0x93   : > { %3371 = vmatprep.mubr.bf16.mxu1 %v4075_v21  ;;  %v3537_v21 = vld [vmem:[%s4325_s5 + $0x220] sm:$0xff]  }
  0x94   : > { %3342 = vmatpush3.bf16.msra.mxu0 %v3532_v18 }
  0x95   : > { %3375 = vmatprep.subr.bf16.mxu0 %v3534_v19 }
  0x97   : > { %3344 = vmatmul.mubr.msk.bf16.vlgmr.msra.gmra.mxu0 %vm3878_vm4, %v3947_v4  ;;  %v3539_v4 = vld [vmem:[%s4325_s5 + $0x210] sm:$0xff]  }
  0x98   : > { %3376 = vmatpush3.bf16.msra.mxu0 %v3534_v19  ;;  %3347 = vmatprep.mubr.msk.bf16.mxu0 %vm3878_vm4, %v4048_v1  ;;  %v3540_v1 = vld [vmem:[%s4325_s5 + $0x208] sm:$0xff]  }
  0x99   : > { %3377 = vmatprep.subr.bf16.mxu0 %v3535_v23 }
  0x9a   : > { %3372 = vmatmul.mubr.bf16.gmra.mxu1 %v4128_v61 }
  0x9c   : > { %3378 = vmatpush3.bf16.msra.mxu0 %v3535_v23 }
  0x9d   : > { %3379 = vmatprep.subr.bf16.mxu0 %v3536_v29 }
  0x9f   : > { %3348 = vmatmul.mubr.bf16.gmra.mxu0 %v4107_v43 }
  0xa0   : > { %3380 = vmatpush3.bf16.msra.mxu0 %v3536_v29  ;;  %3391 = vmatprep.mubr.bf16.mxu0 %v4046_v0  ;;  %v3541_v0 = vld [vmem:[%s4325_s5 + $0x200] sm:$0xff]  }
  0xa1   : > { %3381 = vmatprep.subr.bf16.mxu0 %v3537_v21 }
  0xa4   : > { %3382 = vmatpush3.bf16.msra.mxu0 %v3537_v21 }
  0xa5   : > { %3383 = vmatprep.subr.bf16.mxu0 %v3538_v12 }
  0xa8   : > { %3384 = vmatpush3.bf16.msra.mxu0 %v3538_v12 }
  0xa9   : > { %3385 = vmatprep.subr.bf16.mxu0 %v3539_v4 }
  0xac   : > { %3386 = vmatpush3.bf16.msra.mxu0 %v3539_v4 }
  0xad   : > { %3387 = vmatprep.subr.bf16.mxu0 %v3540_v1 }
  0xb0   : > { %3388 = vmatpush3.bf16.msra.mxu0 %v3540_v1 }
  0xb1   : > { %3389 = vmatprep.subr.bf16.mxu0 %v3541_v0 }
  0xb4   : > { %3390 = vmatpush3.bf16.msra.mxu0 %v3541_v0 }
  0xb7   : > { %3392 = vmatmul.mubr.bf16.vlgmr.msra.gmra.mxu0 %v4078_v8 }
  0xb8   : > { %3395 = vmatprep.mubr.bf16.mxu0 %v4147_v7 }
  0xbf   : > { %3396 = vmatmul.mubr.bf16.gmra.mxu0 %v4122_v55 }
  0xf2   : > { %v3225_v24 = vpop.f32.mrf.mxu1 }
  0xf4   : > { %v1103_v28 = vpop.f32.mrf.mxu1 }
  0xf6   : > { %v3226_v31 = vpop.f32.mrf.mxu1 }
  0xf7   : > { %v3201_v2 = vpop.f32.mrf.mxu0 }
  0xf8   : > { %v1106_v33 = vpop.f32.mrf.mxu1  ;;  %v1112_v44 = vadd.f32 %v3225_v24, %v3201_v2 }
  0xf9   : > { %v990_v9 = vpop.f32.mrf.mxu0 }
  0xfa   : > { %v3229_v34 = vpop.f32.mrf.mxu1  ;;  %v1104_v23 = vadd.f32 %v1103_v28, %v990_v9 }
  0xfb   : > { %v3202_v8 = vpop.f32.mrf.mxu0 }
  0xfc   : > { %v1119_v36 = vpop.f32.mrf.mxu1  ;;  %v1115_v17 = vadd.f32 %v3226_v31, %v3202_v8 }
  0xfd   : > { %v993_v26 = vpop.f32.mrf.mxu0 }
  0xfe   : > { %v3230_v38 = vpop.f32.mrf.mxu1  ;;  %v1107_v29 = vadd.f32 %v1106_v33, %v993_v26 }
  0xff   : > { %v3205_v27 = vpop.f32.mrf.mxu0 }
 0x100   : > { %v1122_v40 = vpop.f32.mrf.mxu1 }
 0x101   : > { %v4240_v30 = vpop.f32.mrf.mxu0 }
 0x102   : > { %4350 = vst [vmem:[#allocation7_spill] sm:$0xff] %v4240_v30  ;;  %v1128_v30 = vadd.f32 %v3229_v34, %v3205_v27 }
 0x103   : > { %v3206_v32 = vpop.f32.mrf.mxu0 }
 0x105   : > { %v1009_v35 = vpop.f32.mrf.mxu0 }
 0x106   : > { %v1123_v26 = vadd.f32 %v1122_v40, %v1009_v35 }
 0x109   : > { %v4355_v9 = vld [vmem:[#allocation7_spill] sm:$0xff] }
 0x10a   : > { %v1120_v28 = vadd.f32 %v1119_v36, %v4355_v9 }
 0x112   : > { %v3273_v22 = vpop.f32.mrf.mxu1 }
 0x114   : > { %v1396_v43 = vpop.f32.mrf.mxu1 }
 0x116   : > { %v3274_v45 = vpop.f32.mrf.mxu1 }
 0x117   : > { %v3249_v14 = vpop.f32.mrf.mxu0 }
 0x118   : > { %v1399_v47 = vpop.f32.mrf.mxu1  ;;  %v1291_v21 = vadd.f32 %v3249_v14, %v1112_v44 }
 0x119   : > { %v1258_v37 = vpop.f32.mrf.mxu0 }
 0x11a   : > { %v3277_v51 = vpop.f32.mrf.mxu1  ;;  %v1289_v4 = vadd.f32 %v1258_v37, %v1104_v23 }
 0x11b   : > { %v3250_v39 = vpop.f32.mrf.mxu0 }
 0x11c   : > { %v4242_v56 = vpop.f32.mrf.mxu1  ;;  %v1292_v12 = vadd.f32 %v3250_v39, %v1115_v17  ;;  %v1427_v2 = vadd.f32 %v1396_v43, %v1289_v4 }
 0x11d   : > { %v1261_v41 = vpop.f32.mrf.mxu0  ;;  %4351 = vst [vmem:[#allocation8_spill] sm:$0xff] %v4242_v56 }
 0x11e   : > { %v3278_v53 = vpop.f32.mrf.mxu1  ;;  %v1290_v1 = vadd.f32 %v1261_v41, %v1107_v29  ;;  %v1430_v56 = vadd.f32 %v3274_v45, %v1292_v12 }
 0x11f   : > { %v3253_v13 = vpop.f32.mrf.mxu0 }
 0x120   : > { %v1415_v59 = vpop.f32.mrf.mxu1  ;;  %v1428_v24 = vadd.f32 %v1399_v47, %v1290_v1  ;;  %v1295_v33 = vadd.f32 %v3253_v13, %v1128_v30 }
 0x121   : > { %v1274_v46 = vpop.f32.mrf.mxu0 }
 0x122   : > { %v1293_v41 = vadd.f32 %v1274_v46, %v1120_v28  ;;  %v1433_v45 = vadd.f32 %v3277_v51, %v1295_v33 }
 0x123   : > { %v3254_v25 = vpop.f32.mrf.mxu0 }
 0x124   : > { %v4356_v36 = vld [vmem:[#allocation8_spill] sm:$0xff] }
 0x125   : > { %v1277_v52 = vpop.f32.mrf.mxu0  ;;  %v1431_v35 = vadd.f32 %v4356_v36, %v1293_v41 }
 0x126   : > { %v1294_v23 = vadd.f32 %v1277_v52, %v1123_v26 }
 0x128   : > { %v1432_v30 = vadd.f32 %v1415_v59, %v1294_v23 }
 0x132   : > { %v3321_v55 = vpop.f32.mrf.mxu1 }
 0x134   : > { %v1691_v61 = vpop.f32.mrf.mxu1 }
 0x136   : > { %v3322_v63 = vpop.f32.mrf.mxu1 }
 0x137   : > { %v3297_v54 = vpop.f32.mrf.mxu0 }
 0x138   : > { %v1694_v50 = vpop.f32.mrf.mxu1 }
 0x139   : > { %v1547_v57 = vpop.f32.mrf.mxu0 }
 0x13a   : > { %v4244_v6 = vpop.f32.mrf.mxu1  ;;  %v1578_v39 = vadd.f32 %v1547_v57, %v1427_v2 }
 0x13b   : > { %v3298_v58 = vpop.f32.mrf.mxu0  ;;  %4352 = vst [vmem:[#allocation9_spill] sm:$0xff] %v4244_v6 }
 0x13c   : > { %v4246_v49 = vpop.f32.mrf.mxu1  ;;  %v1581_v31 = vadd.f32 %v3298_v58, %v1430_v56 }
 0x13d   : > { %v1550_v60 = vpop.f32.mrf.mxu0  ;;  %4353 = vst [vmem:[#allocation10_spill] sm:$0xff] %v4246_v49  ;;  %v1429_v49 = vadd.f32 %v3273_v22, %v1291_v21 }
 0x13e   : > { %v3326_v15 = vpop.f32.mrf.mxu1  ;;  %v1579_v37 = vadd.f32 %v1550_v60, %v1428_v24  ;;  %v1725_v22 = vadd.f32 %v3322_v63, %v1581_v31 }
 0x13f   : > { %v3301_v62 = vpop.f32.mrf.mxu0  ;;  %v1580_v8 = vadd.f32 %v3297_v54, %v1429_v49 }
 0x140   : > { %v4248_v20 = vpop.f32.mrf.mxu1  ;;  %v1723_v43 = vadd.f32 %v1694_v50, %v1579_v37  ;;  %v1584_v40 = vadd.f32 %v3301_v62, %v1433_v45 }
 0x141   : > { %v1563_v48 = vpop.f32.mrf.mxu0  ;;  %4354 = vst [vmem:[#allocation11_spill] sm:$0xff] %v4248_v20  ;;  %v1131_v20 = vadd.f32 %v3230_v38, %v3206_v32  ;;  %v1724_v29 = vadd.f32 %v3321_v55, %v1580_v8  ;;  %v1722_v38 = vadd.f32 %v1691_v61, %v1578_v39 }
 0x142   : > { %v1582_v46 = vadd.f32 %v1563_v48, %v1431_v35  ;;  %v4357_v60 = vld [vmem:[#allocation9_spill] sm:$0xff] }
 0x143   : > { %v3302_v5 = vpop.f32.mrf.mxu0  ;;  %v1296_v14 = vadd.f32 %v3254_v25, %v1131_v20  ;;  %v1728_v61 = vadd.f32 %v4357_v60, %v1584_v40 }
 0x144   : > { %v4358_v62 = vld [vmem:[#allocation10_spill] sm:$0xff] }
 0x145   : > { %v1566_v7 = vpop.f32.mrf.mxu0  ;;  %v1434_v27 = vadd.f32 %v3278_v53, %v1296_v14 }
 0x146   : > { %v1583_v52 = vadd.f32 %v1566_v7, %v1432_v30 }
 0x147   : > { %v1585_v13 = vadd.f32 %v3302_v5, %v1434_v27  ;;  %v1726_v5 = vadd.f32 %v4358_v62, %v1582_v46 }
 0x148   : > { %v4359_v20 = vld [vmem:[#allocation11_spill] sm:$0xff] }
 0x149   : > { %v1729_v63 = vadd.f32 %v3326_v15, %v1585_v13 }
 0x152   : > { %v3369_v3 = vpop.f32.mrf.mxu1 }
 0x154   : > { %v1980_v18 = vpop.f32.mrf.mxu1 }
 0x156   : > { %v3370_v0 = vpop.f32.mrf.mxu1 }
 0x157   : > { %v3345_v42 = vpop.f32.mrf.mxu0 }
 0x158   : > { %v1983_v44 = vpop.f32.mrf.mxu1  ;;  %v1862_v47 = vadd.f32 %v3345_v42, %v1724_v29 }
 0x159   : > { %v1829_v11 = vpop.f32.mrf.mxu0 }
 0x15a   : > { %v3373_v32 = vpop.f32.mrf.mxu1  ;;  %v1860_v56 = vadd.f32 %v1829_v11, %v1722_v38  ;;  %v2013_v53 = vadd.f32 %v3369_v3, %v1862_v47  ;;  %v1727_v11 = vadd.f32 %v4359_v20, %v1583_v52 }
 0x15b   : > { %v3346_v16 = vpop.f32.mrf.mxu0 }
 0x15c   : > { %v1863_v54 = vadd.f32 %v3346_v16, %v1725_v22  ;;  %v1996_v58 = vpop.f32.mrf.mxu1  ;;  %v2011_v42 = vadd.f32 %v1980_v18, %v1860_v56 }
 0x15d   : > { %v1832_v10 = vpop.f32.mrf.mxu0 }
 0x15e   : > { %v1861_v57 = vadd.f32 %v1832_v10, %v1723_v43  ;;  %v2014_v55 = vadd.f32 %v3370_v0, %v1863_v54  ;;  %v3374_v48 = vpop.f32.mrf.mxu1 }
 0x15f   : > { %v3349_v19 = vpop.f32.mrf.mxu0 }
 0x160   : > { %v2012_v49 = vadd.f32 %v1983_v44, %v1861_v57  ;;  %v1866_v10 = vadd.f32 %v3349_v19, %v1728_v61  ;;  %v1999_v2 = vpop.f32.mrf.mxu1 }
 0x161   : > { %v1845_v6 = vpop.f32.mrf.mxu0 }
 0x162   : > { %v1864_v4 = vadd.f32 %v1845_v6, %v1726_v5  ;;  %v2017_v8 = vadd.f32 %v3373_v32, %v1866_v10 }
 0x163   : > { %v3350_v17 = vpop.f32.mrf.mxu0 }
 0x164   : > { %v1867_v3 = vadd.f32 %v3350_v17, %v1729_v63  ;;  %v2015_v9 = vadd.f32 %v1996_v58, %v1864_v4 }
 0x165   : > { %v1848_v34 = vpop.f32.mrf.mxu0 }
 0x166   : > { %v1865_v1 = vadd.f32 %v1848_v34, %v1727_v11  ;;  %v2018_v19 = vadd.f32 %v3374_v48, %v1867_v3 }
 0x168   : > { %v2016_v28 = vadd.f32 %v1999_v2, %v1865_v1 }
 0x177   : > { %v3393_v25 = vpop.f32.mrf.mxu0 }
 0x178   : > { %v2157_v16 = vadd.f32 %v3393_v25, %v2013_v53 }
 0x179   : > { %v2124_v51 = vpop.f32.mrf.mxu0 }
 0x17a   : > { %v2155_v21 = vadd.f32 %v2124_v51, %v2011_v42 }
 0x17b   : > { %v3394_v50 = vpop.f32.mrf.mxu0 }
 0x17c   : > { %v2158_v59 = vadd.f32 %v3394_v50, %v2014_v55 }
 0x17d   : > { %v2127_v7 = vpop.f32.mrf.mxu0 }
 0x17e   : > { %v3047_v15 = vpack.c.bf16 %v2158_v59, %v2157_v16  ;;  %v2156_v12 = vadd.f32 %v2127_v7, %v2012_v49 }
 0x17f   : > { %v3397_v18 = vpop.f32.mrf.mxu0 }
 0x180   : > { %3060 = vst [vmem:[%s640_s14 + $0x8] sm:$0xff] %v3047_v15   ;;  %v3042_v0 = vpack.c.bf16 %v2156_v12, %v2155_v21  ;;  %v2161_v26 = vadd.f32 %v3397_v18, %v2017_v8 }
 0x181   : > { %v2140_v24 = vpop.f32.mrf.mxu0 }
 0x182   : > { %3043 = vst [vmem:[%s640_s14] sm:$0xff] %v3042_v0   ;;  %v2159_v44 = vadd.f32 %v2140_v24, %v2015_v9 }
 0x183   : > { %v3398_v31 = vpop.f32.mrf.mxu0 }
 0x184   : > { %v2162_v33 = vadd.f32 %v3398_v31, %v2018_v19 }
 0x185   : > { %v2143_v14 = vpop.f32.mrf.mxu0 }
 0x186   : > { %v3057_v17 = vpack.c.bf16 %v2162_v33, %v2161_v26  ;;  %v2160_v39 = vadd.f32 %v2143_v14, %v2016_v28  ;;  %2206 = sbr.rel (%p2991_p12) target bundleno = 397 (0x18d), region = 56 }
 0x188   : > { %3062 = vst [vmem:[%s640_s14 + $0x18] sm:$0xff] %v3057_v17   ;;  %v3052_v37 = vpack.c.bf16 %v2160_v39, %v2159_v44 }
 0x18a   : > { %3061 = vst [vmem:[%s640_s14 + $0x10] sm:$0xff] %v3052_v37  }
 0x18b   : > { %v3595_v6 = vmov 0.0  }
 0x18c   : > { %2207 = vst [vmem:[%s3728_s17] sm:$0x1] %v3595_v6  ;;  %2208 = vst [vmem:[%s3735_s27] sm:$0x1] %v3595_v6 }
 0x18d PF: > { %v2210_v41 = vadd.f32 %v2156_v12, %v2155_v21  ;;  %v2226_v23 = vmul.f32 %v2155_v21, %v2155_v21  ;;  %v2227_v29 = vmul.f32 %v2156_v12, %v2156_v12  ;;  %v2228_v22 = vmul.f32 %v2157_v16, %v2157_v16  ;;  %v3542_v45 = vld [vmem:[%s4327_s7 + $0x38] sm:$0xff]   ;;  %v3543_v38 = vld [vmem:[%s4327_s7 + $0x30] sm:$0xff]   ;;  %v3544_v36 = vld [vmem:[%s4327_s7 + $0x28] sm:$0xff]  }
 0x18e   : > { %v2229_v32 = vmul.f32 %v2158_v59, %v2158_v59  ;;  %3399 = vmatprep.subr.bf16.mxu1 %v3542_v45  ;;  %v2230_v47 = vmul.f32 %v2159_v44, %v2159_v44  ;;  %v2231_v30 = vmul.f32 %v2160_v39, %v2160_v39  ;;  %v2232_v25 = vmul.f32 %v2161_v26, %v2161_v26  ;;  %v3545_v57 = vld [vmem:[%s4327_s7 + $0x20] sm:$0xff]   ;;  %v3546_v60 = vld [vmem:[%s4327_s7 + $0x18] sm:$0xff]   ;;  %v3547_v49 = vld [vmem:[%s4327_s7 + $0x10] sm:$0xff]  }
 0x18f   : > { %v2211_v27 = vadd.f32 %v2210_v41, %v2157_v16  ;;  %v2234_v34 = vadd.f32 %v2227_v29, %v2226_v23  ;;  %3400 = vmatpush3.bf16.msra.mxu1 %v3542_v45  ;;  %v3550_v46 = vld [vmem:[%s4238_s23] sm:$0xff]   ;;  %v2233_v58 = vmul.f32 %v2162_v33, %v2162_v33  ;;  %v3548_v20 = vld [vmem:[%s4327_s7 + $0x8] sm:$0xff]   ;;  %v3552_v0 = vld [vmem:[%s4238_s23 + $0x10] sm:$0xff]  }
 0x190   : > { %3401 = vmatprep.subr.bf16.mxu1 %v3543_v38  ;;  %3415 = vmatprep.mubr.bf16.mxu1 %v3550_v46  ;;  %v3549_v15 = vld [vmem:[%s4327_s7] sm:$0xff]   ;;  %v3551_v1 = vld [vmem:[%s4238_s23 + $0x8] sm:$0xff]   ;;  %v3553_v2 = vld [vmem:[%s4238_s23 + $0x18] sm:$0xff]  }
 0x191   : > { %v2212_v43 = vadd.f32 %v2211_v27, %v2158_v59  ;;  %v2235_v54 = vadd.f32 %v2234_v34, %v2228_v22 }
 0x193   : > { %v2213_v35 = vadd.f32 %v2212_v43, %v2159_v44  ;;  %v2236_v40 = vadd.f32 %v2235_v54, %v2229_v32  ;;  %3402 = vmatpush3.bf16.msra.mxu1 %v3543_v38  ;;  %v2209_v48 = vld [vmem:[%s3728_s17] sm:$0x1] }
 0x194   : > { %3403 = vmatprep.subr.bf16.mxu1 %v3544_v36  ;;  %v2225_v21 = vld [vmem:[%s3735_s27] sm:$0x1] }
 0x195   : > { %v2214_v13 = vadd.f32 %v2213_v35, %v2160_v39  ;;  %v2237_v56 = vadd.f32 %v2236_v40, %v2230_v47 }
 0x197   : > { %v2215_v52 = vadd.f32 %v2214_v13, %v2161_v26  ;;  %v2238_v51 = vadd.f32 %v2237_v56, %v2231_v30  ;;  %3404 = vmatpush3.bf16.msra.mxu1 %v3544_v36 }
 0x198   : > { %3405 = vmatprep.subr.bf16.mxu1 %v3545_v57 }
 0x199   : > { %v2216_v53 = vadd.f32 %v2215_v52, %v2162_v33  ;;  %v2239_v55 = vadd.f32 %v2238_v51, %v2232_v25 }
 0x19b   : > { %v2217_v61 = vrot.slane %v2216_v53, 4  ;;  %v2240_v63 = vadd.f32 %v2239_v55, %v2233_v58  ;;  %3406 = vmatpush3.bf16.msra.mxu1 %v3545_v57 }
 0x19c   : > { %3407 = vmatprep.subr.bf16.mxu1 %v3546_v60 }
 0x19d   : > { %v2218_v50 = vadd.f32 %v2217_v61, %v2216_v53  ;;  %v2241_v42 = vrot.slane %v2240_v63, 4 }
 0x19f   : > { %v2219_v16 = vrot.slane %v2218_v50, 2  ;;  %v2242_v59 = vadd.f32 %v2241_v42, %v2240_v63  ;;  %3408 = vmatpush3.bf16.msra.mxu1 %v3546_v60 }
 0x1a0   : > { %3409 = vmatprep.subr.bf16.mxu1 %v3547_v49 }
 0x1a1   : > { %v2220_v62 = vadd.f32 %v2219_v16, %v2218_v50  ;;  %v2243_v5 = vrot.slane %v2242_v59, 2 }
 0x1a3   : > { %v2221_v11 = vrot.slane %v2220_v62, 1  ;;  %v2244_v10 = vadd.f32 %v2243_v5, %v2242_v59  ;;  %3410 = vmatpush3.bf16.msra.mxu1 %v3547_v49 }
 0x1a4   : > { %3411 = vmatprep.subr.bf16.mxu1 %v3548_v20 }
 0x1a5   : > { %v2222_v7 = vadd.f32 %v2221_v11, %v2220_v62  ;;  %v2245_v3 = vrot.slane %v2244_v10, 1 }
 0x1a7   : > { %v2223_v12 = vadd.f32 %v2222_v7, %v2209_v48  ;;  %v2246_v18 = vadd.f32 %v2245_v3, %v2244_v10  ;;  %3412 = vmatpush3.bf16.msra.mxu1 %v3548_v20 }
 0x1a8   : > { %3413 = vmatprep.subr.bf16.mxu1 %v3549_v15 }
 0x1a9   : > { %2224 = vst [vmem:[%s3728_s17] sm:$0x1] %v2223_v12  ;;  %v2247_v4 = vadd.f32 %v2246_v18, %v2225_v21 }
 0x1ab   : > { %2248 = vst [vmem:[%s3735_s27] sm:$0x1] %v2247_v4  ;;  %3414 = vmatpush3.bf16.msra.mxu1 %v3549_v15 }
 0x1ae   : > { %3416 = vmatmul.mubr.bf16.vlgmr.msra.gmra.mxu1 %v3551_v1 }
 0x1af   : > { %3419 = vmatprep.mubr.bf16.mxu1 %v3552_v0 }
 0x1b6   : > { %3420 = vmatmul.mubr.bf16.gmra.mxu1 %v3553_v2 }
 0x26e   : > { %v3417_v24 = vpop.f32.mrf.mxu1 }
 0x270   : > { %v2379_v8 = vpop.f32.mrf.mxu1 }
 0x272   : > { %v3418_v19 = vpop.f32.mrf.mxu1 }
 0x274   : > { %v2382_v31 = vpop.f32.mrf.mxu1 }
 0x276   : > { %v3421_v9 = vpop.f32.mrf.mxu1 }
 0x278   : > { %v2395_v28 = vpop.f32.mrf.mxu1  ;;  %2412 = sbr.rel (%p2991_p12) target bundleno = 639 (0x27f), region = 60 }
 0x27a   : > { %v3422_v26 = vpop.f32.mrf.mxu1 }
 0x27c   : > { %v2398_v33 = vpop.f32.mrf.mxu1 }
 0x27d   : > { %v3596_v14 = vmov 0.0  }
 0x27e   : > { %2413 = vst [vmem:[%s3742_s13] sm:$0x1] %v3596_v14  ;;  %2414 = vst [vmem:[%s3755_s25] sm:$0x1] %v3596_v14 }
 0x27f PF: > { %v2416_v44 = vadd.f32 %v2382_v31, %v2379_v8  ;;  %v2432_v17 = vmul.f32 %v2379_v8, %v2379_v8  ;;  %v2433_v39 = vmul.f32 %v2382_v31, %v2382_v31  ;;  %v2434_v37 = vmul.f32 %v3417_v24, %v3417_v24 }
 0x280   : > { %v2435_v41 = vmul.f32 %v3418_v19, %v3418_v19  ;;  %v2436_v22 = vmul.f32 %v2395_v28, %v2395_v28  ;;  %v2437_v32 = vmul.f32 %v2398_v33, %v2398_v33  ;;  %v2438_v43 = vmul.f32 %v3421_v9, %v3421_v9 }
 0x281   : > { %v2417_v6 = vadd.f32 %v3417_v24, %v2416_v44  ;;  %v2440_v23 = vadd.f32 %v2433_v39, %v2432_v17  ;;  %v2439_v36 = vmul.f32 %v3422_v26, %v3422_v26 }
 0x283   : > { %v2418_v29 = vadd.f32 %v3418_v19, %v2417_v6  ;;  %v2441_v45 = vadd.f32 %v2440_v23, %v2434_v37 }
 0x285   : > { %v2419_v27 = vadd.f32 %v2418_v29, %v2395_v28  ;;  %v2442_v34 = vadd.f32 %v2441_v45, %v2435_v41  ;;  %v2415_v60 = vld [vmem:[%s3742_s13] sm:$0x1] }
 0x286   : > { %v2431_v50 = vld [vmem:[%s3755_s25] sm:$0x1] }
 0x287   : > { %v2420_v38 = vadd.f32 %v2419_v27, %v2398_v33  ;;  %v2443_v47 = vadd.f32 %v2442_v34, %v2436_v22 }
 0x289   : > { %v2421_v54 = vadd.f32 %v3421_v9, %v2420_v38  ;;  %v2444_v35 = vadd.f32 %v2443_v47, %v2437_v32 }
 0x28b   : > { %v2422_v30 = vadd.f32 %v3422_v26, %v2421_v54  ;;  %v2445_v40 = vadd.f32 %v2444_v35, %v2438_v43 }
 0x28d   : > { %v2423_v13 = vrot.slane %v2422_v30, 4  ;;  %v2446_v25 = vadd.f32 %v2445_v40, %v2439_v36 }
 0x28f   : > { %v2424_v56 = vadd.f32 %v2423_v13, %v2422_v30  ;;  %v2447_v57 = vrot.slane %v2446_v25, 4 }
 0x291   : > { %v2425_v46 = vrot.slane %v2424_v56, 2  ;;  %v2448_v52 = vadd.f32 %v2447_v57, %v2446_v25 }
 0x293   : > { %v2426_v58 = vadd.f32 %v2425_v46, %v2424_v56  ;;  %v2449_v51 = vrot.slane %v2448_v52, 2 }
 0x295   : > { %v2427_v53 = vrot.slane %v2426_v58, 1  ;;  %v2450_v55 = vadd.f32 %v2449_v51, %v2448_v52 }
 0x297   : > { %v2428_v61 = vadd.f32 %v2427_v53, %v2426_v58  ;;  %v2451_v63 = vrot.slane %v2450_v55, 1 }
 0x299   : > { %v2429_v42 = vadd.f32 %v2428_v61, %v2415_v60  ;;  %v2452_v49 = vadd.f32 %v2451_v63, %v2450_v55 }
 0x29b   : > { %2430 = vst [vmem:[%s3742_s13] sm:$0x1] %v2429_v42  ;;  %v2453_v16 = vadd.f32 %v2452_v49, %v2431_v50 }
 0x29d   : > { %2454 = vst [vmem:[%s3755_s25] sm:$0x1] %v2453_v16 }
 0x29e PF: > { %s4360_s21 = sld [smem:[#allocation4_spill]] }
 0x29f   : > { %s4362_s22 = sld [smem:[#allocation3_spill]] }
 0x2a0   : > { %s4363_s23 = sld [smem:[#allocation5_spill]] }
 0x2a1   : > { %s4364_s24 = sld [smem:[#allocation6_spill]] }
 0x2a4   : > { %s23_s25 = sadd.s32 1, %s4360_s21   ;;  %s4361_s21 = sld [smem:[#allocation2_spill]] }
 0x2a5   : > { %p20_p13 = scmp.ge.s32.totalorder %s23_s25, 10  }
 0x2a7   :  { %22 = sbr.rel (!%p20_p13) target bundleno = 4 (0x4), region = 155 }

</bundles_post_ra>
